<compile_context>
chip_gen: v5e
topology: v5e:2x2
jax: 0.10.0
libtpu: 0.0.40
codegen_flags: <defaults>
</compile_context>

<pallas_src>
import jax
import jax.numpy as jnp
from jax.experimental import pallas as pl
from jax.experimental.pallas import tpu as pltpu

_VMEM = pl.BlockSpec(memory_space=pltpu.MemorySpace.VMEM)
_SMEM = pl.BlockSpec(memory_space=pltpu.MemorySpace.SMEM)

_bf16 = lambda t: t.astype(jnp.bfloat16)


# ------------------------------ Pallas kernel --------------------------------

def _coop_fwd_kernel(
        # GNN image branch
        x_ref, adj_ref, adj_s_ref, w1_ref, w2_ref,
        # text branch
        prompts_ref, pos_ref, eot_oh_ref,
        ln1_g_ref, ln1_b_ref, wqkv_ref, wo_ref,
        ln2_g_ref, ln2_b_ref, mlp_w1_ref, mlp_w2_ref,
        lnf_g_ref, lnf_b_ref, proj_ref,
        scale_ref,
        o_ref):
    """Fused CoOp inference forward -> logits (B, n_cls)."""
    n_cls, L, D = prompts_ref.shape

    # ---- image branch: 2-layer GCN, s_n gather folded into last matmul ----
    h = jnp.dot(_bf16(x_ref[...]), _bf16(w1_ref[...]),
                preferred_element_type=jnp.float32)
    h = jnp.dot(_bf16(adj_ref[...]), _bf16(h),
                preferred_element_type=jnp.float32)
    h = jnp.maximum(h, 0.0)                                    # f32 epilogue
    h = jnp.dot(_bf16(h), _bf16(w2_ref[...]),
                preferred_element_type=jnp.float32)
    img = jnp.dot(_bf16(adj_s_ref[...]), _bf16(h),
                  preferred_element_type=jnp.float32)          # (B, E)

    # ---- text branch ----
    def layer_norm(t, g, b):                                   # f32 VPU/EUP
        mu = jnp.mean(t, axis=-1, keepdims=True)
        tc = t - mu
        var = jnp.mean(tc * tc, axis=-1, keepdims=True)
        return tc * jax.lax.rsqrt(var + 1e-5) * g + b

    # positional embedding add
    x = prompts_ref[...] + pos_ref[...][None]                  # (C, L, D) f32
    xf = x.reshape(n_cls * L, D)

    # pre-LN single-head attention, fused QKV weight, scale folded into q
    hh = layer_norm(xf, ln1_g_ref[...], ln1_b_ref[...])
    qkv = jnp.dot(_bf16(hh), _bf16(wqkv_ref[...]),
                  preferred_element_type=jnp.float32)          # (C*L, 3D)
    qkv = qkv.reshape(n_cls, L, 3 * D)
    q = qkv[:, :, :D] * (float(D) ** -0.5)
    k = qkv[:, :, D:2 * D]
    v = qkv[:, :, 2 * D:]

    s = jnp.einsum("bqd,bkd->bqk", _bf16(q), _bf16(k),
                   preferred_element_type=jnp.float32)         # (C, L, L)
    qi = jax.lax.broadcasted_iota(jnp.int32, (L, L), 0)
    ki = jax.lax.broadcasted_iota(jnp.int32, (L, L), 1)
    s = jnp.where((ki <= qi)[None, :, :], s, -1e30)            # causal mask

    m = jnp.max(s, axis=-1, keepdims=True)
    p = jnp.exp(s - m)                                         # EUP
    p = p * pl.reciprocal(jnp.sum(p, axis=-1, keepdims=True), approx=True)
    a = jnp.einsum("bqk,bkd->bqd", _bf16(p), _bf16(v),
                   preferred_element_type=jnp.float32)         # (C, L, D)
    xf = xf + jnp.dot(_bf16(a.reshape(n_cls * L, D)), _bf16(wo_ref[...]),
                      preferred_element_type=jnp.float32)

    # pre-LN MLP block with gelu
    hh = layer_norm(xf, ln2_g_ref[...], ln2_b_ref[...])
    hh = jnp.dot(_bf16(hh), _bf16(mlp_w1_ref[...]),
                 preferred_element_type=jnp.float32)
    hh = jax.nn.gelu(hh)                                       # f32 epilogue
    xf = xf + jnp.dot(_bf16(hh), _bf16(mlp_w2_ref[...]),
                      preferred_element_type=jnp.float32)

    # ln_final, EOT pooling (one-hot reduce), text projection
    xf = layer_norm(xf, lnf_g_ref[...], lnf_b_ref[...])
    x3 = xf.reshape(n_cls, L, D)
    pooled = jnp.sum(eot_oh_ref[...][:, :, None] * x3, axis=1)  # (C, D)
    txt = jnp.dot(_bf16(pooled), _bf16(proj_ref[...]),
                  preferred_element_type=jnp.float32)           # (C, E)

    # ---- cosine-similarity logits ----
    img_n = img * jax.lax.rsqrt(jnp.sum(img * img, axis=-1, keepdims=True))
    txt_n = txt * jax.lax.rsqrt(jnp.sum(txt * txt, axis=-1, keepdims=True))
    scale = jnp.exp(jnp.full((1, 1), scale_ref[0], dtype=jnp.float32))
    o_ref[...] = scale * jnp.einsum("bd,cd->bc", _bf16(img_n), _bf16(txt_n),
                                    preferred_element_type=jnp.float32)


# ------------------------------ wrapper ---------------------------------------

def coop_logits(p, x, adj, adj_s, prompts, eot_onehot):
    """One fused pallas_call -> logits of shape (B, n_cls)."""
    B = adj_s.shape[0]
    n_cls = prompts.shape[0]
    return pl.pallas_call(
        _coop_fwd_kernel,
        out_shape=jax.ShapeDtypeStruct((B, n_cls), jnp.float32),
        in_specs=[_VMEM] * 19 + [_SMEM],
        out_specs=_VMEM,
    )(x, adj, adj_s, p["gnn_w1"], p["gnn_w2"],
      prompts, p["pos_emb"], eot_onehot,
      p["ln1_g"], p["ln1_b"], p["wqkv"], p["wo"],
      p["ln2_g"], p["ln2_b"], p["mlp_w1"], p["mlp_w2"],
      p["lnf_g"], p["lnf_b"], p["text_proj"],
      p["logit_scale"])


# ------------------------------ model (JAX glue) --------------------------------

def init_params(key, *, in_feat, gnn_hid, gnn_out, n_cls, n_ctx, seq_len,
                ctx_dim, embed_dim):
    ks = jax.random.split(key, 16)
    rn = lambda k, shape, s: (jax.random.normal(k, shape, jnp.float32) * s)
    p = {}
    # synthetic 2-layer GCN standing in for clip_model.gnn (MXU weights in bf16)
    p["gnn_w1"] = rn(ks[0], (in_feat, gnn_hid), 0.1).astype(jnp.bfloat16)
    p["gnn_w2"] = rn(ks[1], (gnn_hid, gnn_out), 0.1).astype(jnp.bfloat16)
    # PromptLearner buffers / params (token_embedding outputs are synthesized)
    p["ctx"] = rn(ks[2], (n_ctx, ctx_dim), 0.02)                       # shared ctx
    p["token_prefix"] = rn(ks[3], (n_cls, 1, ctx_dim), 0.02)           # SOT embed
    p["token_suffix"] = rn(ks[4], (n_cls, seq_len - 1 - n_ctx, ctx_dim), 0.02)
    # TextEncoder (single pre-LN transformer block replaces clip_model.transformer)
    p["pos_emb"] = rn(ks[5], (seq_len, ctx_dim), 0.01)
    p["ln1_g"] = jnp.ones((1, ctx_dim)); p["ln1_b"] = jnp.zeros((1, ctx_dim))
    p["wqkv"] = rn(ks[6], (ctx_dim, 3 * ctx_dim), ctx_dim ** -0.5).astype(jnp.bfloat16)
    p["wo"] = rn(ks[7], (ctx_dim, ctx_dim), ctx_dim ** -0.5).astype(jnp.bfloat16)
    p["ln2_g"] = jnp.ones((1, ctx_dim)); p["ln2_b"] = jnp.zeros((1, ctx_dim))
    p["mlp_w1"] = rn(ks[8], (ctx_dim, 4 * ctx_dim), ctx_dim ** -0.5).astype(jnp.bfloat16)
    p["mlp_w2"] = rn(ks[9], (4 * ctx_dim, ctx_dim), (4 * ctx_dim) ** -0.5).astype(jnp.bfloat16)
    p["lnf_g"] = jnp.ones((1, ctx_dim)); p["lnf_b"] = jnp.zeros((1, ctx_dim))
    p["text_proj"] = rn(ks[10], (ctx_dim, embed_dim), ctx_dim ** -0.5).astype(jnp.bfloat16)
    p["logit_scale"] = jnp.full((1,), jnp.log(1.0 / 0.07), jnp.float32)   # SMEM scalar
    return p


def prompt_learner_forward(p, n_cls):
    # class_token_position == 'end': [prefix, ctx, suffix] along seq dim
    ctx = jnp.broadcast_to(p["ctx"][None], (n_cls,) + p["ctx"].shape)
    return jnp.concatenate([p["token_prefix"], ctx, p["token_suffix"]], axis=1)


def coop_forward(p, s_n, x, adj, tokenized_prompts):
    """CoOp.forward(..., training=False) -> logits of shape (len(s_n), n_cls)."""
    adj_s = adj[s_n]                                           # (B, N) cheap gather
    prompts = prompt_learner_forward(p, tokenized_prompts.shape[0])
    eot = jnp.argmax(tokenized_prompts, axis=-1)               # (n_cls,)
    eot_onehot = jax.nn.one_hot(eot, prompts.shape[1], dtype=jnp.float32)
    return coop_logits(p, x, adj, adj_s, prompts, eot_onehot)


# --------------------------------- main --------------------------------------

if __name__ == "__main__":
    NUM_NODES, IN_FEAT = 16, 128
    GNN_HID = GNN_OUT = 128
    N_CLS, N_CTX, SEQ, CTX_DIM, EMBED = 4, 4, 16, 128, 128

    key = jax.random.PRNGKey(0)
    kx, ka, kp = jax.random.split(key, 3)

    x = jax.random.normal(kx, (NUM_NODES, IN_FEAT), jnp.float32)
    adj_raw = (jax.random.uniform(ka, (NUM_NODES, NUM_NODES)) > 0.7).astype(jnp.float32)
    adj = adj_raw + adj_raw.T + jnp.eye(NUM_NODES, dtype=jnp.float32)
    adj = adj / jnp.sum(adj, axis=-1, keepdims=True)           # row-normalized
    s_n = jnp.array([1, 5], jnp.int32)                         # query node indices

    # synthetic tokenized prompts: "SOT X X X X name . EOT 0 ..."; EOT has the
    # largest token id so argmax(dim=-1) picks its position (as in CLIP).
    tok = jnp.zeros((N_CLS, SEQ), jnp.int32)
    tok = tok.at[:, 0].set(1)
    tok = tok.at[:, 1:1 + N_CTX].set(2)
    tok = tok.at[:, 1 + N_CTX].set(3)                          # class name token
    tok = tok.at[:, 2 + N_CTX].set(49407)                      # EOT

    params = init_params(
        kp, in_feat=IN_FEAT, gnn_hid=GNN_HID, gnn_out=GNN_OUT, n_cls=N_CLS,
        n_ctx=N_CTX, seq_len=SEQ, ctx_dim=CTX_DIM, embed_dim=EMBED)

    logits = jax.jit(coop_forward)(params, s_n, x, adj, tok)
    logits = jax.block_until_ready(logits)
    assert logits.shape == (s_n.shape[0], N_CLS) and bool(jnp.all(jnp.isfinite(logits)))
    print("KERNEL_OK")
</pallas_src>

<mosaic_0001>
module attributes {stable_mosaic.version = 11 : i64} {
  func.func @_coop_fwd_kernel(%arg0: memref<16x128xf32, #tpu.memory_space<vmem>>, %arg1: memref<16x16xf32, #tpu.memory_space<vmem>>, %arg2: memref<2x16xf32, #tpu.memory_space<vmem>>, %arg3: memref<128x128xbf16, #tpu.memory_space<vmem>>, %arg4: memref<128x128xbf16, #tpu.memory_space<vmem>>, %arg5: memref<4x16x128xf32, #tpu.memory_space<vmem>>, %arg6: memref<16x128xf32, #tpu.memory_space<vmem>>, %arg7: memref<4x16xf32, #tpu.memory_space<vmem>>, %arg8: memref<1x128xf32, #tpu.memory_space<vmem>>, %arg9: memref<1x128xf32, #tpu.memory_space<vmem>>, %arg10: memref<128x384xbf16, #tpu.memory_space<vmem>>, %arg11: memref<128x128xbf16, #tpu.memory_space<vmem>>, %arg12: memref<1x128xf32, #tpu.memory_space<vmem>>, %arg13: memref<1x128xf32, #tpu.memory_space<vmem>>, %arg14: memref<128x512xbf16, #tpu.memory_space<vmem>>, %arg15: memref<512x128xbf16, #tpu.memory_space<vmem>>, %arg16: memref<1x128xf32, #tpu.memory_space<vmem>>, %arg17: memref<1x128xf32, #tpu.memory_space<vmem>>, %arg18: memref<128x128xbf16, #tpu.memory_space<vmem>>, %arg19: memref<1xf32, #tpu.memory_space<smem>>, %arg20: memref<2x4xf32, #tpu.memory_space<vmem>>) attributes {dimension_semantics = [], scalar_prefetch = 0 : i64, scratch_operands = 0 : i64, tpu.core_type = #tpu.core_type<tc>} {
    %c0 = arith.constant 0 : index
    %c0_0 = arith.constant 0 : index
    %0 = vector.load %arg0[%c0, %c0_0] : memref<16x128xf32, #tpu.memory_space<vmem>>, vector<16x128xf32>
    %1 = arith.truncf %0 : vector<16x128xf32> to vector<16x128xbf16>
    %c0_1 = arith.constant 0 : index
    %c0_2 = arith.constant 0 : index
    %2 = vector.load %arg3[%c0_1, %c0_2] : memref<128x128xbf16, #tpu.memory_space<vmem>>, vector<128x128xbf16>
    %cst = arith.constant dense<0.000000e+00> : vector<16x128xf32>
    %3 = tpu.matmul %1, %2, %cst {dimension_numbers = #tpu.dot_dimension_numbers<[1], [0], [0], [1], [0, 0, 1, 1], [], []>} : vector<16x128xbf16>, vector<128x128xbf16>, vector<16x128xf32> -> vector<16x128xf32>
    %c0_3 = arith.constant 0 : index
    %c0_4 = arith.constant 0 : index
    %4 = vector.load %arg1[%c0_3, %c0_4] : memref<16x16xf32, #tpu.memory_space<vmem>>, vector<16x16xf32>
    %5 = arith.truncf %4 : vector<16x16xf32> to vector<16x16xbf16>
    %6 = arith.truncf %3 : vector<16x128xf32> to vector<16x128xbf16>
    %cst_5 = arith.constant dense<0.000000e+00> : vector<16x128xf32>
    %7 = tpu.matmul %5, %6, %cst_5 {dimension_numbers = #tpu.dot_dimension_numbers<[1], [0], [0], [1], [0, 0, 1, 1], [], []>} : vector<16x16xbf16>, vector<16x128xbf16>, vector<16x128xf32> -> vector<16x128xf32>
    %cst_6 = arith.constant 0.000000e+00 : f32
    %8 = vector.broadcast %cst_6 : f32 to vector<16x128xf32>
    %9 = arith.maximumf %7, %8 : vector<16x128xf32>
    %10 = arith.truncf %9 : vector<16x128xf32> to vector<16x128xbf16>
    %c0_7 = arith.constant 0 : index
    %c0_8 = arith.constant 0 : index
    %11 = vector.load %arg4[%c0_7, %c0_8] : memref<128x128xbf16, #tpu.memory_space<vmem>>, vector<128x128xbf16>
    %cst_9 = arith.constant dense<0.000000e+00> : vector<16x128xf32>
    %12 = tpu.matmul %10, %11, %cst_9 {dimension_numbers = #tpu.dot_dimension_numbers<[1], [0], [0], [1], [0, 0, 1, 1], [], []>} : vector<16x128xbf16>, vector<128x128xbf16>, vector<16x128xf32> -> vector<16x128xf32>
    %c0_10 = arith.constant 0 : index
    %c0_11 = arith.constant 0 : index
    %13 = vector.load %arg2[%c0_10, %c0_11] : memref<2x16xf32, #tpu.memory_space<vmem>>, vector<2x16xf32>
    %14 = arith.truncf %13 : vector<2x16xf32> to vector<2x16xbf16>
    %15 = arith.truncf %12 : vector<16x128xf32> to vector<16x128xbf16>
    %cst_12 = arith.constant dense<0.000000e+00> : vector<2x128xf32>
    %16 = tpu.matmul %14, %15, %cst_12 {dimension_numbers = #tpu.dot_dimension_numbers<[1], [0], [0], [1], [0, 0, 1, 1], [], []>} : vector<2x16xbf16>, vector<16x128xbf16>, vector<2x128xf32> -> vector<2x128xf32>
    %c0_13 = arith.constant 0 : index
    %c0_14 = arith.constant 0 : index
    %c0_15 = arith.constant 0 : index
    %17 = vector.load %arg5[%c0_13, %c0_14, %c0_15] : memref<4x16x128xf32, #tpu.memory_space<vmem>>, vector<4x16x128xf32>
    %c0_16 = arith.constant 0 : index
    %c0_17 = arith.constant 0 : index
    %18 = vector.load %arg6[%c0_16, %c0_17] : memref<16x128xf32, #tpu.memory_space<vmem>>, vector<16x128xf32>
    %19 = vector.shape_cast %18 : vector<16x128xf32> to vector<1x16x128xf32>
    %20 = vector.broadcast %19 : vector<1x16x128xf32> to vector<4x16x128xf32>
    %21 = arith.addf %17, %20 : vector<4x16x128xf32>
    %22 = vector.shape_cast %21 : vector<4x16x128xf32> to vector<64x128xf32>
    %c0_18 = arith.constant 0 : index
    %c0_19 = arith.constant 0 : index
    %23 = vector.load %arg8[%c0_18, %c0_19] : memref<1x128xf32, #tpu.memory_space<vmem>>, vector<1x128xf32>
    %c0_20 = arith.constant 0 : index
    %c0_21 = arith.constant 0 : index
    %24 = vector.load %arg9[%c0_20, %c0_21] : memref<1x128xf32, #tpu.memory_space<vmem>>, vector<1x128xf32>
    %cst_22 = arith.constant dense<0.000000e+00> : vector<64xf32>
    %25 = vector.multi_reduction <add>, %22, %cst_22 [1] : vector<64x128xf32> to vector<64xf32>
    %26 = vector.shape_cast %25 : vector<64xf32> to vector<64x1xf32>
    %cst_23 = arith.constant 1.280000e+02 : f32
    %27 = vector.broadcast %cst_23 : f32 to vector<64x1xf32>
    %28 = arith.divf %26, %27 : vector<64x1xf32>
    %29 = vector.broadcast %28 : vector<64x1xf32> to vector<64x128xf32>
    %30 = arith.subf %22, %29 : vector<64x128xf32>
    %31 = arith.mulf %30, %30 : vector<64x128xf32>
    %cst_24 = arith.constant dense<0.000000e+00> : vector<64xf32>
    %32 = vector.multi_reduction <add>, %31, %cst_24 [1] : vector<64x128xf32> to vector<64xf32>
    %33 = vector.shape_cast %32 : vector<64xf32> to vector<64x1xf32>
    %cst_25 = arith.constant 1.280000e+02 : f32
    %34 = vector.broadcast %cst_25 : f32 to vector<64x1xf32>
    %35 = arith.divf %33, %34 : vector<64x1xf32>
    %cst_26 = arith.constant 9.99999974E-6 : f32
    %36 = vector.broadcast %cst_26 : f32 to vector<64x1xf32>
    %37 = arith.addf %35, %36 : vector<64x1xf32>
    %38 = math.rsqrt %37 : vector<64x1xf32>
    %39 = vector.broadcast %38 : vector<64x1xf32> to vector<64x128xf32>
    %40 = arith.mulf %30, %39 : vector<64x128xf32>
    %41 = vector.broadcast %23 : vector<1x128xf32> to vector<64x128xf32>
    %42 = arith.mulf %40, %41 : vector<64x128xf32>
    %43 = vector.broadcast %24 : vector<1x128xf32> to vector<64x128xf32>
    %44 = arith.addf %42, %43 : vector<64x128xf32>
    %45 = arith.truncf %44 : vector<64x128xf32> to vector<64x128xbf16>
    %c0_27 = arith.constant 0 : index
    %c0_28 = arith.constant 0 : index
    %46 = vector.load %arg10[%c0_27, %c0_28] : memref<128x384xbf16, #tpu.memory_space<vmem>>, vector<128x384xbf16>
    %cst_29 = arith.constant dense<0.000000e+00> : vector<64x384xf32>
    %47 = tpu.matmul %45, %46, %cst_29 {dimension_numbers = #tpu.dot_dimension_numbers<[1], [0], [0], [1], [0, 0, 1, 1], [], []>} : vector<64x128xbf16>, vector<128x384xbf16>, vector<64x384xf32> -> vector<64x384xf32>
    %48 = vector.shape_cast %47 : vector<64x384xf32> to vector<4x16x384xf32>
    %49 = vector.extract_strided_slice %48 {offsets = [0, 0, 0], sizes = [4, 16, 128], strides = [1, 1, 1]} : vector<4x16x384xf32> to vector<4x16x128xf32>
    %cst_30 = arith.constant 0.0883883461 : f32
    %50 = vector.broadcast %cst_30 : f32 to vector<4x16x128xf32>
    %51 = arith.mulf %49, %50 : vector<4x16x128xf32>
    %52 = vector.extract_strided_slice %48 {offsets = [0, 0, 128], sizes = [4, 16, 128], strides = [1, 1, 1]} : vector<4x16x384xf32> to vector<4x16x128xf32>
    %53 = vector.extract_strided_slice %48 {offsets = [0, 0, 256], sizes = [4, 16, 128], strides = [1, 1, 1]} : vector<4x16x384xf32> to vector<4x16x128xf32>
    %54 = arith.truncf %51 : vector<4x16x128xf32> to vector<4x16x128xbf16>
    %55 = arith.truncf %52 : vector<4x16x128xf32> to vector<4x16x128xbf16>
    "tpu.trace_start"() <{level = 10 : i32, message = "bqd,bkd->bqk"}> : () -> ()
    %cst_31 = arith.constant dense<0.000000e+00> : vector<4x16x16xf32>
    %56 = tpu.matmul %54, %55, %cst_31 {dimension_numbers = #tpu.dot_dimension_numbers<[2], [2], [1], [1], [0, 0, 0, 1, 1, 1], [0], [0]>} : vector<4x16x128xbf16>, vector<4x16x128xbf16>, vector<4x16x16xf32> -> vector<4x16x16xf32>
    "tpu.trace_stop"() : () -> ()
    %57 = tpu.iota {dimensions = array<i32: 0>} : vector<16x16xi32>
    %58 = tpu.iota {dimensions = array<i32: 1>} : vector<16x16xi32>
    %59 = arith.cmpi sle, %58, %57 : vector<16x16xi32>
    %60 = vector.shape_cast %59 : vector<16x16xi1> to vector<1x16x16xi1>
    %cst_32 = arith.constant -1.000000e+30 : f32
    %61 = vector.shape_cast %60 : vector<1x16x16xi1> to vector<1x16x16xi1>
    %62 = vector.broadcast %61 : vector<1x16x16xi1> to vector<4x16x16xi1>
    %63 = vector.broadcast %cst_32 : f32 to vector<4x16x16xf32>
    %64 = arith.select %62, %56, %63 : vector<4x16x16xi1>, vector<4x16x16xf32>
    %cst_33 = arith.constant dense<0xFF800000> : vector<4x16xf32>
    %65 = vector.multi_reduction <maximumf>, %64, %cst_33 [2] : vector<4x16x16xf32> to vector<4x16xf32>
    %66 = vector.shape_cast %65 : vector<4x16xf32> to vector<4x16x1xf32>
    %67 = vector.broadcast %66 : vector<4x16x1xf32> to vector<4x16x16xf32>
    %68 = arith.subf %64, %67 : vector<4x16x16xf32>
    %69 = math.exp %68 : vector<4x16x16xf32>
    %cst_34 = arith.constant dense<0.000000e+00> : vector<4x16xf32>
    %70 = vector.multi_reduction <add>, %69, %cst_34 [2] : vector<4x16x16xf32> to vector<4x16xf32>
    %71 = vector.shape_cast %70 : vector<4x16xf32> to vector<4x16x1xf32>
    %72 = tpu.reciprocal %71 {approx = true} : vector<4x16x1xf32> -> vector<4x16x1xf32>
    %73 = vector.broadcast %72 : vector<4x16x1xf32> to vector<4x16x16xf32>
    %74 = arith.mulf %69, %73 : vector<4x16x16xf32>
    %75 = arith.truncf %74 : vector<4x16x16xf32> to vector<4x16x16xbf16>
    %76 = arith.truncf %53 : vector<4x16x128xf32> to vector<4x16x128xbf16>
    "tpu.trace_start"() <{level = 10 : i32, message = "bqk,bkd->bqd"}> : () -> ()
    %cst_35 = arith.constant dense<0.000000e+00> : vector<4x16x128xf32>
    %77 = tpu.matmul %75, %76, %cst_35 {dimension_numbers = #tpu.dot_dimension_numbers<[2], [1], [1], [2], [0, 0, 0, 1, 1, 2], [0], [0]>} : vector<4x16x16xbf16>, vector<4x16x128xbf16>, vector<4x16x128xf32> -> vector<4x16x128xf32>
    "tpu.trace_stop"() : () -> ()
    %78 = vector.shape_cast %77 : vector<4x16x128xf32> to vector<64x128xf32>
    %79 = arith.truncf %78 : vector<64x128xf32> to vector<64x128xbf16>
    %c0_36 = arith.constant 0 : index
    %c0_37 = arith.constant 0 : index
    %80 = vector.load %arg11[%c0_36, %c0_37] : memref<128x128xbf16, #tpu.memory_space<vmem>>, vector<128x128xbf16>
    %cst_38 = arith.constant dense<0.000000e+00> : vector<64x128xf32>
    %81 = tpu.matmul %79, %80, %cst_38 {dimension_numbers = #tpu.dot_dimension_numbers<[1], [0], [0], [1], [0, 0, 1, 1], [], []>} : vector<64x128xbf16>, vector<128x128xbf16>, vector<64x128xf32> -> vector<64x128xf32>
    %82 = arith.addf %22, %81 : vector<64x128xf32>
    %c0_39 = arith.constant 0 : index
    %c0_40 = arith.constant 0 : index
    %83 = vector.load %arg12[%c0_39, %c0_40] : memref<1x128xf32, #tpu.memory_space<vmem>>, vector<1x128xf32>
    %c0_41 = arith.constant 0 : index
    %c0_42 = arith.constant 0 : index
    %84 = vector.load %arg13[%c0_41, %c0_42] : memref<1x128xf32, #tpu.memory_space<vmem>>, vector<1x128xf32>
    %cst_43 = arith.constant dense<0.000000e+00> : vector<64xf32>
    %85 = vector.multi_reduction <add>, %82, %cst_43 [1] : vector<64x128xf32> to vector<64xf32>
    %86 = vector.shape_cast %85 : vector<64xf32> to vector<64x1xf32>
    %cst_44 = arith.constant 1.280000e+02 : f32
    %87 = vector.broadcast %cst_44 : f32 to vector<64x1xf32>
    %88 = arith.divf %86, %87 : vector<64x1xf32>
    %89 = vector.broadcast %88 : vector<64x1xf32> to vector<64x128xf32>
    %90 = arith.subf %82, %89 : vector<64x128xf32>
    %91 = arith.mulf %90, %90 : vector<64x128xf32>
    %cst_45 = arith.constant dense<0.000000e+00> : vector<64xf32>
    %92 = vector.multi_reduction <add>, %91, %cst_45 [1] : vector<64x128xf32> to vector<64xf32>
    %93 = vector.shape_cast %92 : vector<64xf32> to vector<64x1xf32>
    %cst_46 = arith.constant 1.280000e+02 : f32
    %94 = vector.broadcast %cst_46 : f32 to vector<64x1xf32>
    %95 = arith.divf %93, %94 : vector<64x1xf32>
    %cst_47 = arith.constant 9.99999974E-6 : f32
    %96 = vector.broadcast %cst_47 : f32 to vector<64x1xf32>
    %97 = arith.addf %95, %96 : vector<64x1xf32>
    %98 = math.rsqrt %97 : vector<64x1xf32>
    %99 = vector.broadcast %98 : vector<64x1xf32> to vector<64x128xf32>
    %100 = arith.mulf %90, %99 : vector<64x128xf32>
    %101 = vector.broadcast %83 : vector<1x128xf32> to vector<64x128xf32>
    %102 = arith.mulf %100, %101 : vector<64x128xf32>
    %103 = vector.broadcast %84 : vector<1x128xf32> to vector<64x128xf32>
    %104 = arith.addf %102, %103 : vector<64x128xf32>
    %105 = arith.truncf %104 : vector<64x128xf32> to vector<64x128xbf16>
    %c0_48 = arith.constant 0 : index
    %c0_49 = arith.constant 0 : index
    %106 = vector.load %arg14[%c0_48, %c0_49] : memref<128x512xbf16, #tpu.memory_space<vmem>>, vector<128x512xbf16>
    %cst_50 = arith.constant dense<0.000000e+00> : vector<64x512xf32>
    %107 = tpu.matmul %105, %106, %cst_50 {dimension_numbers = #tpu.dot_dimension_numbers<[1], [0], [0], [1], [0, 0, 1, 1], [], []>} : vector<64x128xbf16>, vector<128x512xbf16>, vector<64x512xf32> -> vector<64x512xf32>
    %108 = arith.mulf %107, %107 : vector<64x512xf32>
    %109 = arith.mulf %107, %108 : vector<64x512xf32>
    %cst_51 = arith.constant 4.471500e-02 : f32
    %110 = vector.broadcast %cst_51 : f32 to vector<64x512xf32>
    %111 = arith.mulf %110, %109 : vector<64x512xf32>
    %112 = arith.addf %107, %111 : vector<64x512xf32>
    %cst_52 = arith.constant 0.797884583 : f32
    %113 = vector.broadcast %cst_52 : f32 to vector<64x512xf32>
    %114 = arith.mulf %113, %112 : vector<64x512xf32>
    %115 = math.tanh %114 : vector<64x512xf32>
    %cst_53 = arith.constant 1.000000e+00 : f32
    %116 = vector.broadcast %cst_53 : f32 to vector<64x512xf32>
    %117 = arith.addf %116, %115 : vector<64x512xf32>
    %cst_54 = arith.constant 5.000000e-01 : f32
    %118 = vector.broadcast %cst_54 : f32 to vector<64x512xf32>
    %119 = arith.mulf %118, %117 : vector<64x512xf32>
    %120 = arith.mulf %107, %119 : vector<64x512xf32>
    %121 = arith.truncf %120 : vector<64x512xf32> to vector<64x512xbf16>
    %c0_55 = arith.constant 0 : index
    %c0_56 = arith.constant 0 : index
    %122 = vector.load %arg15[%c0_55, %c0_56] : memref<512x128xbf16, #tpu.memory_space<vmem>>, vector<512x128xbf16>
    %cst_57 = arith.constant dense<0.000000e+00> : vector<64x128xf32>
    %123 = tpu.matmul %121, %122, %cst_57 {dimension_numbers = #tpu.dot_dimension_numbers<[1], [0], [0], [1], [0, 0, 1, 1], [], []>} : vector<64x512xbf16>, vector<512x128xbf16>, vector<64x128xf32> -> vector<64x128xf32>
    %124 = arith.addf %82, %123 : vector<64x128xf32>
    %c0_58 = arith.constant 0 : index
    %c0_59 = arith.constant 0 : index
    %125 = vector.load %arg16[%c0_58, %c0_59] : memref<1x128xf32, #tpu.memory_space<vmem>>, vector<1x128xf32>
    %c0_60 = arith.constant 0 : index
    %c0_61 = arith.constant 0 : index
    %126 = vector.load %arg17[%c0_60, %c0_61] : memref<1x128xf32, #tpu.memory_space<vmem>>, vector<1x128xf32>
    %cst_62 = arith.constant dense<0.000000e+00> : vector<64xf32>
    %127 = vector.multi_reduction <add>, %124, %cst_62 [1] : vector<64x128xf32> to vector<64xf32>
    %128 = vector.shape_cast %127 : vector<64xf32> to vector<64x1xf32>
    %cst_63 = arith.constant 1.280000e+02 : f32
    %129 = vector.broadcast %cst_63 : f32 to vector<64x1xf32>
    %130 = arith.divf %128, %129 : vector<64x1xf32>
    %131 = vector.broadcast %130 : vector<64x1xf32> to vector<64x128xf32>
    %132 = arith.subf %124, %131 : vector<64x128xf32>
    %133 = arith.mulf %132, %132 : vector<64x128xf32>
    %cst_64 = arith.constant dense<0.000000e+00> : vector<64xf32>
    %134 = vector.multi_reduction <add>, %133, %cst_64 [1] : vector<64x128xf32> to vector<64xf32>
    %135 = vector.shape_cast %134 : vector<64xf32> to vector<64x1xf32>
    %cst_65 = arith.constant 1.280000e+02 : f32
    %136 = vector.broadcast %cst_65 : f32 to vector<64x1xf32>
    %137 = arith.divf %135, %136 : vector<64x1xf32>
    %cst_66 = arith.constant 9.99999974E-6 : f32
    %138 = vector.broadcast %cst_66 : f32 to vector<64x1xf32>
    %139 = arith.addf %137, %138 : vector<64x1xf32>
    %140 = math.rsqrt %139 : vector<64x1xf32>
    %141 = vector.broadcast %140 : vector<64x1xf32> to vector<64x128xf32>
    %142 = arith.mulf %132, %141 : vector<64x128xf32>
    %143 = vector.broadcast %125 : vector<1x128xf32> to vector<64x128xf32>
    %144 = arith.mulf %142, %143 : vector<64x128xf32>
    %145 = vector.broadcast %126 : vector<1x128xf32> to vector<64x128xf32>
    %146 = arith.addf %144, %145 : vector<64x128xf32>
    %147 = vector.shape_cast %146 : vector<64x128xf32> to vector<4x16x128xf32>
    %c0_67 = arith.constant 0 : index
    %c0_68 = arith.constant 0 : index
    %148 = vector.load %arg7[%c0_67, %c0_68] : memref<4x16xf32, #tpu.memory_space<vmem>>, vector<4x16xf32>
    %149 = vector.shape_cast %148 : vector<4x16xf32> to vector<4x16x1xf32>
    %150 = vector.broadcast %149 : vector<4x16x1xf32> to vector<4x16x128xf32>
    %151 = arith.mulf %150, %147 : vector<4x16x128xf32>
    %cst_69 = arith.constant dense<0.000000e+00> : vector<4x128xf32>
    %152 = vector.multi_reduction <add>, %151, %cst_69 [1] : vector<4x16x128xf32> to vector<4x128xf32>
    %153 = arith.truncf %152 : vector<4x128xf32> to vector<4x128xbf16>
    %c0_70 = arith.constant 0 : index
    %c0_71 = arith.constant 0 : index
    %154 = vector.load %arg18[%c0_70, %c0_71] : memref<128x128xbf16, #tpu.memory_space<vmem>>, vector<128x128xbf16>
    %cst_72 = arith.constant dense<0.000000e+00> : vector<4x128xf32>
    %155 = tpu.matmul %153, %154, %cst_72 {dimension_numbers = #tpu.dot_dimension_numbers<[1], [0], [0], [1], [0, 0, 1, 1], [], []>} : vector<4x128xbf16>, vector<128x128xbf16>, vector<4x128xf32> -> vector<4x128xf32>
    %156 = arith.mulf %16, %16 : vector<2x128xf32>
    %cst_73 = arith.constant dense<0.000000e+00> : vector<2xf32>
    %157 = vector.multi_reduction <add>, %156, %cst_73 [1] : vector<2x128xf32> to vector<2xf32>
    %158 = vector.shape_cast %157 : vector<2xf32> to vector<2x1xf32>
    %159 = math.rsqrt %158 : vector<2x1xf32>
    %160 = vector.broadcast %159 : vector<2x1xf32> to vector<2x128xf32>
    %161 = arith.mulf %16, %160 : vector<2x128xf32>
    %162 = arith.mulf %155, %155 : vector<4x128xf32>
    %cst_74 = arith.constant dense<0.000000e+00> : vector<4xf32>
    %163 = vector.multi_reduction <add>, %162, %cst_74 [1] : vector<4x128xf32> to vector<4xf32>
    %164 = vector.shape_cast %163 : vector<4xf32> to vector<4x1xf32>
    %165 = math.rsqrt %164 : vector<4x1xf32>
    %166 = vector.broadcast %165 : vector<4x1xf32> to vector<4x128xf32>
    %167 = arith.mulf %155, %166 : vector<4x128xf32>
    %c0_75 = arith.constant 0 : index
    %168 = memref.load %arg19[%c0_75] : memref<1xf32, #tpu.memory_space<smem>>
    %169 = vector.broadcast %168 : f32 to vector<1x1xf32>
    %170 = math.exp %169 : vector<1x1xf32>
    %171 = arith.truncf %161 : vector<2x128xf32> to vector<2x128xbf16>
    %172 = arith.truncf %167 : vector<4x128xf32> to vector<4x128xbf16>
    "tpu.trace_start"() <{level = 10 : i32, message = "bd,cd->bc"}> : () -> ()
    %cst_76 = arith.constant dense<0.000000e+00> : vector<2x4xf32>
    %173 = tpu.matmul %171, %172, %cst_76 {dimension_numbers = #tpu.dot_dimension_numbers<[1], [1], [0], [0], [0, 0, 1, 0], [], []>} : vector<2x128xbf16>, vector<4x128xbf16>, vector<2x4xf32> -> vector<2x4xf32>
    "tpu.trace_stop"() : () -> ()
    %174 = vector.broadcast %170 : vector<1x1xf32> to vector<2x4xf32>
    %175 = arith.mulf %174, %173 : vector<2x4xf32>
    %c0_77 = arith.constant 0 : index
    %c0_78 = arith.constant 0 : index
    %176 = vector.load %arg20[%c0_77, %c0_78] : memref<2x4xf32, #tpu.memory_space<vmem>>, vector<2x4xf32>
    tpu.vector_store %arg20[%c0_77, %c0_78], %175 {strides = array<i32>} : memref<2x4xf32, #tpu.memory_space<vmem>>, vector<2x4xf32>,
    return
  }
}

</mosaic_0001>

<bundles_post_ra>
// kernel: coop_forward.1
= control target key start
LH: loop header
LB: loop body
LE: loop exit
PB: predicated region body
PF: predicated region fallthrough
CT: control target
= control target key end

     0   :  { %s4794_s0 = inlined_call_operand.vmem [shape: f32[16,128], index: 0, kind: input, shape index: {}]   ;;  %s4795_s1 = inlined_call_operand.vmem [shape: f32[16,16], index: 1, kind: input, shape index: {}]   ;;  %s4796_s2 = inlined_call_operand.vmem [shape: f32[2,16], index: 2, kind: input, shape index: {}]   ;;  %s4797_s3 = inlined_call_operand.vmem [shape: bf16[128,128], index: 3, kind: input, shape index: {}]   ;;  %s4798_s4 = inlined_call_operand.vmem [shape: bf16[128,128], index: 4, kind: input, shape index: {}]   ;;  %s4799_s5 = inlined_call_operand.vmem [shape: f32[4,16,128], index: 5, kind: input, shape index: {}]   ;;  %s4800_s6 = inlined_call_operand.vmem [shape: f32[16,128], index: 6, kind: input, shape index: {}]   ;;  %s4801_s7 = inlined_call_operand.vmem [shape: f32[4,16], index: 7, kind: input, shape index: {}]   ;;  %s4802_s8 = inlined_call_operand.vmem [shape: f32[1,128], index: 8, kind: input, shape index: {}]   ;;  %s4803_s9 = inlined_call_operand.vmem [shape: f32[1,128], index: 9, kind: input, shape index: {}]   ;;  %s4804_s10 = inlined_call_operand.hbm [shape: bf16[128,384], index: 10, kind: input, shape index: {}]   ;;  %s4805_s11 = inlined_call_operand.vmem [shape: bf16[128,128], index: 11, kind: input, shape index: {}]   ;;  %s4806_s12 = inlined_call_operand.vmem [shape: f32[1,128], index: 12, kind: input, shape index: {}]   ;;  %s4807_s13 = inlined_call_operand.vmem [shape: f32[1,128], index: 13, kind: input, shape index: {}]   ;;  %s4808_s14 = inlined_call_operand.hbm [shape: bf16[128,512], index: 14, kind: input, shape index: {}]   ;;  %s4809_s15 = inlined_call_operand.hbm [shape: bf16[512,128], index: 15, kind: input, shape index: {}]   ;;  %s4810_s16 = inlined_call_operand.vmem [shape: f32[1,128], index: 16, kind: input, shape index: {}]   ;;  %s4811_s17 = inlined_call_operand.vmem [shape: f32[1,128], index: 17, kind: input, shape index: {}]   ;;  %s4812_s18 = inlined_call_operand.hbm [shape: bf16[128,128], index: 18, kind: input, shape index: {}]   ;;  %s4813_s19 = inlined_call_operand.<no memory space> [shape: f32[1], index: 19, kind: input, shape index: {}]   ;;  %s4814_s20 = inlined_call_operand.hbm [shape: f32[2,4], index: 20, kind: output, shape index: {}]  }
   0x1   :  { %4819 = sst [smem:[#allocation16_spill]] %s4794_s0 }
   0x2   :  { %4820 = sst [smem:[#allocation17_spill]] %s4795_s1 }
   0x3   :  { %4821 = sst [smem:[#allocation18_spill]] %s4796_s2 }
   0x4   :  { %4822 = sst [smem:[#allocation19_spill]] %s4797_s3 }
   0x5   :  { %4823 = sst [smem:[#allocation20_spill]] %s4798_s4 }
   0x6   :  { %26 = vsyncpa [#allocation4], 0 }
   0x7   :  { %27 = vsyncpa [#allocation7], 0 }
   0x8   :  { %28 = vsyncpa [#allocation10], 0  ;;  %s73_s23 = sshll.u32 %s4808_s14, 4  ;;  %s74_s23 = int_to_ptr.hbm [resolvable:$true] %s73_s23 }
   0x9   :  { %29 = vsyncpa [#allocation5], 0  ;;  %s3809_s24 = smov [#allocation6]   ;;  %s54_s26 = sshll.u32 %s4804_s10, 4  ;;  %s55_s26 = int_to_ptr.hbm [resolvable:$true] %s54_s26 }
   0xa   :  { %s75_s2 = sshll.u32 %s3809_s24, 4  ;;  %s3810_s27 = smov 256   ;;  %s76_s2 = int_to_ptr.vmem [resolvable:$true] %s75_s2 }
   0xb   :  { %s3811_s28 = smov 16   ;;  %s3812_s4 = smov [#allocation3]  }
   0xc   :  { %81 = dma.hbm_to_vmem [thread:$0]  %s74_s23, 4096, %s76_s2, [#allocation7], %s3810_s27, %s3810_s27, %s3811_s28  }
   0xd   :  { %s56_s29 = sshll.u32 %s3812_s4, 4  ;;  %s3813_s30 = smov 192   ;;  %s57_s29 = int_to_ptr.vmem [resolvable:$true] %s56_s29 }
   0xe   :  { %s3814_s0 = smov 12   ;;  %s86_s1 = sshll.u32 %s4809_s15, 4  ;;  %s87_s1 = int_to_ptr.hbm [resolvable:$true] %s86_s1 }
   0xf   :  { %62 = dma.hbm_to_vmem [thread:$0]  %s55_s26, 3072, %s57_s29, [#allocation4], %s3813_s30, %s3813_s30, %s3814_s0  }
  0x10   :  { %s3815_s22 = smov [#allocation8]   ;;  %s103_s3 = sshll.u32 %s4812_s18, 4  ;;  %s104_s3 = int_to_ptr.hbm [resolvable:$true] %s103_s3 }
  0x11   :  { %s88_s24 = sshll.u32 %s3815_s22, 4  ;;  %s3816_s23 = smov 64   ;;  %s89_s24 = int_to_ptr.vmem [resolvable:$true] %s88_s24 }
  0x12   :  { %s3817_s2 = smov 4   ;;  %s3818_s27 = smov [#allocation9]  }
  0x13   :  { %94 = dma.hbm_to_vmem [thread:$0]  %s87_s1, 4096, %s89_s24, [#allocation7], %s3816_s23, %s3816_s23, %s3817_s2  }
  0x14   :  { %s105_s28 = sshll.u32 %s3818_s27, 4  ;;  %s106_s28 = int_to_ptr.vmem [resolvable:$true] %s105_s28 }
  0x15   :  { %111 = dma.hbm_to_vmem [thread:$0]  %s104_s3, 1024, %s106_s28, [#allocation10], %s3816_s23, %s3816_s23, %s3817_s2  }
  0x16   :  { %3801 = dma.done.wait [#allocation4], 3072  }
  0x17   :  { %3802 = vsyncadd [#allocation4], 4294964224 }
  0x18   :  { %3803 = dma.done.wait [#allocation7], 8192  }
  0x19   :  { %3804 = vsyncadd [#allocation7], 4294959104 }
  0x1a   :  { %3805 = dma.done.wait [#allocation10], 1024  }
  0x1b   :  { %3806 = vsyncadd [#allocation10], 4294966272  ;;  %s4824_s4 = sld [smem:[#allocation19_spill]]  ;;  %v334_v1 = vld [vmem:[%s4799_s5] sm:$0xff]  ;;  %v336_v6 = vld [vmem:[%s4799_s5 + $0x10] sm:$0xff]  ;;  %v3819_v25 = vmov 128.0  }
  0x1c   :  { %v342_v2 = vld [vmem:[%s4800_s6] sm:$0xff]  ;;  %v335_v7 = vld [vmem:[%s4799_s5 + $0x8] sm:$0xff]  ;;  %v337_v13 = vld [vmem:[%s4799_s5 + $0x18] sm:$0xff]  ;;  %s4825_s2 = sld [smem:[#allocation16_spill]]  ;;  %3529 = vrcp.f32 %v3819_v25  ;;  %vm216_vm1 = vcmask 130048   ;;  %s2873_s24 = sshll.u32 %s4814_s20, 4  ;;  %s2874_s24 = int_to_ptr.hbm [resolvable:$true] %s2873_s24 }
  0x1d   :  { %v3950_v4 = vadd.f32 %v342_v2, %v334_v1  ;;  %v343_v8 = vld [vmem:[%s4800_s6 + $0x8] sm:$0xff]  ;;  %v3965_v9 = vadd.f32 %v342_v2, %v336_v6  ;;  %v338_v10 = vld [vmem:[%s4799_s5 + $0x20] sm:$0xff]  ;;  %v340_v26 = vld [vmem:[%s4799_s5 + $0x30] sm:$0xff]  ;;  %s4826_s18 = sld [smem:[#allocation17_spill]] }
  0x1e   :  { %v3970_v11 = vadd.f32 %v342_v2, %v338_v10  ;;  %v3973_v12 = vadd.f32 %v343_v8, %v335_v7  ;;  %v339_v14 = vld [vmem:[%s4799_s5 + $0x28] sm:$0xff]  ;;  %v3985_v16 = vadd.f32 %v343_v8, %v337_v13  ;;  %v4013_v27 = vadd.f32 %v342_v2, %v340_v26  ;;  %v341_v38 = vld [vmem:[%s4799_s5 + $0x38] sm:$0xff]  ;;  %s4827_s1 = sld [smem:[#allocation20_spill]] }
  0x1f   :  { %354 = vadd.xlane.f32.xlu0 %v3950_v4  ;;  %358 = vadd.xlane.f32.xlu1 %v3965_v9  ;;  %v3988_v17 = vadd.f32 %v343_v8, %v339_v14  ;;  %v4027_v39 = vadd.f32 %v343_v8, %v341_v38  ;;  %s4832_s14 = sld [smem:[#allocation18_spill]] }
  0x20   :  { %362 = vadd.xlane.f32.xlu2 %v3970_v11 }
  0x21   :  { %v3378_v0 = vld [vmem:[%s4824_s4 + $0x38] sm:$0xff]  ;;  %v3377_v3 = vld [vmem:[%s4824_s4 + $0x30] sm:$0xff]  ;;  %v3376_v5 = vld [vmem:[%s4824_s4 + $0x28] sm:$0xff] }
  0x22   :  { %198 = vmatpush.bf16.msra.mxu0 %v3378_v0  ;;  %v3375_v15 = vld [vmem:[%s4824_s4 + $0x20] sm:$0xff]  ;;  %v3374_v18 = vld [vmem:[%s4824_s4 + $0x18] sm:$0xff]  ;;  %v3373_v19 = vld [vmem:[%s4824_s4 + $0x10] sm:$0xff]  ;;  %v3530_v28 = vpop.eup %3529 }
  0x23   :  { %v3372_v20 = vld [vmem:[%s4824_s4 + $0x8] sm:$0xff]  ;;  %v3371_v21 = vld [vmem:[%s4824_s4] sm:$0xff]  ;;  %v371_v29 = vmul.f32 128.0, %v3530_v28  ;;  %vm375_vm0 = vweird.f32 %v3530_v28 }
  0x24   :  { %v131_v22 = vld [vmem:[%s4825_s2] sm:$0xff]  ;;  %v132_v23 = vld [vmem:[%s4825_s2 + $0x8] sm:$0xff]  ;;  %v3386_v7 = vld [vmem:[%s4827_s1 + $0x38] sm:$0xff] }
  0x25   :  { %v133_v24 = vpack.c.bf16 %v132_v23, %v131_v22  ;;  %v372_v30 = vsub.f32 1.0, %v371_v29  ;;  %v212_v61 = vld [vmem:[%s4826_s18] sm:$0xff]  ;;  %v213_v62 = vld [vmem:[%s4826_s18 + $0x8] sm:$0xff]  ;;  %301 = vmatpush.bf16.msra.mxu2 %v3386_v7  ;;  %v3385_v8 = vld [vmem:[%s4827_s1 + $0x30] sm:$0xff] }
  0x26   :  { %199 = vmatpush.bf16.msra.mxu0 %v3377_v3  ;;  %v214_v1 = vpack.c.bf16 %v213_v62, %v212_v61  ;;  %v3384_v10 = vld [vmem:[%s4827_s1 + $0x28] sm:$0xff]  ;;  %v3409_v29 = vld [vmem:[#allocation3 + $0xb0] sm:$0xf0]  ;;  %v3379_v62 = vld [vmem:[%s4827_s1] sm:$0xff] }
  0x27   :  { %356 = vadd.xlane.f32.xlu0 %v3973_v12  ;;  %360 = vadd.xlane.f32.xlu1 %v3985_v16  ;;  %v373_v31 = vmul.f32 %v3530_v28, %v372_v30  ;;  %v3045_v30 = vld [vmem:[#allocation3 + $0xb0] sm:$0xf]  ;;  %v3401_v7 = vld [vmem:[#allocation3 + $0x70] sm:$0xf0] }
  0x28   :  { %364 = vadd.xlane.f32.xlu2 %v3988_v17 }
  0x29   :  { %v374_v32 = vadd.f32 %v3530_v28, %v373_v31  ;;  %302 = vmatpush.bf16.msra.mxu2 %v3385_v8 }
  0x2a   :  { %200 = vmatpush.bf16.msra.mxu0 %v3376_v5 }
  0x2b   :  { %v4016_v33 = vsel %vm375_vm0, %v3530_v28, %v374_v32  ;;  %v3037_v28 = vld [vmem:[#allocation3 + $0xa8] sm:$0xf] }
  0x2d   :  { %303 = vmatpush.bf16.msra.mxu2 %v3384_v10 }
  0x2e   :  { %201 = vmatpush.bf16.msra.mxu0 %v3375_v15  ;;  %v3383_v15 = vld [vmem:[%s4827_s1 + $0x20] sm:$0xff] }
  0x30   :  { %366 = vadd.xlane.f32.xlu2 %v4013_v27 }
  0x31   :  { %304 = vmatpush.bf16.msra.mxu2 %v3383_v15  ;;  %v2989_v15 = vld [vmem:[#allocation3 + $0x48] sm:$0xf] }
  0x32   :  { %202 = vmatpush.bf16.msra.mxu0 %v3374_v18 }
  0x36   :  { %203 = vmatpush.bf16.msra.mxu0 %v3373_v19  ;;  %v3382_v19 = vld [vmem:[%s4827_s1 + $0x18] sm:$0xff] }
  0x37   :  { %305 = vmatpush.bf16.msra.mxu2 %v3382_v19 }
  0x3a   :  { %204 = vmatpush.bf16.msra.mxu0 %v3372_v20 }
  0x3e   :  { %205 = vmatpush.bf16.msra.mxu0 %v3371_v21 }
  0x41   :  { %206 = vmatmul.bf16.vlgmr.msra.gmra.mxu0 %v133_v24 }
  0x92   :  { %v355_v34 = vpop.xlane.xlu0 %354  ;;  %v359_v41 = vpop.xlane.xlu1 %358 }
  0x93   :  { %v377_v35 = vmul.f32 %v4016_v33, %v355_v34  ;;  %v363_v43 = vpop.xlane.xlu2 %362  ;;  %v379_v46 = vmul.f32 %v4016_v33, %v359_v41  ;;  %v3038_v34 = vor.u32 %v3409_v29, %v3037_v28  ;;  %v3025_v41 = vld [vmem:[#allocation3 + $0x90] sm:$0xf] }
  0x94   :  { %v381_v44 = vmul.f32 %v4016_v33, %v363_v43  ;;  %v3033_v43 = vld [vmem:[#allocation3 + $0x98] sm:$0xf]  ;;  %v2977_v28 = vld [vmem:[#allocation3 + $0x30] sm:$0xf] }
  0x95   :  { %v4020_v36 = vsub.f32 %v3950_v4, %v377_v35  ;;  %v4044_v50 = vsub.f32 %v3965_v9, %v379_v46  ;;  %v3410_v35 = vld [vmem:[#allocation3 + $0xb8] sm:$0xf0] }
  0x96   :  { %v4037_v47 = vsub.f32 %v3970_v11, %v381_v44 }
  0x97   :  { %v393_v37 = vmul.f32 %v4020_v36, %v4020_v36  ;;  %v395_v55 = vmul.f32 %v4044_v50, %v4044_v50 }
  0x98   :  { %v397_v49 = vmul.f32 %v4037_v47, %v4037_v47 }
  0x99   :  { %401 = vadd.xlane.f32.xlu0 %v393_v37  ;;  %v4100_v37 = vor.u32 %v3410_v35, %v3045_v30 }
  0x9a   :  { %v357_v40 = vpop.xlane.xlu0 %356  ;;  %v361_v51 = vpop.xlane.xlu1 %360 }
  0x9b   :  { %v378_v42 = vmul.f32 %v4016_v33, %v357_v40  ;;  %v380_v52 = vmul.f32 %v4016_v33, %v361_v51  ;;  %v365_v53 = vpop.xlane.xlu2 %364  ;;  %v3381_v40 = vld [vmem:[%s4827_s1 + $0x10] sm:$0xff]  ;;  %765 = vmatpush.bf16.msrb.mxu0 %v4100_v37 }
  0x9c   :  { %v382_v56 = vmul.f32 %v4016_v33, %v365_v53  ;;  %306 = vmatpush.bf16.msra.mxu2 %v3381_v40  ;;  %v3403_v53 = vld [vmem:[#allocation3 + $0x80] sm:$0xf0] }
  0x9d   :  { %v4033_v45 = vsub.f32 %v3973_v12, %v378_v42  ;;  %v4048_v54 = vsub.f32 %v3985_v16, %v380_v52  ;;  %v3406_v42 = vld [vmem:[#allocation3 + $0x98] sm:$0xf0]  ;;  %v3013_v52 = vld [vmem:[#allocation3 + $0x78] sm:$0xf] }
  0x9e   :  { %v4056_v58 = vsub.f32 %v3988_v17, %v382_v56  ;;  %v3026_v46 = vor.u32 %v3406_v42, %v3025_v41 }
  0x9f   :  { %v394_v48 = vmul.f32 %v4033_v45, %v4033_v45  ;;  %v396_v57 = vmul.f32 %v4048_v54, %v4048_v54 }
  0xa0   :  { %v398_v60 = vmul.f32 %v4056_v58, %v4056_v58 }
  0xa1   :  { %368 = vadd.xlane.f32.xlu0 %v4027_v39  ;;  %403 = vadd.xlane.f32.xlu1 %v394_v48  ;;  %v3407_v48 = vld [vmem:[#allocation3 + $0xa0] sm:$0xf0] }
  0xa2   :  { %407 = vadd.xlane.f32.xlu2 %v396_v57  ;;  %v4109_v51 = vor.u32 %v3407_v48, %v3033_v43  ;;  %v3014_v57 = vor.u32 %v3403_v53, %v3013_v52  ;;  %v3391_v48 = vld [vmem:[#allocation3 + $0x20] sm:$0xf0]  ;;  %v4149_v53 = vld [vmem:[%s4802_s8] ss:$0 sm:$0xff] }
  0xa3   :  { %v367_v2 = vpop.xlane.xlu2 %366 }
  0xa4   :  { %v383_v3 = vmul.f32 %v4016_v33, %v367_v2  ;;  %766 = vmatpush.bf16.msrb.mxu0 %v4109_v51  ;;  %v3009_v2 = vld [vmem:[#allocation3 + $0x68] sm:$0xf] }
  0xa6   :  { %v4069_v5 = vsub.f32 %v4013_v27, %v383_v3 }
  0xa8   :  { %v399_v6 = vmul.f32 %v4069_v5, %v4069_v5 }
  0xa9   :  { %409 = vadd.xlane.f32.xlu0 %v397_v49  ;;  %405 = vadd.xlane.f32.xlu1 %v395_v55  ;;  %v3380_v49 = vld [vmem:[%s4827_s1 + $0x8] sm:$0xff]  ;;  %v3021_v55 = vld [vmem:[#allocation3 + $0x80] sm:$0xf] }
  0xaa   :  { %413 = vadd.xlane.f32.xlu2 %v399_v6  ;;  %307 = vmatpush.bf16.msra.mxu2 %v3380_v49  ;;  %v2973_v49 = vld [vmem:[#allocation3 + $0x20] sm:$0xf] }
  0xae   :  { %308 = vmatpush.bf16.msra.mxu2 %v3379_v62 }
  0xb1   :  { %411 = vadd.xlane.f32.xlu1 %v398_v60 }
  0xbe   :  { %v207_v59 = vpop.f32.mrf.mxu0 }
  0xc6   :  { %v209_v63 = vpop.f32.mrf.mxu0 }
  0xc7   :  { %v215_v0 = vpack.c.bf16 %v209_v63, %v207_v59  ;;  %v3404_v59 = vld [vmem:[#allocation3 + $0x88] sm:$0xf0] }
  0xc8   :  { %v4112_v60 = vor.u32 %v3404_v59, %v3021_v55 }
  0xc9   :  { %227 = vmatpush.bf16.msra.mxu1 %v215_v0  ;;  %v3001_v0 = vld [vmem:[#allocation3 + $0x60] sm:$0xf] }
  0xca   :  { %767 = vmatpush.bf16.msrb.mxu0 %v4112_v60 }
  0xcc   :  { %2917 = vmatmul.msk.bf16.vlgmr.msra.gmra.mxu1 %vm216_vm1, %v214_v1  ;;  %v3400_v1 = vld [vmem:[#allocation3 + $0x68] sm:$0xf0] }
  0xcd   :  { %707 = vmatpush.bf16.msrb.mxu1 %v3038_v34  ;;  %v3002_v6 = vor.u32 %v3400_v1, %v3001_v0  ;;  %v2961_v1 = vld [vmem:[#allocation3 + $0x8] sm:$0xf] }
  0xd1   :  { %708 = vmatpush.bf16.msrb.mxu1 %v3026_v46  ;;  %v2965_v46 = vld [vmem:[#allocation3 + $0x18] sm:$0xf] }
  0xd5   :  { %709 = vmatpush.bf16.msrb.mxu1 %v3014_v57  ;;  %v2966_v57 = vor.u32 %v3391_v48, %v2965_v46 }
  0xd9   :  { %710 = vmatpush.bf16.msrb.mxu1 %v3002_v6 }
 0x10c   :  { %v402_v13 = vpop.xlane.xlu0 %401 }
 0x10d   :  { %v417_v14 = vmul.f32 %v402_v13, %v4016_v33  ;;  %v4124_v13 = vor.u32 %v3401_v7, %v3009_v2  ;;  %v3389_v2 = vld [vmem:[#allocation3 + $0x10] sm:$0xf0] }
 0x10e   :  { %v4165_v8 = vor.u32 %v3389_v2, %v2961_v1 }
 0x10f   :  { %v425_v18 = vadd.f32 1e-05, %v417_v14  ;;  %768 = vmatpush.bf16.msrb.mxu0 %v4124_v13 }
 0x111   :  { %3531 = vrsqrt.f32 %v425_v18  ;;  %vm439_vm2 = vweird.f32 %v425_v18 }
 0x114   :  { %v369_v20 = vpop.xlane.xlu0 %368  ;;  %v404_v26 = vpop.xlane.xlu1 %403 }
 0x115   :  { %v384_v21 = vmul.f32 %v4016_v33, %v369_v20  ;;  %v418_v32 = vmul.f32 %v404_v26, %v4016_v33  ;;  %v408_v19 = vpop.xlane.xlu2 %407  ;;  %v3398_v26 = vld [vmem:[#allocation3 + $0x58] sm:$0xf0] }
 0x116   :  { %v420_v34 = vmul.f32 %v408_v19, %v4016_v33 }
 0x117   :  { %v4091_v22 = vsub.f32 %v4027_v39, %v384_v21  ;;  %v4095_v24 = vpop.eup %3531  ;;  %v426_v38 = vadd.f32 1e-05, %v418_v32  ;;  %v2985_v32 = vld [vmem:[#allocation3 + $0x38] sm:$0xf] }
 0x118   :  { %v434_v25 = vmul.f32 %v4095_v24, %v425_v18  ;;  %vm440_vm3 = vweird.f32 %v4095_v24  ;;  %v3397_v18 = vld [vmem:[#allocation3 + $0x50] sm:$0xf0]  ;;  %v428_v55 = vadd.f32 1e-05, %v420_v34 }
 0x119   :  { %v400_v23 = vmul.f32 %v4091_v22, %v4091_v22  ;;  %3533 = vrsqrt.f32 %v426_v38  ;;  %vm4120_vm4 = vmor %vm439_vm2, %vm440_vm3  ;;  %vm449_vm5 = vweird.f32 %v426_v38 }
 0x11a   :  { %v435_v31 = vmul.f32 %v4095_v24, %v434_v25  ;;  %v2997_v25 = vld [vmem:[#allocation3 + $0x50] sm:$0xf]  ;;  %3535 = vrsqrt.f32 %v428_v55  ;;  %vm469_vm8 = vweird.f32 %v428_v55 }
 0x11b   :  { %415 = vadd.xlane.f32.xlu0 %v400_v23  ;;  %v2990_v23 = vor.u32 %v3397_v18, %v2989_v15  ;;  %v4130_v30 = vor.u32 %v3398_v26, %v2997_v25 }
 0x11c   :  { %v436_v44 = vmul.f32 0.5, %v435_v31  ;;  %v406_v20 = vpop.xlane.xlu1 %405  ;;  %v3394_v31 = vld [vmem:[#allocation3 + $0x38] sm:$0xf0] }
 0x11d   :  { %711 = vmatpush.bf16.msrb.mxu1 %v2990_v23  ;;  %v2978_v40 = vor.u32 %v3394_v31, %v2977_v28  ;;  %v419_v41 = vmul.f32 %v406_v20, %v4016_v33  ;;  %769 = vmatpush.bf16.msrb.mxu0 %v4130_v30 }
 0x11e   :  { %v437_v56 = vsub.f32 1.5, %v436_v44 }
 0x11f   :  { %v3534_v61 = vpop.eup %3533  ;;  %v427_v59 = vadd.f32 1e-05, %v419_v41 }
 0x120   :  { %v444_v63 = vmul.f32 %v3534_v61, %v426_v38  ;;  %v438_v3 = vmul.f32 %v4095_v24, %v437_v56  ;;  %vm450_vm6 = vweird.f32 %v3534_v61  ;;  %v3392_v38 = vld [vmem:[#allocation3 + $0x28] sm:$0xf0] }
 0x121   :  { %vm4135_vm7 = vmor %vm449_vm5, %vm450_vm6  ;;  %712 = vmatpush.bf16.msrb.mxu1 %v2978_v40  ;;  %v4158_v62 = vor.u32 %v3392_v38, %v2973_v49  ;;  %3537 = vrsqrt.f32 %v427_v59  ;;  %vm459_vm10 = vweird.f32 %v427_v59 }
 0x122   :  { %v445_v10 = vmul.f32 %v3534_v61, %v444_v63  ;;  %v442_v21 = vsel %vm4120_vm4, %v4095_v24, %v438_v3  ;;  %v3395_v24 = vld [vmem:[#allocation3 + $0x40] sm:$0xf0]  ;;  %v3388_v63 = vld [vmem:[#allocation3 + $0x8] sm:$0xf0] }
 0x123   :  { %v513_v42 = vmul.f32 %v442_v21, %v4020_v36  ;;  %v4142_v44 = vor.u32 %v3395_v24, %v2985_v32  ;;  %v4154_v36 = vld [vmem:[%s4803_s9] ss:$0 sm:$0xff] }
 0x124   :  { %v446_v14 = vmul.f32 0.5, %v445_v10  ;;  %v3536_v10 = vpop.eup %3535 }
 0x125   :  { %770 = vmatpush.bf16.msrb.mxu0 %v4142_v44  ;;  %v524_v0 = vmul.f32 %v4149_v53, %v513_v42  ;;  %713 = vmatpush.bf16.msrb.mxu1 %v2966_v57  ;;  %v464_v18 = vmul.f32 %v3536_v10, %v428_v55  ;;  %vm470_vm9 = vweird.f32 %v3536_v10  ;;  %v410_v55 = vpop.xlane.xlu0 %409 }
 0x126   :  { %v447_v29 = vsub.f32 1.5, %v446_v14  ;;  %vm471_vm12 = vmor %vm469_vm8, %vm470_vm9 }
 0x127   :  { %v535_v6 = vadd.f32 %v4154_v36, %v524_v0  ;;  %v3538_v15 = vpop.eup %3537  ;;  %v465_v20 = vmul.f32 %v3536_v10, %v464_v18 }
 0x128   :  { %v448_v43 = vmul.f32 %v3534_v61, %v447_v29  ;;  %v454_v19 = vmul.f32 %v3538_v15, %v427_v59  ;;  %vm460_vm11 = vweird.f32 %v3538_v15 }
 0x129   :  { %771 = vmatpush.bf16.msrb.mxu0 %v4158_v62  ;;  %v466_v25 = vmul.f32 0.5, %v465_v20  ;;  %vm461_vm13 = vmor %vm459_vm10, %vm460_vm11  ;;  %v414_v20 = vpop.xlane.xlu2 %413 }
 0x12a   :  { %v452_v52 = vsel %vm4135_vm7, %v3534_v61, %v448_v43  ;;  %v2953_v61 = vld [vmem:[#allocation3] sm:$0xf]  ;;  %v455_v21 = vmul.f32 %v3538_v15, %v454_v19 }
 0x12b   :  { %v514_v56 = vmul.f32 %v452_v52, %v4033_v45  ;;  %v2954_v45 = vor.u32 %v3388_v63, %v2953_v61  ;;  %v467_v28 = vsub.f32 1.5, %v466_v25 }
 0x12c   :  { %v456_v26 = vmul.f32 0.5, %v455_v21  ;;  %v423_v21 = vmul.f32 %v414_v20, %v4016_v33 }
 0x12d   :  { %v525_v3 = vmul.f32 %v4149_v53, %v514_v56  ;;  %714 = vmatpush.bf16.msrb.mxu1 %v2954_v45  ;;  %772 = vmatpush.bf16.msrb.mxu0 %v4165_v8  ;;  %v468_v31 = vmul.f32 %v3536_v10, %v467_v28 }
 0x12e   :  { %v457_v29 = vsub.f32 1.5, %v456_v26  ;;  %v431_v26 = vadd.f32 1e-05, %v423_v21  ;;  %v3039_v21 = vld [vmem:[#allocation3 + $0xb4] sm:$0xf0] }
 0x12f   :  { %v536_v7 = vadd.f32 %v4154_v36, %v525_v3  ;;  %v472_v34 = vsel %vm471_vm12, %v3536_v10, %v468_v31 }
 0x130   :  { %v458_v32 = vmul.f32 %v3538_v15, %v457_v29  ;;  %v516_v35 = vmul.f32 %v472_v34, %v4048_v54  ;;  %v412_v54 = vpop.xlane.xlu1 %411  ;;  %vm499_vm5 = vweird.f32 %v431_v26 }
 0x131   :  { %v4167_v14 = vpack.c.bf16 %v536_v7, %v535_v6  ;;  %3491 = vmatpush.bf16.msra.mxu1 %v4100_v37  ;;  %v422_v57 = vmul.f32 %v412_v54, %v4016_v33 }
 0x132   :  { %v462_v40 = vsel %vm461_vm13, %v3538_v15, %v458_v32  ;;  %v527_v46 = vmul.f32 %v4149_v53, %v516_v35 }
 0x133   :  { %715 = vmatmul.bf16.vlgmr.msrb.gmra.mxu1 %v4167_v14  ;;  %773 = vmatmul.bf16.vlgmr.msrb.gmra.mxu0 %v4167_v14  ;;  %v515_v41 = vmul.f32 %v462_v40, %v4044_v50  ;;  %v421_v50 = vmul.f32 %v410_v55, %v4016_v33  ;;  %v430_v61 = vadd.f32 1e-05, %v422_v57 }
 0x134   :  { %v538_v38 = vadd.f32 %v4154_v36, %v527_v46 }
 0x135   :  { %3493 = vmatpush.bf16.msra.mxu1 %v4109_v51  ;;  %v526_v48 = vmul.f32 %v4149_v53, %v515_v41  ;;  %v429_v59 = vadd.f32 1e-05, %v421_v50  ;;  %vm489_vm0 = vweird.f32 %v430_v61 }
 0x137   :  { %v537_v52 = vadd.f32 %v4154_v36, %v526_v48  ;;  %3539 = vrsqrt.f32 %v429_v59  ;;  %vm479_vm14 = vweird.f32 %v429_v59 }
 0x138   :  { %3541 = vrsqrt.f32 %v430_v61 }
 0x139   :  { %3495 = vmatpush.bf16.msra.mxu1 %v4112_v60  ;;  %v4183_v56 = vpack.c.bf16 %v538_v38, %v537_v52  ;;  %3543 = vrsqrt.f32 %v431_v26 }
 0x13d   :  { %3497 = vmatpush.bf16.msra.mxu1 %v4124_v13  ;;  %v3540_v63 = vpop.eup %3539 }
 0x13e   :  { %v3542_v0 = vpop.eup %3541  ;;  %v474_v2 = vmul.f32 %v3540_v63, %v429_v59  ;;  %vm480_vm15 = vweird.f32 %v3540_v63 }
 0x13f   :  { %v484_v1 = vmul.f32 %v3542_v0, %v430_v61  ;;  %vm490_vm2 = vweird.f32 %v3542_v0  ;;  %vm481_vm3 = vmor %vm479_vm14, %vm480_vm15  ;;  %v3544_v40 = vpop.eup %3543 }
 0x140   :  { %v475_v6 = vmul.f32 %v3540_v63, %v474_v2  ;;  %vm491_vm4 = vmor %vm489_vm0, %vm490_vm2  ;;  %v494_v41 = vmul.f32 %v3544_v40, %v431_v26  ;;  %vm500_vm6 = vweird.f32 %v3544_v40 }
 0x141   :  { %3499 = vmatpush.bf16.msra.mxu1 %v4130_v30  ;;  %v485_v3 = vmul.f32 %v3542_v0, %v484_v1  ;;  %vm501_vm7 = vmor %vm499_vm5, %vm500_vm6 }
 0x142   :  { %v476_v7 = vmul.f32 0.5, %v475_v6 }
 0x143   :  { %720 = vmatmul.bf16.gmra.mxu1 %v4183_v56  ;;  %778 = vmatmul.bf16.gmra.mxu0 %v4183_v56  ;;  %v486_v45 = vmul.f32 0.5, %v485_v3 }
 0x144   :  { %v477_v15 = vsub.f32 1.5, %v476_v7 }
 0x145   :  { %3501 = vmatpush.bf16.msra.mxu1 %v4142_v44  ;;  %v487_v10 = vsub.f32 1.5, %v486_v45 }
 0x146   :  { %v478_v19 = vmul.f32 %v3540_v63, %v477_v15 }
 0x147   :  { %v488_v18 = vmul.f32 %v3542_v0, %v487_v10 }
 0x148   :  { %v482_v25 = vsel %vm481_vm3, %v3540_v63, %v478_v19 }
 0x149   :  { %v229_v23 = vpop.f32.mrf.mxu1  ;;  %3503 = vmatpush.bf16.msra.mxu1 %v4158_v62  ;;  %v517_v29 = vmul.f32 %v482_v25, %v4037_v47 }
 0x14a   :  { %v234_v42 = vmax.f32 %v229_v23, 0.0  ;;  %v492_v23 = vsel %vm491_vm4, %v3542_v0, %v488_v18 }
 0x14b   :  { %v518_v28 = vmul.f32 %v492_v23, %v4056_v58  ;;  %v528_v31 = vmul.f32 %v4149_v53, %v517_v29  ;;  %v3027_v29 = vld [vmem:[#allocation3 + $0x9c] sm:$0xf0] }
 0x14d   :  { %3505 = vmatpush.bf16.msra.mxu1 %v4165_v8  ;;  %v529_v32 = vmul.f32 %v4149_v53, %v518_v28  ;;  %v539_v34 = vadd.f32 %v4154_v36, %v528_v31  ;;  %v3405_v28 = vld [vmem:[#allocation3 + $0x94] sm:$0xf] }
 0x14f   :  { %v540_v35 = vadd.f32 %v4154_v36, %v529_v32  ;;  %v3030_v32 = vor.u32 %v3405_v28, %v3027_v29 }
 0x151   :  { %v231_v24 = vpop.f32.mrf.mxu1 }
 0x152   :  { %v235_v43 = vmax.f32 %v231_v24, 0.0  ;;  %v4199_v24 = vpack.c.bf16 %v540_v35, %v539_v34  ;;  %v3402_v34 = vld [vmem:[#allocation3 + $0x7c] sm:$0xf]  ;;  %v3015_v35 = vld [vmem:[#allocation3 + $0x84] sm:$0xf0] }
 0x154   :  { %v236_v49 = vpack.c.bf16 %v235_v43, %v234_v42  ;;  %725 = vmatmul.bf16.gmra.mxu1 %v4199_v24  ;;  %v495_v42 = vmul.f32 %v3544_v40, %v494_v41  ;;  %v3399_v41 = vld [vmem:[#allocation3 + $0x64] sm:$0xf] }
 0x156   :  { %309 = vmatmul.bf16.vlgmr.msra.gmra.mxu2 %v236_v49  ;;  %v496_v47 = vmul.f32 0.5, %v495_v42  ;;  %v3003_v42 = vld [vmem:[#allocation3 + $0x6c] sm:$0xf0] }
 0x158   :  { %v497_v48 = vsub.f32 1.5, %v496_v47  ;;  %v2991_v47 = vld [vmem:[#allocation3 + $0x54] sm:$0xf0] }
 0x15a   :  { %v498_v49 = vmul.f32 %v3544_v40, %v497_v48  ;;  %v3393_v48 = vld [vmem:[#allocation3 + $0x34] sm:$0xf] }
 0x15c   :  { %v502_v55 = vsel %vm501_vm7, %v3544_v40, %v498_v49  ;;  %v3018_v40 = vor.u32 %v3402_v34, %v3015_v35  ;;  %v2979_v49 = vld [vmem:[#allocation3 + $0x3c] sm:$0xf0] }
 0x15d   :  { %v519_v57 = vmul.f32 %v502_v55, %v4069_v5  ;;  %v2967_v55 = vld [vmem:[#allocation3 + $0x24] sm:$0xf0] }
 0x15f   :  { %v530_v63 = vmul.f32 %v4149_v53, %v519_v57  ;;  %v2955_v57 = vld [vmem:[#allocation3 + $0xc] sm:$0xf0] }
 0x161   :  { %v541_v3 = vadd.f32 %v4154_v36, %v530_v63 }
 0x18e   :  { %v416_v43 = vpop.xlane.xlu0 %415 }
 0x18f   :  { %v424_v58 = vmul.f32 %v416_v43, %v4016_v33  ;;  %v3006_v43 = vor.u32 %v3399_v41, %v3003_v42 }
 0x191   :  { %v432_v46 = vadd.f32 1e-05, %v424_v58  ;;  %v3396_v58 = vld [vmem:[#allocation3 + $0x4c] sm:$0xf] }
 0x193   :  { %3545 = vrsqrt.f32 %v432_v46  ;;  %vm509_vm8 = vweird.f32 %v432_v46 }
 0x199   :  { %v3546_v38 = vpop.eup %3545 }
 0x19a   :  { %v504_v52 = vmul.f32 %v3546_v38, %v432_v46  ;;  %vm510_vm9 = vweird.f32 %v3546_v38  ;;  %v2994_v46 = vor.u32 %v3396_v58, %v2991_v47 }
 0x19b   :  { %vm511_vm10 = vmor %vm509_vm8, %vm510_vm9 }
 0x19c   :  { %v505_v54 = vmul.f32 %v3546_v38, %v504_v52  ;;  %v3390_v52 = vld [vmem:[#allocation3 + $0x1c] sm:$0xf] }
 0x19e   :  { %v506_v50 = vmul.f32 0.5, %v505_v54  ;;  %v2970_v54 = vor.u32 %v3390_v52, %v2967_v55 }
 0x1a0   :  { %v507_v59 = vsub.f32 1.5, %v506_v50  ;;  %v3387_v50 = vld [vmem:[#allocation3 + $0x4] sm:$0xf] }
 0x1a2   :  { %v508_v61 = vmul.f32 %v3546_v38, %v507_v59  ;;  %v2958_v59 = vor.u32 %v3387_v50, %v2955_v57 }
 0x1a4   :  { %v512_v0 = vsel %vm511_vm10, %v3546_v38, %v508_v61  ;;  %v2982_v38 = vor.u32 %v3393_v48, %v2979_v49 }
 0x1a5   :  { %v520_v1 = vmul.f32 %v512_v0, %v4091_v22 }
 0x1a7   :  { %v531_v2 = vmul.f32 %v4149_v53, %v520_v1  ;;  %v3408_v53 = vld [vmem:[#allocation3 + $0xac] sm:$0xf] }
 0x1a8   :  { %v3042_v25 = vor.u32 %v3408_v53, %v3039_v21 }
 0x1a9   :  { %v542_v6 = vadd.f32 %v4154_v36, %v531_v2  ;;  %v315_v36 = vld [vmem:[%s4832_s14] sm:$0x3]  ;;  %s3820_s14 = smov [#allocation11]  }
 0x1aa   :  { %v316_v31 = vpack.c.bf16 %v315_v36, %v315_v36  ;;  %s2871_s21 = sshll.u32 %s3820_s14, 4  ;;  %s2872_s21 = int_to_ptr.vmem [resolvable:$true] %s2871_s21 }
 0x1ab   :  { %v4209_v45 = vpack.c.bf16 %v542_v6, %v541_v3 }
 0x1ad   :  { %730 = vmatmul.bf16.gmra.mxu1 %v4209_v45 }
 0x1b0   :  { %v774_v5 = vpop.f32.mrf.mxu0 }
 0x1b1   :  { %v1037_v7 = vpack.c.bf16 %v774_v5, %v774_v5 }
 0x1b3   :  { %v1052_v15 = vunpack.c.l.b16 %v1037_v7 }
 0x1b8   :  { %v776_v10 = vpop.f32.mrf.mxu0 }
 0x1b9   :  { %v1038_v18 = vpack.c.bf16 %v776_v10, %v776_v10 }
 0x1bb   :  { %v1053_v19 = vunpack.c.l.b16 %v1038_v18 }
 0x1bd   :  { %783 = vmatmul.bf16.vlgmr.msra.gmra.mxu1 %v4199_v24  ;;  %v1054_v20 = vpack.c.b16 %v1053_v19, %v1052_v15 }
 0x1bf   :  { %1066 = vmatpush.bf16.msrb.mxu1 %v1054_v20 }
 0x1c0   :  { %v779_v61 = vpop.f32.mrf.mxu0 }
 0x1c1   :  { %v1039_v63 = vpack.c.bf16 %v779_v61, %v779_v61 }
 0x1d9   :  { %v310_v22 = vpop.f32.mrf.mxu2 }
 0x1e1   :  { %v312_v23 = vpop.f32.mrf.mxu2 }
 0x1e2   :  { %v317_v26 = vpack.c.bf16 %v312_v23, %v310_v22 }
 0x1e4   :  { %328 = vmatpush.bf16.msra.mxu3 %v317_v26 }
 0x1e7   :  { %2950 = vmatmul.msk.bf16.vlgmr.msra.gmra.mxu3 %vm216_vm1, %v316_v31 }
 0x1e8   :  { %736 = vmatpush.bf16.msrb.mxu3 %v3042_v25 }
 0x1ec   :  { %737 = vmatpush.bf16.msrb.mxu3 %v3030_v32 }
 0x1f0   :  { %738 = vmatpush.bf16.msrb.mxu3 %v3018_v40 }
 0x1f4   :  { %739 = vmatpush.bf16.msrb.mxu3 %v3006_v43 }
 0x1f8   :  { %740 = vmatpush.bf16.msrb.mxu3 %v2994_v46 }
 0x1fc   :  { %741 = vmatpush.bf16.msrb.mxu3 %v2982_v38 }
 0x200   :  { %742 = vmatpush.bf16.msrb.mxu3 %v2970_v54 }
 0x204   :  { %743 = vmatpush.bf16.msrb.mxu3 %v2958_v59 }
 0x207   :  { %744 = vmatmul.bf16.vlgmr.msrb.gmra.mxu3 %v4167_v14  ;;  %v1080_v14 = vunpack.c.l.b16 %v1039_v63 }
 0x208   :  { %3492 = vmatpush.bf16.msra.mxu3 %v4100_v37  ;;  %v781_v37 = vpop.f32.mrf.mxu0 }
 0x209   :  { %v1040_v0 = vpack.c.bf16 %v781_v37, %v781_v37 }
 0x20c   :  { %3494 = vmatpush.bf16.msra.mxu3 %v4109_v51  ;;  %v1081_v51 = vunpack.c.l.b16 %v1040_v0 }
 0x20e   :  { %v1082_v1 = vpack.c.b16 %v1081_v51, %v1080_v14 }
 0x210   :  { %3496 = vmatpush.bf16.msra.mxu3 %v4112_v60  ;;  %v716_v60 = vpop.f32.mrf.mxu1 }
 0x211   :  { %v794_v6 = vmul.f32 0.088388346, %v716_v60 }
 0x213   :  { %v802_v19 = vpack.c.bf16 %v794_v6, %v794_v6 }
 0x214   :  { %3498 = vmatpush.bf16.msra.mxu3 %v4124_v13 }
 0x215   :  { %v820_v22 = vunpack.c.l.b16 %v802_v19 }
 0x217   :  { %749 = vmatmul.bf16.gmra.mxu3 %v4183_v56 }
 0x218   :  { %3500 = vmatpush.bf16.msra.mxu3 %v4130_v30  ;;  %v718_v30 = vpop.f32.mrf.mxu1 }
 0x219   :  { %v795_v5 = vmul.f32 0.088388346, %v718_v30 }
 0x21b   :  { %v803_v20 = vpack.c.bf16 %v795_v5, %v795_v5 }
 0x21c   :  { %3502 = vmatpush.bf16.msra.mxu3 %v4142_v44 }
 0x21d   :  { %v821_v53 = vunpack.c.l.b16 %v803_v20 }
 0x21f   :  { %v822_v36 = vpack.c.b16 %v821_v53, %v820_v22 }
 0x220   :  { %3504 = vmatpush.bf16.msra.mxu3 %v4158_v62  ;;  %v721_v62 = vpop.f32.mrf.mxu1 }
 0x221   :  { %v796_v26 = vmul.f32 0.088388346, %v721_v62 }
 0x223   :  { %v804_v35 = vpack.c.bf16 %v796_v26, %v796_v26 }
 0x224   :  { %3506 = vmatpush.bf16.msra.mxu3 %v4165_v8 }
 0x225   :  { %v846_v43 = vunpack.c.l.b16 %v804_v35 }
 0x227   :  { %754 = vmatmul.bf16.gmra.mxu3 %v4199_v24 }
 0x228   :  { %1094 = vmatpush.bf16.msrb.mxu3 %v1082_v1  ;;  %v723_v56 = vpop.f32.mrf.mxu1 }
 0x229   :  { %v797_v28 = vmul.f32 0.088388346, %v723_v56 }
 0x22b   :  { %v805_v40 = vpack.c.bf16 %v797_v28, %v797_v28  ;;  %v922_v28 = vlaneseq }
 0x22d   :  { %v847_v58 = vunpack.c.l.b16 %v805_v40 }
 0x22f   :  { %v848_v46 = vpack.c.b16 %v847_v58, %v846_v43 }
 0x230   :  { %v726_v2 = vpop.f32.mrf.mxu1 }
 0x231   :  { %v798_v49 = vmul.f32 0.088388346, %v726_v2 }
 0x233   :  { %v806_v59 = vpack.c.bf16 %v798_v49, %v798_v49 }
 0x235   :  { %v872_v37 = vunpack.c.l.b16 %v806_v59 }
 0x237   :  { %759 = vmatmul.bf16.gmra.mxu3 %v4209_v45 }
 0x238   :  { %v728_v24 = vpop.f32.mrf.mxu1 }
 0x239   :  { %v799_v38 = vmul.f32 0.088388346, %v728_v24 }
 0x23b   :  { %v807_v61 = vpack.c.bf16 %v799_v38, %v799_v38 }
 0x23d   :  { %v873_v14 = vunpack.c.l.b16 %v807_v61 }
 0x23f   :  { %v874_v1 = vpack.c.b16 %v873_v14, %v872_v37 }
 0x240   :  { %v731_v23 = vpop.f32.mrf.mxu1 }
 0x241   :  { %v800_v62 = vmul.f32 0.088388346, %v731_v23 }
 0x247   :  { %788 = vmatmul.bf16.vlgmr.msra.gmra.mxu3 %v4209_v45 }
 0x248   :  { %v733_v42 = vpop.f32.mrf.mxu1 }
 0x249   :  { %v801_v56 = vmul.f32 0.088388346, %v733_v42 }
 0x24b   :  { %v809_v24 = vpack.c.bf16 %v801_v56, %v801_v56 }
 0x24d   :  { %v899_v20 = vunpack.c.l.b16 %v809_v24 }
 0x250   :  { %v784_v55 = vpop.f32.mrf.mxu1 }
 0x251   :  { %v1041_v60 = vpack.c.bf16 %v784_v55, %v784_v55 }
 0x258   :  { %v786_v51 = vpop.f32.mrf.mxu1 }
 0x259   :  { %v1042_v30 = vpack.c.bf16 %v786_v51, %v786_v51 }
 0x25b   :  { %v1109_v6 = vunpack.c.l.b16 %v1042_v30 }
 0x26a   :  { %v4230_v13 = vpop.f32.mrf.mxu3 }
 0x272   :  { %v332_v44 = vpop.f32.mrf.mxu3 }
 0x28a   :  { %v745_v8 = vpop.f32.mrf.mxu3 }
 0x28b   :  { %v810_v3 = vpack.c.bf16 %v745_v8, %v745_v8 }
 0x28d   :  { %v826_v15 = vunpack.c.l.b16 %v810_v3  ;;  %v1108_v3 = vunpack.c.l.b16 %v1041_v60 }
 0x292   :  { %v747_v7 = vpop.f32.mrf.mxu3 }
 0x293   :  { %v811_v10 = vpack.c.bf16 %v747_v7, %v747_v7 }
 0x295   :  { %v827_v18 = vunpack.c.l.b16 %v811_v10  ;;  %v808_v10 = vpack.c.bf16 %v800_v62, %v800_v62 }
 0x297   :  { %v828_v45 = vpack.c.b16 %v827_v18, %v826_v15  ;;  %v1110_v18 = vpack.c.b16 %v1109_v6, %v1108_v3  ;;  %v898_v19 = vunpack.c.l.b16 %v808_v10 }
 0x299   :  { %837 = vmatpush.bf16.xpose.msrb.mxu2 %v828_v45  ;;  %v900_v22 = vpack.c.b16 %v899_v20, %v898_v19 }
 0x29a   :  { %v750_v21 = vpop.f32.mrf.mxu3 }
 0x29b   :  { %v812_v25 = vpack.c.bf16 %v750_v21, %v750_v21 }
 0x29d   :  { %v852_v32 = vunpack.c.l.b16 %v812_v25 }
 0x2a0   :  { %838 = vmatmul.bf16.vlgmr.msrb.gmra.mxu2 %v822_v36 }
 0x2a2   :  { %v752_v29 = vpop.f32.mrf.mxu3 }
 0x2a3   :  { %v813_v31 = vpack.c.bf16 %v752_v29, %v752_v29  ;;  %v923_v29 = vshrl.u32 %v922_v28, 7 }
 0x2a5   :  { %v853_v34 = vunpack.c.l.b16 %v813_v31  ;;  %3519 = vset.pattern.permute.xlu1 %v923_v29  ;;  %3521 = vset.pattern.permute.xlu0 %v923_v29  ;;  %v4232_v31 = vadd.s32 8, %v923_v29 }
 0x2a7   :  { %v854_v41 = vpack.c.b16 %v853_v34, %v852_v32  ;;  %3520 = vset.pattern.permute.xlu2 %v4232_v31  ;;  %v926_v32 = vand.u32 127, %v922_v28 }
 0x2a9   :  { %863 = vmatpush.bf16.xpose.msra.mxu2 %v854_v41  ;;  %vm927_vm11 = vcmp.le.s32.totalorder %v926_v32, %v923_v29  ;;  %vm928_vm12 = vcmp.le.s32.totalorder %v926_v32, %v4232_v31 }
 0x2aa   :  { %v755_v47 = vpop.f32.mrf.mxu3 }
 0x2ab   :  { %v814_v48 = vpack.c.bf16 %v755_v47, %v755_v47 }
 0x2ad   :  { %v878_v50 = vunpack.c.l.b16 %v814_v48 }
 0x2b0   :  { %864 = vmatmul.bf16.vlgmr.msra.gmra.mxu2 %v848_v46 }
 0x2b2   :  { %v757_v52 = vpop.f32.mrf.mxu3 }
 0x2b3   :  { %v815_v54 = vpack.c.bf16 %v757_v52, %v757_v52 }
 0x2b5   :  { %v879_v57 = vunpack.c.l.b16 %v815_v54 }
 0x2b7   :  { %v880_v63 = vpack.c.b16 %v879_v57, %v878_v50 }
 0x2b9   :  { %889 = vmatpush.bf16.xpose.msrb.mxu2 %v880_v63 }
 0x2ba   :  { %v760_v0 = vpop.f32.mrf.mxu3 }
 0x2bb   :  { %v816_v44 = vpack.c.bf16 %v760_v0, %v760_v0 }
 0x2bd   :  { %v904_v5 = vunpack.c.l.b16 %v816_v44 }
 0x2c0   :  { %890 = vmatmul.bf16.vlgmr.msrb.gmra.mxu2 %v874_v1 }
 0x2c2   :  { %v762_v8 = vpop.f32.mrf.mxu3 }
 0x2c3   :  { %v817_v2 = vpack.c.bf16 %v762_v8, %v762_v8 }
 0x2c5   :  { %v905_v7 = vunpack.c.l.b16 %v817_v2 }
 0x2c7   :  { %v906_v15 = vpack.c.b16 %v905_v7, %v904_v5 }
 0x2c9   :  { %915 = vmatpush.bf16.xpose.msra.mxu2 %v906_v15 }
 0x2ca   :  { %v789_v45 = vpop.f32.mrf.mxu3 }
 0x2cb   :  { %v1043_v53 = vpack.c.bf16 %v789_v45, %v789_v45 }
 0x2cd   :  { %v1136_v23 = vunpack.c.l.b16 %v1043_v53 }
 0x2d0   :  { %916 = vmatmul.bf16.vlgmr.msra.gmra.mxu2 %v900_v22 }
 0x2d1   :  { %1122 = vmatpush.bf16.msrb.mxu2 %v1110_v18 }
 0x2d2   :  { %v791_v21 = vpop.f32.mrf.mxu3 }
 0x2d3   :  { %v1044_v36 = vpack.c.bf16 %v791_v21, %v791_v21 }
 0x2d5   :  { %v1137_v25 = vunpack.c.l.b16 %v1044_v36 }
 0x2d7   :  { %v1138_v26 = vpack.c.b16 %v1137_v25, %v1136_v23 }
 0x2d9   :  { %1150 = vmatpush.bf16.msra.mxu1 %v1138_v26 }
 0x323   :  { %v839_v34 = vpop.f32.mrf.mxu2 }
 0x324   :  { %v933_v35 = vsel %vm927_vm11, %v839_v34, -1e+30 }
 0x325   :  { %v941_v40 = vsel %vm216_vm1, %v933_v35, -inf }
 0x326   :  { %942 = vmax.xlane.f32.xlu1 %v941_v40 }
 0x32b   :  { %v841_v41 = vpop.f32.mrf.mxu2 }
 0x32c   :  { %v934_v42 = vsel %vm928_vm12, %v841_v41, -1e+30 }
 0x32d   :  { %v944_v43 = vsel %vm216_vm1, %v934_v42, -inf }
 0x32e   :  { %945 = vmax.xlane.f32.xlu2 %v944_v43 }
 0x333   :  { %v865_v58 = vpop.f32.mrf.mxu2 }
 0x334   :  { %v935_v47 = vsel %vm927_vm11, %v865_v58, -1e+30 }
 0x335   :  { %v947_v46 = vsel %vm216_vm1, %v935_v47, -inf }
 0x336   :  { %948 = vmax.xlane.f32.xlu0 %v947_v46 }
 0x33b   :  { %v867_v48 = vpop.f32.mrf.mxu2 }
 0x33c   :  { %v936_v49 = vsel %vm928_vm12, %v867_v48, -1e+30 }
 0x33d   :  { %v950_v38 = vsel %vm216_vm1, %v936_v49, -inf }
 0x33e   :  { %951 = vmax.xlane.f32.xlu1 %v950_v38 }
 0x343   :  { %v891_v52 = vpop.f32.mrf.mxu2 }
 0x344   :  { %v937_v55 = vsel %vm927_vm11, %v891_v52, -1e+30 }
 0x345   :  { %v953_v54 = vsel %vm216_vm1, %v937_v55, -inf }
 0x346   :  { %954 = vmax.xlane.f32.xlu2 %v953_v54 }
 0x34b   :  { %v893_v50 = vpop.f32.mrf.mxu2 }
 0x34c   :  { %v938_v57 = vsel %vm928_vm12, %v893_v50, -1e+30 }
 0x34d   :  { %v956_v59 = vsel %vm216_vm1, %v938_v57, -inf }
 0x34e   :  { %957 = vmax.xlane.f32.xlu0 %v956_v59 }
 0x353   :  { %v917_v61 = vpop.f32.mrf.mxu2 }
 0x354   :  { %v939_v63 = vsel %vm927_vm11, %v917_v61, -1e+30 }
 0x355   :  { %v959_v37 = vsel %vm216_vm1, %v939_v63, -inf }
 0x356   :  { %960 = vmax.xlane.f32.xlu1 %v959_v37 }
 0x35b   :  { %v919_v14 = vpop.f32.mrf.mxu2 }
 0x35c   :  { %v940_v0 = vsel %vm928_vm12, %v919_v14, -1e+30 }
 0x35d   :  { %v962_v51 = vsel %vm216_vm1, %v940_v0, -inf }
 0x35e   :  { %963 = vmax.xlane.f32.xlu2 %v962_v51 }
 0x399   :  { %v943_v1 = vpop.xlane.xlu1 %942 }
 0x39a   :  { %v965_v60 = vsub.f32 %v933_v35, %v943_v1 }
 0x39c   :  { %v973_v30 = vmul.f32 1.442695, %v965_v60 }
 0x39e   :  { %3547 = vpow2.f32 %v973_v30 }
 0x3a1   :  { %v946_v44 = vpop.xlane.xlu2 %945 }
 0x3a2   :  { %v966_v62 = vsub.f32 %v934_v42, %v946_v44 }
 0x3a4   :  { %v3548_v56 = vpop.eup %3547  ;;  %v975_v8 = vmul.f32 1.442695, %v966_v62 }
 0x3a5   :  { %v989_v2 = vsel %vm216_vm1, %v3548_v56, 0.0 }
 0x3a6   :  { %3549 = vpow2.f32 %v975_v8  ;;  %990 = vadd.xlane.f32.xlu0 %v989_v2 }
 0x3a9   :  { %v949_v3 = vpop.xlane.xlu0 %948 }
 0x3aa   :  { %v967_v6 = vsub.f32 %v935_v47, %v949_v3 }
 0x3ac   :  { %v3550_v5 = vpop.eup %3549  ;;  %v977_v7 = vmul.f32 1.442695, %v967_v6 }
 0x3ad   :  { %v992_v10 = vsel %vm216_vm1, %v3550_v5, 0.0 }
 0x3ae   :  { %3551 = vpow2.f32 %v977_v7  ;;  %993 = vadd.xlane.f32.xlu1 %v992_v10  ;;  %v3418_v7 = vld [vmem:[%s4805_s11 + $0x38] sm:$0xff] }
 0x3af   :  { %1225 = vmatpush.bf16.msra.mxu0 %v3418_v7 }
 0x3b1   :  { %v952_v24 = vpop.xlane.xlu1 %951 }
 0x3b2   :  { %v968_v15 = vsub.f32 %v936_v49, %v952_v24  ;;  %v3417_v24 = vld [vmem:[%s4805_s11 + $0x30] sm:$0xff] }
 0x3b3   :  { %1226 = vmatpush.bf16.msra.mxu0 %v3417_v24 }
 0x3b4   :  { %v3552_v18 = vpop.eup %3551  ;;  %v979_v19 = vmul.f32 1.442695, %v968_v15 }
 0x3b5   :  { %v995_v20 = vsel %vm216_vm1, %v3552_v18, 0.0 }
 0x3b6   :  { %3553 = vpow2.f32 %v979_v19  ;;  %996 = vadd.xlane.f32.xlu2 %v995_v20 }
 0x3b9   :  { %v955_v45 = vpop.xlane.xlu2 %954 }
 0x3ba   :  { %v969_v22 = vsub.f32 %v937_v55, %v955_v45 }
 0x3bc   :  { %v3554_v53 = vpop.eup %3553  ;;  %v981_v21 = vmul.f32 1.442695, %v969_v22 }
 0x3bd   :  { %v998_v36 = vsel %vm216_vm1, %v3554_v53, 0.0 }
 0x3be   :  { %3555 = vpow2.f32 %v981_v21  ;;  %999 = vadd.xlane.f32.xlu0 %v998_v36  ;;  %v3415_v21 = vld [vmem:[%s4805_s11 + $0x20] sm:$0xff] }
 0x3c1   :  { %v958_v23 = vpop.xlane.xlu0 %957 }
 0x3c2   :  { %v970_v25 = vsub.f32 %v938_v57, %v958_v23 }
 0x3c4   :  { %v3556_v26 = vpop.eup %3555  ;;  %v983_v28 = vmul.f32 1.442695, %v970_v25 }
 0x3c5   :  { %v1001_v29 = vsel %vm216_vm1, %v3556_v26, 0.0 }
 0x3c6   :  { %3557 = vpow2.f32 %v983_v28  ;;  %1002 = vadd.xlane.f32.xlu1 %v1001_v29 }
 0x3c9   :  { %v961_v32 = vpop.xlane.xlu1 %960 }
 0x3ca   :  { %v971_v34 = vsub.f32 %v939_v63, %v961_v32 }
 0x3cc   :  { %v3558_v35 = vpop.eup %3557  ;;  %v985_v40 = vmul.f32 1.442695, %v971_v34 }
 0x3cd   :  { %v1004_v41 = vsel %vm216_vm1, %v3558_v35, 0.0 }
 0x3ce   :  { %3559 = vpow2.f32 %v985_v40  ;;  %1005 = vadd.xlane.f32.xlu2 %v1004_v41 }
 0x3d1   :  { %v964_v42 = vpop.xlane.xlu2 %963 }
 0x3d2   :  { %v972_v43 = vsub.f32 %v940_v0, %v964_v42 }
 0x3d4   :  { %v4262_v58 = vpop.eup %3559  ;;  %v987_v47 = vmul.f32 1.442695, %v972_v43 }
 0x3d5   :  { %v1007_v46 = vsel %vm216_vm1, %v4262_v58, 0.0 }
 0x3d6   :  { %3561 = vpow2.f32 %v987_v47  ;;  %1008 = vadd.xlane.f32.xlu0 %v1007_v46  ;;  %v3413_v46 = vld [vmem:[%s4805_s11 + $0x10] sm:$0xff] }
 0x3dc   :  { %v4266_v48 = vpop.eup %3561 }
 0x3dd   :  { %v1010_v49 = vsel %vm216_vm1, %v4266_v48, 0.0 }
 0x3de   :  { %1011 = vadd.xlane.f32.xlu1 %v1010_v49  ;;  %v3412_v49 = vld [vmem:[%s4805_s11 + $0x8] sm:$0xff] }
 0x419   :  { %v991_v38 = vpop.xlane.xlu0 %990 }
 0x41a   :  { %3563 = vrcp.f32 %v991_v38 }
 0x420   :  { %v3564_v55 = vpop.eup %3563 }
 0x421   :  { %v994_v52 = vpop.xlane.xlu1 %993  ;;  %v1021_v54 = vmul.f32 %v3564_v55, %v3548_v56 }
 0x422   :  { %3565 = vrcp.f32 %v994_v52 }
 0x423   :  { %v1029_v57 = vpack.c.bf16 %v1021_v54, %v1021_v54 }
 0x425   :  { %v1047_v37 = vunpack.c.l.b16 %v1029_v57 }
 0x428   :  { %v3566_v50 = vpop.eup %3565 }
 0x429   :  { %v1022_v59 = vmul.f32 %v3566_v50, %v3550_v5  ;;  %v997_v61 = vpop.xlane.xlu2 %996 }
 0x42a   :  { %3567 = vrcp.f32 %v997_v61 }
 0x42b   :  { %v1030_v63 = vpack.c.bf16 %v1022_v59, %v1022_v59 }
 0x42d   :  { %v1048_v14 = vunpack.c.l.b16 %v1030_v63 }
 0x42f   :  { %v1049_v0 = vpack.c.b16 %v1048_v14, %v1047_v37 }
 0x430   :  { %v3568_v1 = vpop.eup %3567 }
 0x431   :  { %v1000_v51 = vpop.xlane.xlu0 %999  ;;  %3047 = vmatmul.msk.bf16.vlgmr.msrb.gmra.mxu1 %vm216_vm1, %v1049_v0  ;;  %v1023_v60 = vmul.f32 %v3568_v1, %v3552_v18  ;;  %v3416_v18 = vld [vmem:[%s4805_s11 + $0x28] sm:$0xff] }
 0x432   :  { %3569 = vrcp.f32 %v1000_v51  ;;  %1227 = vmatpush.bf16.msra.mxu0 %v3416_v18 }
 0x433   :  { %v1031_v44 = vpack.c.bf16 %v1023_v60, %v1023_v60 }
 0x435   :  { %v1075_v2 = vunpack.c.l.b16 %v1031_v44 }
 0x436   :  { %1228 = vmatpush.bf16.msra.mxu0 %v3415_v21 }
 0x438   :  { %v3570_v30 = vpop.eup %3569 }
 0x439   :  { %v1024_v62 = vmul.f32 %v3570_v30, %v3554_v53  ;;  %v1003_v8 = vpop.xlane.xlu1 %1002 }
 0x43a   :  { %3571 = vrcp.f32 %v1003_v8 }
 0x43b   :  { %v1032_v56 = vpack.c.bf16 %v1024_v62, %v1024_v62 }
 0x43d   :  { %v1076_v3 = vunpack.c.l.b16 %v1032_v56 }
 0x43f   :  { %v1077_v6 = vpack.c.b16 %v1076_v3, %v1075_v2 }
 0x440   :  { %v3572_v10 = vpop.eup %3571 }
 0x441   :  { %3048 = vmatmul.msk.bf16.vlgmr.msrb.gmra.mxu3 %vm216_vm1, %v1077_v6  ;;  %v1006_v5 = vpop.xlane.xlu2 %1005  ;;  %v1025_v15 = vmul.f32 %v3572_v10, %v3556_v26  ;;  %v3414_v26 = vld [vmem:[%s4805_s11 + $0x18] sm:$0xff] }
 0x442   :  { %3573 = vrcp.f32 %v1006_v5  ;;  %1229 = vmatpush.bf16.msra.mxu0 %v3414_v26 }
 0x443   :  { %v1033_v20 = vpack.c.bf16 %v1025_v15, %v1025_v15 }
 0x445   :  { %v1103_v36 = vunpack.c.l.b16 %v1033_v20 }
 0x446   :  { %1230 = vmatpush.bf16.msra.mxu0 %v3413_v46  ;;  %v3447_v46 = vld [vmem:[#allocation6 + $0xe4] sm:$0xf] }
 0x448   :  { %v3574_v19 = vpop.eup %3573 }
 0x449   :  { %v1026_v45 = vmul.f32 %v3574_v19, %v3558_v35  ;;  %v1009_v22 = vpop.xlane.xlu0 %1008 }
 0x44a   :  { %3575 = vrcp.f32 %v1009_v22  ;;  %1231 = vmatpush.bf16.msra.mxu0 %v3412_v49 }
 0x44b   :  { %v1034_v53 = vpack.c.bf16 %v1026_v45, %v1026_v45 }
 0x44d   :  { %v1104_v23 = vunpack.c.l.b16 %v1034_v53 }
 0x44f   :  { %v1105_v25 = vpack.c.b16 %v1104_v23, %v1103_v36 }
 0x450   :  { %v3576_v29 = vpop.eup %3575 }
 0x451   :  { %v1012_v28 = vpop.xlane.xlu1 %1011  ;;  %3049 = vmatmul.msk.bf16.vlgmr.msrb.gmra.mxu2 %vm216_vm1, %v1105_v25  ;;  %v1027_v32 = vmul.f32 %v3576_v29, %v4262_v58  ;;  %v3411_v58 = vld [vmem:[%s4805_s11] sm:$0xff] }
 0x452   :  { %3577 = vrcp.f32 %v1012_v28  ;;  %1232 = vmatpush.bf16.msra.mxu0 %v3411_v58  ;;  %v3199_v58 = vld [vmem:[#allocation6 + $0xf0] sm:$0xf0] }
 0x453   :  { %v1035_v35 = vpack.c.bf16 %v1027_v32, %v1027_v32 }
 0x455   :  { %v1131_v42 = vunpack.c.l.b16 %v1035_v35 }
 0x458   :  { %v3578_v34 = vpop.eup %3577 }
 0x459   :  { %v1028_v40 = vmul.f32 %v3578_v34, %v4266_v48 }
 0x45b   :  { %v1036_v41 = vpack.c.bf16 %v1028_v40, %v1028_v40 }
 0x45d   :  { %v1132_v43 = vunpack.c.l.b16 %v1036_v41 }
 0x45f   :  { %v1133_v47 = vpack.c.b16 %v1132_v43, %v1131_v42  ;;  %v3197_v43 = vld [vmem:[#allocation6 + $0xe0] sm:$0xf] }
 0x461   :  { %3050 = vmatmul.msk.bf16.vlgmr.msra.gmra.mxu1 %vm216_vm1, %v1133_v47  ;;  %v3449_v47 = vld [vmem:[#allocation6 + $0xec] sm:$0xf0] }
 0x462   :  { %v3198_v49 = vor.u32 %v3449_v47, %v3197_v43  ;;  %v3159_v43 = vld [vmem:[#allocation6 + $0x98] sm:$0xf0] }
 0x464   :  { %1642 = vmatpush.bf16.msra.mxu3 %v3198_v49  ;;  %v3433_v49 = vld [vmem:[#allocation6 + $0x6c] sm:$0xf0] }
 0x4ae   :  { %v1068_v48 = vpop.f32.mrf.mxu1 }
 0x4b6   :  { %v1070_v38 = vpop.f32.mrf.mxu1 }
 0x4b7   :  { %v1157_v52 = vpack.c.bf16 %v1070_v38, %v1068_v48  ;;  %v3448_v48 = vld [vmem:[#allocation6 + $0xec] sm:$0xf]  ;;  %v3207_v38 = vld [vmem:[#allocation6 + $0xf8] sm:$0xf0] }
 0x4b9   :  { %1233 = vmatmul.bf16.vlgmr.msra.gmra.mxu0 %v1157_v52  ;;  %v3202_v52 = vor.u32 %v3447_v46, %v3199_v58  ;;  %v3133_v46 = vld [vmem:[#allocation6 + $0x60] sm:$0xf]  ;;  %v3431_v58 = vld [vmem:[#allocation6 + $0x64] sm:$0xf] }
 0x4bb   :  { %1671 = vmatpush.bf16.msra.mxu2 %v3202_v52  ;;  %v3141_v52 = vld [vmem:[#allocation6 + $0x68] sm:$0xf] }
 0x4c4   :  { %v1096_v55 = vpop.f32.mrf.mxu3 }
 0x4cc   :  { %v1098_v54 = vpop.f32.mrf.mxu3 }
 0x4cd   :  { %v1158_v50 = vpack.c.bf16 %v1098_v54, %v1096_v55  ;;  %v3210_v55 = vor.u32 %v3448_v48, %v3207_v38  ;;  %v3205_v54 = vld [vmem:[#allocation6 + $0xe8] sm:$0xf]  ;;  %v3134_v48 = vor.u32 %v3433_v49, %v3133_v46  ;;  %v3135_v38 = vld [vmem:[#allocation6 + $0x70] sm:$0xf0] }
 0x4cf   :  { %1238 = vmatmul.bf16.gmra.mxu0 %v1158_v50  ;;  %v3450_v50 = vld [vmem:[#allocation6 + $0xf4] sm:$0xf0] }
 0x4d0   :  { %1729 = vmatpush.bf16.msrb.mxu0 %v3210_v55  ;;  %v3434_v55 = vld [vmem:[#allocation6 + $0x74] sm:$0xf0] }
 0x4d4   :  { %v1124_v57 = vpop.f32.mrf.mxu2 }
 0x4dc   :  { %v1126_v59 = vpop.f32.mrf.mxu2 }
 0x4dd   :  { %v1159_v61 = vpack.c.bf16 %v1126_v59, %v1124_v57  ;;  %v3206_v57 = vor.u32 %v3450_v50, %v3205_v54  ;;  %v3181_v59 = vld [vmem:[#allocation6 + $0xc0] sm:$0xf]  ;;  %v3138_v54 = vor.u32 %v3431_v58, %v3135_v38  ;;  %v3142_v50 = vor.u32 %v3434_v55, %v3141_v52  ;;  %v3420_v58 = vld [vmem:[#allocation6 + $0xc] sm:$0xf] }
 0x4de   :  { %v1152_v63 = vpop.f32.mrf.mxu1 }
 0x4df   :  { %1243 = vmatmul.bf16.gmra.mxu0 %v1159_v61  ;;  %v3445_v61 = vld [vmem:[#allocation6 + $0xcc] sm:$0xf0]  ;;  %1700 = vmatpush.bf16.msrb.mxu1 %v3206_v57  ;;  %v3432_v57 = vld [vmem:[#allocation6 + $0x6c] sm:$0xf] }
 0x4e6   :  { %v1154_v37 = vpop.f32.mrf.mxu1 }
 0x4e7   :  { %v1160_v14 = vpack.c.bf16 %v1154_v37, %v1152_v63  ;;  %v3443_v63 = vld [vmem:[#allocation6 + $0xc4] sm:$0xf]  ;;  %v3182_v37 = vor.u32 %v3445_v61, %v3181_v59  ;;  %v3143_v59 = vld [vmem:[#allocation6 + $0x78] sm:$0xf0] }
 0x4e8   :  { %v3146_v61 = vor.u32 %v3432_v57, %v3143_v59 }
 0x4e9   :  { %1643 = vmatpush.bf16.msra.mxu3 %v3182_v37  ;;  %v3429_v37 = vld [vmem:[#allocation6 + $0x4c] sm:$0xf0] }
 0x4ef   :  { %1248 = vmatmul.bf16.gmra.mxu0 %v1160_v14  ;;  %v3183_v14 = vld [vmem:[#allocation6 + $0xd0] sm:$0xf0] }
 0x536   :  { %v1234_v0 = vpop.f32.mrf.mxu0 }
 0x537   :  { %v4301_v51 = vadd.f32 %v1234_v0, %v3950_v4  ;;  %v3189_v0 = vld [vmem:[#allocation6 + $0xc8] sm:$0xf] }
 0x539   :  { %1264 = vadd.xlane.f32.xlu2 %v4301_v51 }
 0x53e   :  { %v1236_v1 = vpop.f32.mrf.mxu0 }
 0x53f   :  { %v4305_v60 = vadd.f32 %v1236_v1, %v3973_v12  ;;  %v3446_v1 = vld [vmem:[#allocation6 + $0xd4] sm:$0xf0] }
 0x541   :  { %1266 = vadd.xlane.f32.xlu0 %v4305_v60 }
 0x54c   :  { %v1239_v30 = vpop.f32.mrf.mxu0 }
 0x54d   :  { %v4309_v44 = vadd.f32 %v1239_v30, %v3965_v9  ;;  %v3186_v30 = vor.u32 %v3443_v63, %v3183_v14  ;;  %v3117_v63 = vld [vmem:[#allocation6 + $0x40] sm:$0xf]  ;;  %v3427_v14 = vld [vmem:[#allocation6 + $0x44] sm:$0xf] }
 0x54f   :  { %1268 = vadd.xlane.f32.xlu1 %v4309_v44  ;;  %1672 = vmatpush.bf16.msra.mxu2 %v3186_v30  ;;  %v3125_v30 = vld [vmem:[#allocation6 + $0x48] sm:$0xf] }
 0x554   :  { %v1241_v62 = vpop.f32.mrf.mxu0 }
 0x555   :  { %v4313_v8 = vadd.f32 %v1241_v62, %v3985_v16  ;;  %v3190_v62 = vor.u32 %v3446_v1, %v3189_v0  ;;  %v3118_v0 = vor.u32 %v3429_v37, %v3117_v63  ;;  %v3119_v1 = vld [vmem:[#allocation6 + $0x50] sm:$0xf0] }
 0x557   :  { %1270 = vadd.xlane.f32.xlu2 %v4313_v8  ;;  %1701 = vmatpush.bf16.msrb.mxu1 %v3190_v62  ;;  %v3430_v62 = vld [vmem:[#allocation6 + $0x54] sm:$0xf0] }
 0x55c   :  { %v1244_v4 = vpop.f32.mrf.mxu0 }
 0x55d   :  { %v4317_v56 = vadd.f32 %v1244_v4, %v3970_v11  ;;  %v3444_v4 = vld [vmem:[#allocation6 + $0xcc] sm:$0xf] }
 0x55f   :  { %1272 = vadd.xlane.f32.xlu0 %v4317_v56 }
 0x564   :  { %v1246_v12 = vpop.f32.mrf.mxu0 }
 0x565   :  { %v4321_v2 = vadd.f32 %v1246_v12, %v3988_v17  ;;  %v3191_v12 = vld [vmem:[#allocation6 + $0xd8] sm:$0xf0] }
 0x567   :  { %1274 = vadd.xlane.f32.xlu1 %v4321_v2 }
 0x56c   :  { %v1249_v9 = vpop.f32.mrf.mxu0 }
 0x56d   :  { %v4325_v3 = vadd.f32 %v1249_v9, %v4013_v27  ;;  %v3194_v9 = vor.u32 %v3444_v4, %v3191_v12  ;;  %v3122_v4 = vor.u32 %v3427_v14, %v3119_v1  ;;  %v3126_v12 = vor.u32 %v3430_v62, %v3125_v30 }
 0x56f   :  { %1276 = vadd.xlane.f32.xlu1 %v4325_v3  ;;  %1730 = vmatpush.bf16.msrb.mxu0 %v3194_v9  ;;  %v3428_v9 = vld [vmem:[#allocation6 + $0x4c] sm:$0xf] }
 0x574   :  { %v1251_v10 = vpop.f32.mrf.mxu0 }
 0x575   :  { %v4339_v27 = vadd.f32 %v1251_v10, %v4027_v39  ;;  %v3173_v10 = vld [vmem:[#allocation6 + $0xa8] sm:$0xf] }
 0x5ac   :  { %v1265_v16 = vpop.xlane.xlu2 %1264 }
 0x5ad   :  { %v1280_v6 = vmul.f32 %v1265_v16, %v4016_v33  ;;  %v3165_v16 = vld [vmem:[#allocation6 + $0xa0] sm:$0xf] }
 0x5af   :  { %v4330_v11 = vsub.f32 %v4301_v51, %v1280_v6  ;;  %v3441_v6 = vld [vmem:[#allocation6 + $0xac] sm:$0xf0] }
 0x5b1   :  { %v1296_v5 = vmul.f32 %v4330_v11, %v4330_v11 }
 0x5b3   :  { %1304 = vadd.xlane.f32.xlu2 %v1296_v5  ;;  %v3439_v5 = vld [vmem:[#allocation6 + $0xa4] sm:$0xf] }
 0x5b4   :  { %v1267_v17 = vpop.xlane.xlu0 %1266 }
 0x5b5   :  { %v1281_v7 = vmul.f32 %v1267_v17, %v4016_v33  ;;  %v3166_v17 = vor.u32 %v3441_v6, %v3165_v16  ;;  %v3127_v16 = vld [vmem:[#allocation6 + $0x58] sm:$0xf0] }
 0x5b6   :  { %v3130_v6 = vor.u32 %v3428_v9, %v3127_v16 }
 0x5b7   :  { %v4336_v24 = vsub.f32 %v4305_v60, %v1281_v7  ;;  %v3167_v7 = vld [vmem:[#allocation6 + $0xb0] sm:$0xf0]  ;;  %1644 = vmatpush.bf16.msra.mxu3 %v3166_v17  ;;  %v3425_v17 = vld [vmem:[#allocation6 + $0x2c] sm:$0xf0] }
 0x5b9   :  { %v1297_v15 = vmul.f32 %v4336_v24, %v4336_v24 }
 0x5bb   :  { %1306 = vadd.xlane.f32.xlu0 %v1297_v15  ;;  %1278 = vadd.xlane.f32.xlu2 %v4339_v27  ;;  %v3442_v15 = vld [vmem:[#allocation6 + $0xb4] sm:$0xf0] }
 0x5c2   :  { %v1269_v18 = vpop.xlane.xlu1 %1268 }
 0x5c3   :  { %v1282_v19 = vmul.f32 %v1269_v18, %v4016_v33  ;;  %v3170_v18 = vor.u32 %v3439_v5, %v3167_v7  ;;  %v3101_v5 = vld [vmem:[#allocation6 + $0x20] sm:$0xf]  ;;  %v3423_v7 = vld [vmem:[#allocation6 + $0x24] sm:$0xf] }
 0x5c5   :  { %v4346_v20 = vsub.f32 %v4309_v44, %v1282_v19  ;;  %v3174_v19 = vor.u32 %v3442_v15, %v3173_v10  ;;  %1673 = vmatpush.bf16.msra.mxu2 %v3170_v18  ;;  %v3102_v10 = vor.u32 %v3425_v17, %v3101_v5  ;;  %v3103_v15 = vld [vmem:[#allocation6 + $0x30] sm:$0xf0]  ;;  %v3109_v18 = vld [vmem:[#allocation6 + $0x28] sm:$0xf] }
 0x5c7   :  { %v1298_v45 = vmul.f32 %v4346_v20, %v4346_v20  ;;  %1702 = vmatpush.bf16.msrb.mxu1 %v3174_v19  ;;  %v3426_v19 = vld [vmem:[#allocation6 + $0x34] sm:$0xf0] }
 0x5c9   :  { %1308 = vadd.xlane.f32.xlu0 %v1298_v45  ;;  %v3440_v45 = vld [vmem:[#allocation6 + $0xac] sm:$0xf] }
 0x5ca   :  { %v1271_v22 = vpop.xlane.xlu2 %1270 }
 0x5cb   :  { %v1283_v39 = vmul.f32 %v1271_v22, %v4016_v33  ;;  %v3175_v22 = vld [vmem:[#allocation6 + $0xb8] sm:$0xf0] }
 0x5cd   :  { %v4352_v53 = vsub.f32 %v4313_v8, %v1283_v39  ;;  %v3178_v39 = vor.u32 %v3440_v45, %v3175_v22  ;;  %v3106_v45 = vor.u32 %v3423_v7, %v3103_v15  ;;  %v3110_v22 = vor.u32 %v3426_v19, %v3109_v18  ;;  %v4387_v15 = vld [vmem:[%s4806_s12] ss:$0 sm:$0xff] }
 0x5cf   :  { %v1299_v21 = vmul.f32 %v4352_v53, %v4352_v53  ;;  %1731 = vmatpush.bf16.msrb.mxu0 %v3178_v39  ;;  %v3424_v39 = vld [vmem:[#allocation6 + $0x2c] sm:$0xf] }
 0x5d1   :  { %1310 = vadd.xlane.f32.xlu1 %v1299_v21  ;;  %v3149_v21 = vld [vmem:[#allocation6 + $0x80] sm:$0xf] }
 0x5d2   :  { %v1273_v36 = vpop.xlane.xlu0 %1272 }
 0x5d3   :  { %v1284_v23 = vmul.f32 %v1273_v36, %v4016_v33  ;;  %v3437_v36 = vld [vmem:[#allocation6 + $0x8c] sm:$0xf0] }
 0x5d5   :  { %v4358_v25 = vsub.f32 %v4317_v56, %v1284_v23  ;;  %v3435_v23 = vld [vmem:[#allocation6 + $0x84] sm:$0xf] }
 0x5d7   :  { %v1300_v26 = vmul.f32 %v4358_v25, %v4358_v25 }
 0x5d9   :  { %1312 = vadd.xlane.f32.xlu2 %v1300_v26  ;;  %v3150_v26 = vor.u32 %v3437_v36, %v3149_v21  ;;  %v3111_v21 = vld [vmem:[#allocation6 + $0x38] sm:$0xf0] }
 0x5da   :  { %v1275_v28 = vpop.xlane.xlu1 %1274 }
 0x5db   :  { %v1285_v29 = vmul.f32 %v1275_v28, %v4016_v33  ;;  %v3151_v28 = vld [vmem:[#allocation6 + $0x90] sm:$0xf0]  ;;  %1645 = vmatpush.bf16.msra.mxu3 %v3150_v26 }
 0x5dd   :  { %v4364_v32 = vsub.f32 %v4321_v2, %v1285_v29  ;;  %v3157_v29 = vld [vmem:[#allocation6 + $0x88] sm:$0xf] }
 0x5df   :  { %v1301_v34 = vmul.f32 %v4364_v32, %v4364_v32  ;;  %1646 = vmatpush.bf16.msra.mxu3 %v3134_v48  ;;  %v3095_v48 = vld [vmem:[#allocation6 + $0x18] sm:$0xf0] }
 0x5e0   :  { %v3098_v38 = vor.u32 %v3420_v58, %v3095_v48 }
 0x5e1   :  { %1314 = vadd.xlane.f32.xlu0 %v1301_v34  ;;  %v3438_v34 = vld [vmem:[#allocation6 + $0x94] sm:$0xf0] }
 0x5e2   :  { %v1277_v35 = vpop.xlane.xlu1 %1276 }
 0x5e3   :  { %v1286_v40 = vmul.f32 %v1277_v35, %v4016_v33  ;;  %v3154_v35 = vor.u32 %v3435_v23, %v3151_v28  ;;  %1647 = vmatpush.bf16.msra.mxu3 %v3118_v0  ;;  %v3114_v23 = vor.u32 %v3424_v39, %v3111_v21  ;;  %v3085_v28 = vld [vmem:[#allocation6] sm:$0xf] }
 0x5e5   :  { %v4370_v41 = vsub.f32 %v4325_v3, %v1286_v40  ;;  %v3158_v40 = vor.u32 %v3438_v34, %v3157_v29  ;;  %1674 = vmatpush.bf16.msra.mxu2 %v3154_v35  ;;  %v3421_v29 = vld [vmem:[#allocation6 + $0xc] sm:$0xf0]  ;;  %v3419_v34 = vld [vmem:[#allocation6 + $0x4] sm:$0xf] }
 0x5e6   :  { %v3086_v35 = vor.u32 %v3421_v29, %v3085_v28 }
 0x5e7   :  { %v1302_v42 = vmul.f32 %v4370_v41, %v4370_v41  ;;  %1703 = vmatpush.bf16.msrb.mxu1 %v3158_v40  ;;  %1648 = vmatpush.bf16.msra.mxu3 %v3102_v10  ;;  %v3087_v40 = vld [vmem:[#allocation6 + $0x10] sm:$0xf0] }
 0x5e8   :  { %v3090_v46 = vor.u32 %v3419_v34, %v3087_v40 }
 0x5e9   :  { %1316 = vadd.xlane.f32.xlu1 %v1302_v42  ;;  %v3436_v42 = vld [vmem:[#allocation6 + $0x8c] sm:$0xf]  ;;  %1675 = vmatpush.bf16.msra.mxu2 %v3138_v54 }
 0x5ea   :  { %v3162_v47 = vor.u32 %v3436_v42, %v3159_v43  ;;  %v3093_v42 = vld [vmem:[#allocation6 + $0x8] sm:$0xf]  ;;  %v3422_v43 = vld [vmem:[#allocation6 + $0x14] sm:$0xf0] }
 0x5eb   :  { %1704 = vmatpush.bf16.msrb.mxu1 %v3142_v50  ;;  %v3094_v49 = vor.u32 %v3422_v43, %v3093_v42  ;;  %1649 = vmatpush.bf16.msra.mxu3 %v3086_v35 }
 0x5ec   :  { %1732 = vmatpush.bf16.msrb.mxu0 %v3162_v47 }
 0x5ed   :  { %1676 = vmatpush.bf16.msra.mxu2 %v3122_v4 }
 0x5ef   :  { %1705 = vmatpush.bf16.msrb.mxu1 %v3126_v12 }
 0x5f0   :  { %1733 = vmatpush.bf16.msrb.mxu0 %v3146_v61 }
 0x5f1   :  { %1677 = vmatpush.bf16.msra.mxu2 %v3106_v45 }
 0x5f3   :  { %1706 = vmatpush.bf16.msrb.mxu1 %v3110_v22 }
 0x5f4   :  { %1734 = vmatpush.bf16.msrb.mxu0 %v3130_v6 }
 0x5f5   :  { %1678 = vmatpush.bf16.msra.mxu2 %v3090_v46 }
 0x5f7   :  { %1707 = vmatpush.bf16.msrb.mxu1 %v3094_v49 }
 0x5f8   :  { %1735 = vmatpush.bf16.msrb.mxu0 %v3114_v23 }
 0x5fc   :  { %1736 = vmatpush.bf16.msrb.mxu0 %v3098_v38 }
 0x626   :  { %v1305_v36 = vpop.xlane.xlu2 %1304 }
 0x627   :  { %v1320_v26 = vmul.f32 %v1305_v36, %v4016_v33 }
 0x629   :  { %v1328_v47 = vadd.f32 1e-05, %v1320_v26 }
 0x62b   :  { %3579 = vrsqrt.f32 %v1328_v47  ;;  %vm1342_vm13 = vweird.f32 %v1328_v47 }
 0x62e   :  { %v1307_v52 = vpop.xlane.xlu0 %1306  ;;  %v1279_v55 = vpop.xlane.xlu2 %1278 }
 0x62f   :  { %v1321_v54 = vmul.f32 %v1307_v52, %v4016_v33  ;;  %v1287_v50 = vmul.f32 %v1279_v55, %v4016_v33 }
 0x631   :  { %v3580_v57 = vpop.eup %3579  ;;  %v1329_v59 = vadd.f32 1e-05, %v1321_v54  ;;  %v4378_v61 = vsub.f32 %v4339_v27, %v1287_v50 }
 0x632   :  { %v1337_v63 = vmul.f32 %v3580_v57, %v1328_v47  ;;  %vm1343_vm1 = vweird.f32 %v3580_v57 }
 0x633   :  { %3581 = vrsqrt.f32 %v1329_v59  ;;  %v1303_v37 = vmul.f32 %v4378_v61, %v4378_v61  ;;  %vm1344_vm14 = vmor %vm1342_vm13, %vm1343_vm1  ;;  %vm1352_vm0 = vweird.f32 %v1329_v59 }
 0x634   :  { %v1338_v14 = vmul.f32 %v3580_v57, %v1337_v63 }
 0x635   :  { %1318 = vadd.xlane.f32.xlu2 %v1303_v37 }
 0x636   :  { %v1339_v0 = vmul.f32 0.5, %v1338_v14 }
 0x638   :  { %v1340_v1 = vsub.f32 1.5, %v1339_v0 }
 0x639   :  { %v3582_v30 = vpop.eup %3581 }
 0x63a   :  { %v1341_v62 = vmul.f32 %v3580_v57, %v1340_v1  ;;  %v1347_v4 = vmul.f32 %v3582_v30, %v1329_v59  ;;  %vm1353_vm15 = vweird.f32 %v3582_v30 }
 0x63b   :  { %vm1354_vm2 = vmor %vm1352_vm0, %vm1353_vm15 }
 0x63c   :  { %v1348_v12 = vmul.f32 %v3582_v30, %v1347_v4  ;;  %v1309_v9 = vpop.xlane.xlu0 %1308  ;;  %v1345_v6 = vsel %vm1344_vm14, %v3580_v57, %v1341_v62 }
 0x63d   :  { %v1322_v16 = vmul.f32 %v1309_v9, %v4016_v33  ;;  %v1416_v10 = vmul.f32 %v1345_v6, %v4330_v11  ;;  %v4395_v11 = vld [vmem:[%s4807_s13] ss:$0 sm:$0xff] }
 0x63e   :  { %v1349_v5 = vmul.f32 0.5, %v1348_v12 }
 0x63f   :  { %v1330_v17 = vadd.f32 1e-05, %v1322_v16  ;;  %v1427_v21 = vmul.f32 %v4387_v15, %v1416_v10 }
 0x640   :  { %v1350_v7 = vsub.f32 1.5, %v1349_v5 }
 0x641   :  { %3583 = vrsqrt.f32 %v1330_v17  ;;  %v1438_v29 = vadd.f32 %v4395_v11, %v1427_v21  ;;  %vm1362_vm4 = vweird.f32 %v1330_v17 }
 0x642   :  { %v1351_v18 = vmul.f32 %v3582_v30, %v1350_v7 }
 0x644   :  { %v1355_v19 = vsel %vm1354_vm2, %v3582_v30, %v1351_v18  ;;  %v1311_v45 = vpop.xlane.xlu1 %1310 }
 0x645   :  { %v1417_v22 = vmul.f32 %v1355_v19, %v4336_v24  ;;  %v1323_v39 = vmul.f32 %v1311_v45, %v4016_v33 }
 0x647   :  { %v3584_v36 = vpop.eup %3583  ;;  %v1331_v23 = vadd.f32 1e-05, %v1323_v39  ;;  %v1428_v26 = vmul.f32 %v4387_v15, %v1417_v22 }
 0x648   :  { %v1357_v28 = vmul.f32 %v3584_v36, %v1330_v17  ;;  %vm1363_vm3 = vweird.f32 %v3584_v36 }
 0x649   :  { %3585 = vrsqrt.f32 %v1331_v23  ;;  %v1439_v34 = vadd.f32 %v4395_v11, %v1428_v26  ;;  %vm1364_vm5 = vmor %vm1362_vm4, %vm1363_vm3  ;;  %vm1372_vm7 = vweird.f32 %v1331_v23 }
 0x64a   :  { %v1358_v24 = vmul.f32 %v3584_v36, %v1357_v28 }
 0x64b   :  { %v1446_v35 = vpack.c.bf16 %v1439_v34, %v1438_v29 }
 0x64c   :  { %v1359_v40 = vmul.f32 0.5, %v1358_v24  ;;  %v1313_v42 = vpop.xlane.xlu2 %1312 }
 0x64d   :  { %v1324_v43 = vmul.f32 %v1313_v42, %v4016_v33  ;;  %1650 = vmatmul.bf16.vlgmr.msra.gmra.mxu3 %v1446_v35  ;;  %1679 = vmatmul.bf16.vlgmr.msra.gmra.mxu2 %v1446_v35 }
 0x64e   :  { %v1360_v47 = vsub.f32 1.5, %v1359_v40  ;;  %1708 = vmatmul.bf16.vlgmr.msrb.gmra.mxu1 %v1446_v35  ;;  %1737 = vmatmul.bf16.vlgmr.msrb.gmra.mxu0 %v1446_v35 }
 0x64f   :  { %v3586_v46 = vpop.eup %3585  ;;  %v1332_v49 = vadd.f32 1e-05, %v1324_v43 }
 0x650   :  { %v1361_v58 = vmul.f32 %v3584_v36, %v1360_v47  ;;  %v1367_v48 = vmul.f32 %v3586_v46, %v1331_v23  ;;  %vm1373_vm6 = vweird.f32 %v3586_v46 }
 0x651   :  { %3587 = vrsqrt.f32 %v1332_v49  ;;  %vm1374_vm8 = vmor %vm1372_vm7, %vm1373_vm6  ;;  %vm1382_vm10 = vweird.f32 %v1332_v49 }
 0x652   :  { %v1368_v38 = vmul.f32 %v3586_v46, %v1367_v48  ;;  %v1365_v52 = vsel %vm1364_vm5, %v3584_v36, %v1361_v58  ;;  %v3474_v58 = vld [vmem:[#allocation8 + $0xb8] sm:$0xff]  ;;  %vm2813_vm5 = vcmask 1041408  }
 0x653   :  { %v1418_v63 = vmul.f32 %v1365_v52, %v4346_v20  ;;  %v3482_v48 = vld [vmem:[#allocation8 + $0xf8] sm:$0xff]  ;;  %2376 = vmatpush.bf16.msra.mxu1 %v3474_v58  ;;  %v3473_v52 = vld [vmem:[#allocation8 + $0xb0] sm:$0xff] }
 0x654   :  { %v1369_v55 = vmul.f32 0.5, %v1368_v38  ;;  %v1315_v54 = vpop.xlane.xlu0 %1314  ;;  %2405 = vmatpush.bf16.msra.mxu0 %v3482_v48 }
 0x655   :  { %v1325_v50 = vmul.f32 %v1315_v54, %v4016_v33  ;;  %v1429_v4 = vmul.f32 %v4387_v15, %v1418_v63 }
 0x656   :  { %v1370_v57 = vsub.f32 1.5, %v1369_v55  ;;  %v3481_v55 = vld [vmem:[#allocation8 + $0xf0] sm:$0xff] }
 0x657   :  { %v3588_v59 = vpop.eup %3587  ;;  %v1333_v37 = vadd.f32 1e-05, %v1325_v50  ;;  %v1440_v5 = vadd.f32 %v4395_v11, %v1429_v4  ;;  %2377 = vmatpush.bf16.msra.mxu1 %v3473_v52  ;;  %v3458_v50 = vld [vmem:[#allocation8 + $0x38] sm:$0xff] }
 0x658   :  { %v1371_v14 = vmul.f32 %v3586_v46, %v1370_v57  ;;  %v1377_v0 = vmul.f32 %v3588_v59, %v1332_v49  ;;  %vm1383_vm9 = vweird.f32 %v3588_v59  ;;  %2406 = vmatpush.bf16.msra.mxu0 %v3481_v55  ;;  %v3466_v57 = vld [vmem:[#allocation8 + $0x78] sm:$0xff]  ;;  %2318 = vmatpush.bf16.msrb.mxu3 %v3458_v50  ;;  %v3451_v50 = vld [vmem:[#allocation8] sm:$0xff] }
 0x659   :  { %3589 = vrsqrt.f32 %v1333_v37  ;;  %vm1384_vm11 = vmor %vm1382_vm10, %vm1383_vm9  ;;  %vm1392_vm1 = vweird.f32 %v1333_v37  ;;  %2347 = vmatpush.bf16.msrb.mxu2 %v3466_v57  ;;  %v3459_v57 = vld [vmem:[#allocation8 + $0x40] sm:$0xff] }
 0x65a   :  { %v1375_v1 = vsel %vm1374_vm8, %v3586_v46, %v1371_v14  ;;  %v1378_v30 = vmul.f32 %v3588_v59, %v1377_v0  ;;  %v3480_v14 = vld [vmem:[#allocation8 + $0xe8] sm:$0xff] }
 0x65b   :  { %v1419_v62 = vmul.f32 %v1375_v1, %v4352_v53  ;;  %v3457_v1 = vld [vmem:[#allocation8 + $0x30] sm:$0xff] }
 0x65c   :  { %v1379_v12 = vmul.f32 0.5, %v1378_v30  ;;  %2407 = vmatpush.bf16.msra.mxu0 %v3480_v14  ;;  %v3465_v30 = vld [vmem:[#allocation8 + $0x70] sm:$0xff]  ;;  %2319 = vmatpush.bf16.msrb.mxu3 %v3457_v1 }
 0x65d   :  { %v1430_v9 = vmul.f32 %v4387_v15, %v1419_v62  ;;  %2348 = vmatpush.bf16.msrb.mxu2 %v3465_v30 }
 0x65e   :  { %v1380_v16 = vsub.f32 1.5, %v1379_v12  ;;  %v3471_v12 = vld [vmem:[#allocation8 + $0xa0] sm:$0xff] }
 0x65f   :  { %v3590_v6 = vpop.eup %3589  ;;  %v1441_v20 = vadd.f32 %v4395_v11, %v1430_v9  ;;  %v3479_v9 = vld [vmem:[#allocation8 + $0xe0] sm:$0xff] }
 0x660   :  { %v1381_v17 = vmul.f32 %v3588_v59, %v1380_v16  ;;  %v1387_v7 = vmul.f32 %v3590_v6, %v1333_v37  ;;  %vm1393_vm12 = vweird.f32 %v3590_v6  ;;  %v3472_v37 = vld [vmem:[#allocation8 + $0xa8] sm:$0xff]  ;;  %2408 = vmatpush.bf16.msra.mxu0 %v3479_v9 }
 0x661   :  { %v1447_v10 = vpack.c.bf16 %v1441_v20, %v1440_v5  ;;  %vm1394_vm13 = vmor %vm1392_vm1, %vm1393_vm12  ;;  %2378 = vmatpush.bf16.msra.mxu1 %v3472_v37  ;;  %v3456_v5 = vld [vmem:[#allocation8 + $0x28] sm:$0xff] }
 0x662   :  { %v1388_v18 = vmul.f32 %v3590_v6, %v1387_v7  ;;  %v1385_v53 = vsel %vm1384_vm11, %v3588_v59, %v1381_v17  ;;  %v3464_v20 = vld [vmem:[#allocation8 + $0x68] sm:$0xff]  ;;  %2320 = vmatpush.bf16.msrb.mxu3 %v3456_v5  ;;  %v3470_v7 = vld [vmem:[#allocation8 + $0x98] sm:$0xff] }
 0x663   :  { %1655 = vmatmul.bf16.gmra.mxu3 %v1447_v10  ;;  %1684 = vmatmul.bf16.gmra.mxu2 %v1447_v10  ;;  %v1420_v22 = vmul.f32 %v1385_v53, %v4358_v25  ;;  %v1317_v25 = vpop.xlane.xlu1 %1316 }
 0x664   :  { %v1389_v19 = vmul.f32 0.5, %v1388_v18  ;;  %1713 = vmatmul.bf16.gmra.mxu1 %v1447_v10  ;;  %1742 = vmatmul.bf16.gmra.mxu0 %v1447_v10  ;;  %v1326_v24 = vmul.f32 %v1317_v25, %v4016_v33  ;;  %v3478_v10 = vld [vmem:[#allocation8 + $0xd8] sm:$0xff]  ;;  %v3461_v25 = vld [vmem:[#allocation8 + $0x50] sm:$0xff] }
 0x665   :  { %v1431_v23 = vmul.f32 %v4387_v15, %v1420_v22  ;;  %2379 = vmatpush.bf16.msra.mxu1 %v3471_v12  ;;  %2349 = vmatpush.bf16.msrb.mxu2 %v3464_v20 }
 0x666   :  { %v1390_v45 = vsub.f32 1.5, %v1389_v19  ;;  %v1334_v35 = vadd.f32 1e-05, %v1326_v24  ;;  %2409 = vmatpush.bf16.msra.mxu0 %v3478_v10 }
 0x667   :  { %v1442_v28 = vadd.f32 %v4395_v11, %v1431_v23 }
 0x668   :  { %v1391_v39 = vmul.f32 %v3590_v6, %v1390_v45  ;;  %3591 = vrsqrt.f32 %v1334_v35  ;;  %vm1402_vm15 = vweird.f32 %v1334_v35  ;;  %v3455_v45 = vld [vmem:[#allocation8 + $0x20] sm:$0xff] }
 0x669   :  { %2380 = vmatpush.bf16.msra.mxu1 %v3470_v7  ;;  %2321 = vmatpush.bf16.msrb.mxu3 %v3455_v45 }
 0x66a   :  { %v1395_v21 = vsel %vm1394_vm13, %v3590_v6, %v1391_v39  ;;  %v3469_v39 = vld [vmem:[#allocation8 + $0x90] sm:$0xff] }
 0x66b   :  { %v1421_v36 = vmul.f32 %v1395_v21, %v4364_v32  ;;  %v3477_v21 = vld [vmem:[#allocation8 + $0xd0] sm:$0xff] }
 0x66c   :  { %2410 = vmatpush.bf16.msra.mxu0 %v3477_v21 }
 0x66d   :  { %v1432_v26 = vmul.f32 %v4387_v15, %v1421_v36  ;;  %2381 = vmatpush.bf16.msra.mxu1 %v3469_v39 }
 0x66e   :  { %v3592_v40 = vpop.eup %3591 }
 0x66f   :  { %v1443_v29 = vadd.f32 %v4395_v11, %v1432_v26  ;;  %v1397_v32 = vmul.f32 %v3592_v40, %v1334_v35  ;;  %vm1403_vm14 = vweird.f32 %v3592_v40  ;;  %v3454_v26 = vld [vmem:[#allocation8 + $0x18] sm:$0xff]  ;;  %v3467_v35 = vld [vmem:[#allocation8 + $0x80] sm:$0xff] }
 0x670   :  { %vm1404_vm0 = vmor %vm1402_vm15, %vm1403_vm14  ;;  %2322 = vmatpush.bf16.msrb.mxu3 %v3454_v26 }
 0x671   :  { %v1448_v34 = vpack.c.bf16 %v1443_v29, %v1442_v28  ;;  %v1398_v42 = vmul.f32 %v3592_v40, %v1397_v32  ;;  %v3468_v29 = vld [vmem:[#allocation8 + $0x88] sm:$0xff] }
 0x672   :  { %2382 = vmatpush.bf16.msra.mxu1 %v3468_v29 }
 0x673   :  { %1660 = vmatmul.bf16.gmra.mxu3 %v1448_v34  ;;  %1689 = vmatmul.bf16.gmra.mxu2 %v1448_v34  ;;  %v1399_v49 = vmul.f32 0.5, %v1398_v42 }
 0x674   :  { %1718 = vmatmul.bf16.gmra.mxu1 %v1448_v34  ;;  %1747 = vmatmul.bf16.gmra.mxu0 %v1448_v34  ;;  %v3476_v34 = vld [vmem:[#allocation8 + $0xc8] sm:$0xff] }
 0x675   :  { %v1400_v38 = vsub.f32 1.5, %v1399_v49  ;;  %2411 = vmatpush.bf16.msra.mxu0 %v3476_v34 }
 0x676   :  { %2383 = vmatpush.bf16.msra.mxu1 %v3467_v35 }
 0x677   :  { %v1401_v59 = vmul.f32 %v3592_v40, %v1400_v38 }
 0x679   :  { %v1405_v62 = vsel %vm1404_vm0, %v3592_v40, %v1401_v59  ;;  %v3475_v40 = vld [vmem:[#allocation8 + $0xc0] sm:$0xff] }
 0x67a   :  { %v1422_v6 = vmul.f32 %v1405_v62, %v4370_v41  ;;  %v3463_v41 = vld [vmem:[#allocation8 + $0x60] sm:$0xff]  ;;  %2412 = vmatpush.bf16.msra.mxu0 %v3475_v40 }
 0x67b   :  { %2350 = vmatpush.bf16.msrb.mxu2 %v3463_v41 }
 0x67c   :  { %v1433_v19 = vmul.f32 %v4387_v15, %v1422_v6 }
 0x67e   :  { %v1444_v36 = vadd.f32 %v4395_v11, %v1433_v19 }
 0x6a8   :  { %v1319_v43 = vpop.xlane.xlu2 %1318 }
 0x6a9   :  { %v1327_v47 = vmul.f32 %v1319_v43, %v4016_v33  ;;  %v3452_v43 = vld [vmem:[#allocation8 + $0x8] sm:$0xff] }
 0x6ab   :  { %v1335_v46 = vadd.f32 1e-05, %v1327_v47  ;;  %v3460_v47 = vld [vmem:[#allocation8 + $0x48] sm:$0xff] }
 0x6ad   :  { %3593 = vrsqrt.f32 %v1335_v46  ;;  %vm1412_vm3 = vweird.f32 %v1335_v46 }
 0x6b3   :  { %v3594_v54 = vpop.eup %3593 }
 0x6b4   :  { %v1407_v63 = vmul.f32 %v3594_v54, %v1335_v46  ;;  %vm1413_vm2 = vweird.f32 %v3594_v54 }
 0x6b5   :  { %vm1414_vm4 = vmor %vm1412_vm3, %vm1413_vm2 }
 0x6b6   :  { %v1408_v0 = vmul.f32 %v3594_v54, %v1407_v63 }
 0x6b8   :  { %v1409_v4 = vmul.f32 0.5, %v1408_v0 }
 0x6ba   :  { %v1410_v16 = vsub.f32 1.5, %v1409_v4 }
 0x6bc   :  { %v1411_v17 = vmul.f32 %v3594_v54, %v1410_v16 }
 0x6be   :  { %v1415_v18 = vsel %vm1414_vm4, %v3594_v54, %v1411_v17 }
 0x6bf   :  { %v1423_v53 = vmul.f32 %v1415_v18, %v4378_v61  ;;  %v3462_v61 = vld [vmem:[#allocation8 + $0x58] sm:$0xff] }
 0x6c0   :  { %2351 = vmatpush.bf16.msrb.mxu2 %v3462_v61 }
 0x6c1   :  { %v1434_v22 = vmul.f32 %v4387_v15, %v1423_v53  ;;  %v3453_v15 = vld [vmem:[#allocation8 + $0x10] sm:$0xff] }
 0x6c2   :  { %2323 = vmatpush.bf16.msrb.mxu3 %v3453_v15 }
 0x6c3   :  { %v1445_v23 = vadd.f32 %v4395_v11, %v1434_v22 }
 0x6c4   :  { %2352 = vmatpush.bf16.msrb.mxu2 %v3461_v25 }
 0x6c5   :  { %v1449_v28 = vpack.c.bf16 %v1445_v23, %v1444_v36 }
 0x6c6   :  { %2324 = vmatpush.bf16.msrb.mxu3 %v3452_v43 }
 0x6c7   :  { %1665 = vmatmul.bf16.gmra.mxu3 %v1449_v28  ;;  %1694 = vmatmul.bf16.gmra.mxu2 %v1449_v28 }
 0x6c8   :  { %1723 = vmatmul.bf16.gmra.mxu1 %v1449_v28  ;;  %1752 = vmatmul.bf16.gmra.mxu0 %v1449_v28 }
 0x6c9   :  { %2353 = vmatpush.bf16.msrb.mxu2 %v3460_v47 }
 0x6ca   :  { %2325 = vmatpush.bf16.msrb.mxu3 %v3451_v50 }
 0x6cb   :  { %v4422_v11 = vpop.f32.mrf.mxu1  ;;  %v4424_v24 = vpop.f32.mrf.mxu0 }
 0x6cc   :  { %v1760_v32 = vmul.f32 %v4422_v11, %v4422_v11  ;;  %v1761_v42 = vmul.f32 %v4424_v24, %v4424_v24 }
 0x6cd   :  { %2354 = vmatpush.bf16.msrb.mxu2 %v3459_v57 }
 0x6ce   :  { %v1792_v46 = vmul.f32 %v1760_v32, %v4422_v11  ;;  %v1793_v49 = vmul.f32 %v1761_v42, %v4424_v24 }
 0x6d0   :  { %v1824_v58 = vmul.f32 0.044715, %v1792_v46  ;;  %v1825_v48 = vmul.f32 0.044715, %v1793_v49  ;;  %v4432_v38 = vpop.f32.mrf.mxu3  ;;  %v4434_v52 = vpop.f32.mrf.mxu2 }
 0x6d1   :  { %v1758_v55 = vmul.f32 %v4432_v38, %v4432_v38  ;;  %v1759_v54 = vmul.f32 %v4434_v52, %v4434_v52 }
 0x6d2   :  { %v1856_v59 = vadd.f32 %v1824_v58, %v4422_v11  ;;  %v1857_v63 = vadd.f32 %v1825_v48, %v4424_v24 }
 0x6d3   :  { %v1790_v37 = vmul.f32 %v1758_v55, %v4432_v38  ;;  %v1791_v14 = vmul.f32 %v1759_v54, %v4434_v52  ;;  %v4444_v0 = vpop.f32.mrf.mxu1  ;;  %v4446_v1 = vpop.f32.mrf.mxu0 }
 0x6d4   :  { %v1888_v30 = vmul.f32 0.7978846, %v1856_v59  ;;  %v1889_v62 = vmul.f32 0.7978846, %v1857_v63  ;;  %v1764_v4 = vmul.f32 %v4444_v0, %v4444_v0  ;;  %v1765_v12 = vmul.f32 %v4446_v1, %v4446_v1 }
 0x6d5   :  { %v1822_v9 = vmul.f32 0.044715, %v1790_v37  ;;  %v1823_v16 = vmul.f32 0.044715, %v1791_v14 }
 0x6d6   :  { %3595 = vtanh.f32 %v1888_v30  ;;  %v1796_v6 = vmul.f32 %v1764_v4, %v4444_v0  ;;  %v1797_v5 = vmul.f32 %v1765_v12, %v4446_v1 }
 0x6d7   :  { %3597 = vtanh.f32 %v1889_v62  ;;  %v1854_v20 = vadd.f32 %v1822_v9, %v4432_v38  ;;  %v1855_v17 = vadd.f32 %v1823_v16, %v4434_v52 }
 0x6d8   :  { %v1828_v7 = vmul.f32 0.044715, %v1796_v6  ;;  %v1829_v10 = vmul.f32 0.044715, %v1797_v5  ;;  %v4456_v18 = vpop.f32.mrf.mxu3  ;;  %v4458_v53 = vpop.f32.mrf.mxu2 }
 0x6d9   :  { %v1886_v19 = vmul.f32 0.7978846, %v1854_v20  ;;  %v1887_v45 = vmul.f32 0.7978846, %v1855_v17  ;;  %v1762_v41 = vmul.f32 %v4456_v18, %v4456_v18  ;;  %v1763_v22 = vmul.f32 %v4458_v53, %v4458_v53 }
 0x6da   :  { %v1860_v39 = vadd.f32 %v1828_v7, %v4444_v0  ;;  %v1861_v21 = vadd.f32 %v1829_v10, %v4446_v1 }
 0x6db   :  { %3599 = vtanh.f32 %v1886_v19  ;;  %v1794_v36 = vmul.f32 %v1762_v41, %v4456_v18  ;;  %v1795_v23 = vmul.f32 %v1763_v22, %v4458_v53 }
 0x6dc   :  { %v3596_v26 = vpop.eup %3595  ;;  %3601 = vtanh.f32 %v1887_v45  ;;  %v1892_v61 = vmul.f32 0.7978846, %v1860_v39  ;;  %v1893_v28 = vmul.f32 0.7978846, %v1861_v21 }
 0x6dd   :  { %v3598_v29 = vpop.eup %3597  ;;  %v1826_v34 = vmul.f32 0.044715, %v1794_v36  ;;  %v1827_v15 = vmul.f32 0.044715, %v1795_v23  ;;  %v1952_v25 = vadd.f32 1.0, %v3596_v26 }
 0x6de   :  { %3603 = vtanh.f32 %v1892_v61  ;;  %v1953_v35 = vadd.f32 1.0, %v3598_v29 }
 0x6df   :  { %3605 = vtanh.f32 %v1893_v28  ;;  %v1858_v40 = vadd.f32 %v1826_v34, %v4456_v18  ;;  %v1859_v32 = vadd.f32 %v1827_v15, %v4458_v53  ;;  %v1984_v48 = vmul.f32 0.5, %v1952_v25 }
 0x6e0   :  { %v1985_v57 = vmul.f32 0.5, %v1953_v35 }
 0x6e1   :  { %v3600_v42 = vpop.eup %3599  ;;  %v1890_v43 = vmul.f32 0.7978846, %v1858_v40  ;;  %v1891_v47 = vmul.f32 0.7978846, %v1859_v32  ;;  %v4470_v46 = vpop.f32.mrf.mxu1  ;;  %v2016_v9 = vmul.f32 %v1984_v48, %v4422_v11 }
 0x6e2   :  { %v4472_v49 = vpop.f32.mrf.mxu0  ;;  %v3602_v58 = vpop.eup %3601  ;;  %v1950_v55 = vadd.f32 1.0, %v3600_v42  ;;  %v1768_v54 = vmul.f32 %v4470_v46, %v4470_v46  ;;  %v2017_v7 = vmul.f32 %v1985_v57, %v4424_v24 }
 0x6e3   :  { %v1769_v50 = vmul.f32 %v4472_v49, %v4472_v49  ;;  %v1951_v59 = vadd.f32 1.0, %v3602_v58  ;;  %3607 = vtanh.f32 %v1890_v43 }
 0x6e4   :  { %v3604_v63 = vpop.eup %3603  ;;  %v1982_v37 = vmul.f32 0.5, %v1950_v55  ;;  %3609 = vtanh.f32 %v1891_v47  ;;  %v1800_v14 = vmul.f32 %v1768_v54, %v4470_v46 }
 0x6e5   :  { %v1801_v30 = vmul.f32 %v1769_v50, %v4472_v49  ;;  %v3606_v62 = vpop.eup %3605  ;;  %v1983_v4 = vmul.f32 0.5, %v1951_v59  ;;  %v1956_v12 = vadd.f32 1.0, %v3604_v63 }
 0x6e6   :  { %v1957_v16 = vadd.f32 1.0, %v3606_v62  ;;  %v1832_v6 = vmul.f32 0.044715, %v1800_v14  ;;  %v4481_v20 = vpop.f32.mrf.mxu3  ;;  %v4483_v17 = vpop.f32.mrf.mxu2  ;;  %v2014_v41 = vmul.f32 %v1982_v37, %v4432_v38 }
 0x6e7   :  { %v1833_v5 = vmul.f32 0.044715, %v1801_v30  ;;  %v1988_v10 = vmul.f32 0.5, %v1956_v12  ;;  %v1766_v19 = vmul.f32 %v4481_v20, %v4481_v20  ;;  %v1767_v45 = vmul.f32 %v4483_v17, %v4483_v17 }
 0x6e8   :  { %v1989_v22 = vmul.f32 0.5, %v1957_v16  ;;  %v1864_v11 = vadd.f32 %v1832_v6, %v4470_v46  ;;  %v2015_v36 = vmul.f32 %v1983_v4, %v4434_v52 }
 0x6e9   :  { %v1865_v39 = vadd.f32 %v1833_v5, %v4472_v49  ;;  %v3608_v21 = vpop.eup %3607  ;;  %v2020_v23 = vmul.f32 %v1988_v10, %v4444_v0  ;;  %v1798_v24 = vmul.f32 %v1766_v19, %v4481_v20  ;;  %v1799_v26 = vmul.f32 %v1767_v45, %v4483_v17  ;;  %v4497_v61 = vpop.f32.mrf.mxu1 }
 0x6ea   :  { %v4499_v28 = vpop.f32.mrf.mxu0  ;;  %v3610_v29 = vpop.eup %3609  ;;  %v2021_v38 = vmul.f32 %v1989_v22, %v4446_v1  ;;  %v1954_v34 = vadd.f32 1.0, %v3608_v21  ;;  %v1896_v15 = vmul.f32 0.7978846, %v1864_v11  ;;  %v1772_v0 = vmul.f32 %v4497_v61, %v4497_v61 }
 0x6eb   :  { %v1897_v25 = vmul.f32 0.7978846, %v1865_v39  ;;  %v2048_v35 = vpack.c.bf16 %v2020_v23, %v2016_v9  ;;  %v1955_v40 = vadd.f32 1.0, %v3610_v29  ;;  %v1830_v32 = vmul.f32 0.044715, %v1798_v24 }
 0x6ec   :  { %v1831_v52 = vmul.f32 0.044715, %v1799_v26  ;;  %v1986_v42 = vmul.f32 0.5, %v1954_v34  ;;  %3611 = vtanh.f32 %v1896_v15  ;;  %v1773_v43 = vmul.f32 %v4499_v28, %v4499_v28 }
 0x6ed   :  { %v1987_v47 = vmul.f32 0.5, %v1955_v40  ;;  %3613 = vtanh.f32 %v1897_v25  ;;  %v1862_v58 = vadd.f32 %v1830_v32, %v4481_v20  ;;  %2384 = vmatmul.bf16.vlgmr.msra.gmra.mxu1 %v2048_v35  ;;  %v1804_v55 = vmul.f32 %v1772_v0, %v4497_v61 }
 0x6ee   :  { %v1863_v1 = vadd.f32 %v1831_v52, %v4483_v17  ;;  %v2018_v48 = vmul.f32 %v1986_v42, %v4456_v18  ;;  %v1805_v54 = vmul.f32 %v1773_v43, %v4499_v28  ;;  %v2049_v50 = vpack.c.bf16 %v2021_v38, %v2017_v7  ;;  %v4511_v57 = vpop.f32.mrf.mxu3  ;;  %v4513_v59 = vpop.f32.mrf.mxu2 }
 0x6ef   :  { %v2019_v63 = vmul.f32 %v1987_v47, %v4458_v53  ;;  %v1894_v37 = vmul.f32 0.7978846, %v1862_v58  ;;  %v1770_v30 = vmul.f32 %v4511_v57, %v4511_v57  ;;  %v1836_v62 = vmul.f32 0.044715, %v1804_v55 }
 0x6f0   :  { %v1895_v14 = vmul.f32 0.7978846, %v1863_v1  ;;  %v1837_v4 = vmul.f32 0.044715, %v1805_v54  ;;  %2413 = vmatmul.bf16.vlgmr.msra.gmra.mxu0 %v2049_v50  ;;  %v1771_v18 = vmul.f32 %v4513_v59, %v4513_v59  ;;  %v2046_v12 = vpack.c.bf16 %v2018_v48, %v2014_v41 }
 0x6f1   :  { %3615 = vtanh.f32 %v1894_v37  ;;  %v1802_v9 = vmul.f32 %v1770_v30, %v4511_v57  ;;  %v4521_v16 = vpop.f32.mrf.mxu1  ;;  %v2047_v53 = vpack.c.bf16 %v2019_v63, %v2015_v36  ;;  %v1868_v7 = vadd.f32 %v1836_v62, %v4497_v61 }
 0x6f2   :  { %v4523_v6 = vpop.f32.mrf.mxu0  ;;  %v3612_v5 = vpop.eup %3611  ;;  %v1869_v10 = vadd.f32 %v1837_v4, %v4499_v28  ;;  %v1803_v19 = vmul.f32 %v1771_v18, %v4513_v59  ;;  %2326 = vmatmul.bf16.vlgmr.msrb.gmra.mxu3 %v2046_v12  ;;  %v1776_v41 = vmul.f32 %v4521_v16, %v4521_v16  ;;  %3617 = vtanh.f32 %v1895_v14 }
 0x6f3   :  { %v3614_v45 = vpop.eup %3613  ;;  %v1960_v22 = vadd.f32 1.0, %v3612_v5  ;;  %v1834_v11 = vmul.f32 0.044715, %v1802_v9  ;;  %v1777_v39 = vmul.f32 %v4523_v6, %v4523_v6  ;;  %2355 = vmatmul.bf16.vlgmr.msrb.gmra.mxu2 %v2047_v53  ;;  %v1900_v36 = vmul.f32 0.7978846, %v1868_v7 }
 0x6f4   :  { %v1961_v21 = vadd.f32 1.0, %v3614_v45  ;;  %v1901_v23 = vmul.f32 0.7978846, %v1869_v10  ;;  %v1835_v29 = vmul.f32 0.044715, %v1803_v19  ;;  %v1808_v38 = vmul.f32 %v1776_v41, %v4521_v16 }
 0x6f5   :  { %v1992_v24 = vmul.f32 0.5, %v1960_v22  ;;  %v1866_v26 = vadd.f32 %v1834_v11, %v4511_v57  ;;  %3619 = vtanh.f32 %v1900_v36  ;;  %v1809_v34 = vmul.f32 %v1777_v39, %v4523_v6 }
 0x6f6   :  { %v4535_v15 = vpop.f32.mrf.mxu3  ;;  %v4537_v25 = vpop.f32.mrf.mxu2  ;;  %v1993_v40 = vmul.f32 0.5, %v1961_v21  ;;  %3621 = vtanh.f32 %v1901_v23  ;;  %v1867_v52 = vadd.f32 %v1835_v29, %v4513_v59  ;;  %v1840_v43 = vmul.f32 0.044715, %v1808_v38 }
 0x6f7   :  { %v3616_v35 = vpop.eup %3615  ;;  %v1898_v32 = vmul.f32 0.7978846, %v1866_v26  ;;  %v4541_v42 = vmul.f32 %v1992_v24, %v4470_v46  ;;  %v1841_v47 = vmul.f32 0.044715, %v1809_v34  ;;  %v1774_v1 = vmul.f32 %v4535_v15, %v4535_v15 }
 0x6f8   :  { %v1958_v0 = vadd.f32 1.0, %v3616_v35  ;;  %v1899_v58 = vmul.f32 0.7978846, %v1867_v52  ;;  %v1775_v48 = vmul.f32 %v4537_v25, %v4537_v25  ;;  %v3618_v50 = vpop.eup %3617  ;;  %v1872_v46 = vadd.f32 %v1840_v43, %v4521_v16 }
 0x6f9   :  { %3623 = vtanh.f32 %v1898_v32  ;;  %v4547_v55 = vpop.f32.mrf.mxu1  ;;  %v1873_v37 = vadd.f32 %v1841_v47, %v4523_v6  ;;  %v2025_v30 = vmul.f32 %v1993_v40, %v4472_v49  ;;  %v1806_v62 = vmul.f32 %v1774_v1, %v4535_v15 }
 0x6fa   :  { %v4549_v54 = vpop.f32.mrf.mxu0  ;;  %v1990_v63 = vmul.f32 0.5, %v1958_v0  ;;  %v1780_v14 = vmul.f32 %v4547_v55, %v4547_v55  ;;  %v1807_v4 = vmul.f32 %v1775_v48, %v4537_v25  ;;  %3625 = vtanh.f32 %v1899_v58 }
 0x6fb   :  { %v1781_v18 = vmul.f32 %v4549_v54, %v4549_v54  ;;  %v3620_v12 = vpop.eup %3619  ;;  %v1904_v9 = vmul.f32 0.7978846, %v1872_v46  ;;  %v1905_v53 = vmul.f32 0.7978846, %v1873_v37  ;;  %v1838_v19 = vmul.f32 0.044715, %v1806_v62 }
 0x6fc   :  { %v1812_v5 = vmul.f32 %v1780_v14, %v4547_v55  ;;  %v3622_v7 = vpop.eup %3621  ;;  %v1964_v10 = vadd.f32 1.0, %v3620_v12  ;;  %v1839_v45 = vmul.f32 0.044715, %v1807_v4  ;;  %v2022_v49 = vmul.f32 %v1990_v63, %v4481_v20 }
 0x6fd   :  { %v1813_v22 = vmul.f32 %v1781_v18, %v4549_v54  ;;  %v1965_v11 = vadd.f32 1.0, %v3622_v7  ;;  %3627 = vtanh.f32 %v1904_v9  ;;  %v1870_v23 = vadd.f32 %v1838_v19, %v4535_v15 }
 0x6fe   :  { %v1844_v41 = vmul.f32 0.044715, %v1812_v5  ;;  %v4563_v39 = vpop.f32.mrf.mxu3  ;;  %v1996_v36 = vmul.f32 0.5, %v1964_v10  ;;  %3629 = vtanh.f32 %v1905_v53  ;;  %v1871_v24 = vadd.f32 %v1839_v45, %v4537_v25  ;;  %v4568_v35 = vpop.f32.mrf.mxu2 }
 0x6ff   :  { %v3624_v21 = vpop.eup %3623  ;;  %v1997_v26 = vmul.f32 0.5, %v1965_v11  ;;  %v1845_v34 = vmul.f32 0.044715, %v1813_v22  ;;  %v1902_v40 = vmul.f32 0.7978846, %v1870_v23  ;;  %v1778_v32 = vmul.f32 %v4563_v39, %v4563_v39 }
 0x700   :  { %v1962_v29 = vadd.f32 1.0, %v3624_v21  ;;  %v1876_v38 = vadd.f32 %v1844_v41, %v4547_v55  ;;  %v2028_v20 = vmul.f32 %v1996_v36, %v4497_v61  ;;  %v1959_v52 = vadd.f32 1.0, %v3618_v50  ;;  %v3626_v0 = vpop.eup %3625 }
 0x701   :  { %v2029_v43 = vmul.f32 %v1997_v26, %v4499_v28  ;;  %v1877_v1 = vadd.f32 %v1845_v34, %v4549_v54  ;;  %v1903_v48 = vmul.f32 0.7978846, %v1871_v24  ;;  %v1810_v63 = vmul.f32 %v1778_v32, %v4563_v39 }
 0x702   :  { %v1994_v47 = vmul.f32 0.5, %v1962_v29  ;;  %v1908_v58 = vmul.f32 0.7978846, %v1876_v38  ;;  %v1779_v46 = vmul.f32 %v4568_v35, %v4568_v35  ;;  %v2052_v61 = vpack.c.bf16 %v2028_v20, %v4541_v42 }
 0x703   :  { %v3628_v37 = vpop.eup %3627  ;;  %3631 = vtanh.f32 %v1902_v40  ;;  %v1909_v50 = vmul.f32 0.7978846, %v1877_v1  ;;  %v2053_v62 = vpack.c.bf16 %v2029_v43, %v2025_v30  ;;  %v1842_v28 = vmul.f32 0.044715, %v1810_v63 }
 0x704   :  { %v2026_v14 = vmul.f32 %v1994_v47, %v4511_v57  ;;  %v3630_v4 = vpop.eup %3629  ;;  %3633 = vtanh.f32 %v1908_v58  ;;  %v1811_v18 = vmul.f32 %v1779_v46, %v4568_v35  ;;  %2389 = vmatmul.bf16.gmra.mxu1 %v2052_v61  ;;  %v1963_v9 = vadd.f32 1.0, %v3626_v0 }
 0x705   :  { %3635 = vtanh.f32 %v1909_v50  ;;  %2418 = vmatmul.bf16.gmra.mxu0 %v2053_v62  ;;  %v1874_v53 = vadd.f32 %v1842_v28, %v4563_v39  ;;  %v1991_v5 = vmul.f32 0.5, %v1959_v52  ;;  %v1968_v7 = vadd.f32 1.0, %v3628_v37 }
 0x706   :  { %v2050_v12 = vpack.c.bf16 %v2026_v14, %v2022_v49  ;;  %3637 = vtanh.f32 %v1903_v48  ;;  %v1843_v42 = vmul.f32 0.044715, %v1811_v18  ;;  %v1995_v57 = vmul.f32 0.5, %v1963_v9 }
 0x707   :  { %v1969_v10 = vadd.f32 1.0, %v3630_v4  ;;  %v1906_v30 = vmul.f32 0.7978846, %v1874_v53  ;;  %v2023_v22 = vmul.f32 %v1991_v5, %v4483_v17  ;;  %v2000_v36 = vmul.f32 0.5, %v1968_v7 }
 0x708   :  { %2331 = vmatmul.bf16.gmra.mxu3 %v2050_v12  ;;  %v1875_v19 = vadd.f32 %v1843_v42, %v4568_v35  ;;  %v2027_v11 = vmul.f32 %v1995_v57, %v4513_v59 }
 0x709   :  { %v3632_v45 = vpop.eup %3631  ;;  %3639 = vtanh.f32 %v1906_v30  ;;  %v2001_v29 = vmul.f32 0.5, %v1969_v10  ;;  %v2032_v32 = vmul.f32 %v2000_v36, %v4521_v16 }
 0x70a   :  { %v3634_v41 = vpop.eup %3633  ;;  %v1907_v49 = vmul.f32 0.7978846, %v1875_v19  ;;  %v2051_v24 = vpack.c.bf16 %v2027_v11, %v2023_v22  ;;  %v1966_v34 = vadd.f32 1.0, %v3632_v45 }
 0x70b   :  { %v3636_v21 = vpop.eup %3635  ;;  %v1972_v23 = vadd.f32 1.0, %v3634_v41  ;;  %v2033_v0 = vmul.f32 %v2001_v29, %v4523_v6 }
 0x70c   :  { %v3638_v26 = vpop.eup %3637  ;;  %v1973_v38 = vadd.f32 1.0, %v3636_v21  ;;  %3641 = vtanh.f32 %v1907_v49  ;;  %2360 = vmatmul.bf16.gmra.mxu2 %v2051_v24  ;;  %v1998_v47 = vmul.f32 0.5, %v1966_v34 }
 0x70d   :  { %v2004_v20 = vmul.f32 0.5, %v1972_v23  ;;  %v1967_v17 = vadd.f32 1.0, %v3638_v26 }
 0x70e   :  { %v2005_v40 = vmul.f32 0.5, %v1973_v38  ;;  %v2030_v14 = vmul.f32 %v1998_v47, %v4535_v15 }
 0x70f   :  { %v2036_v59 = vmul.f32 %v2004_v20, %v4547_v55  ;;  %v3640_v52 = vpop.eup %3639  ;;  %v1999_v46 = vmul.f32 0.5, %v1967_v17 }
 0x710   :  { %v2037_v43 = vmul.f32 %v2005_v40, %v4549_v54  ;;  %v1970_v58 = vadd.f32 1.0, %v3640_v52 }
 0x711   :  { %v2056_v1 = vpack.c.bf16 %v2036_v59, %v2032_v32  ;;  %v2031_v55 = vmul.f32 %v1999_v46, %v4537_v25 }
 0x712   :  { %v3642_v48 = vpop.eup %3641  ;;  %v2057_v63 = vpack.c.bf16 %v2037_v43, %v2033_v0  ;;  %v2002_v61 = vmul.f32 0.5, %v1970_v58 }
 0x713   :  { %v1971_v37 = vadd.f32 1.0, %v3642_v48 }
 0x714   :  { %2394 = vmatmul.bf16.gmra.mxu1 %v2056_v1  ;;  %v2034_v16 = vmul.f32 %v2002_v61, %v4563_v39 }
 0x715   :  { %v2003_v50 = vmul.f32 0.5, %v1971_v37  ;;  %2423 = vmatmul.bf16.gmra.mxu0 %v2057_v63 }
 0x716   :  { %v2054_v54 = vpack.c.bf16 %v2034_v16, %v2030_v14 }
 0x717   :  { %v2035_v6 = vmul.f32 %v2003_v50, %v4568_v35 }
 0x718   :  { %2336 = vmatmul.bf16.gmra.mxu3 %v2054_v54 }
 0x719   :  { %v2055_v62 = vpack.c.bf16 %v2035_v6, %v2031_v55 }
 0x71c   :  { %2365 = vmatmul.bf16.gmra.mxu2 %v2055_v62 }
 0x745   :  { %v4593_v4 = vpop.f32.mrf.mxu1  ;;  %v4595_v28 = vpop.f32.mrf.mxu0 }
 0x746   :  { %v1784_v18 = vmul.f32 %v4593_v4, %v4593_v4  ;;  %v1785_v15 = vmul.f32 %v4595_v28, %v4595_v28 }
 0x748   :  { %v1816_v39 = vmul.f32 %v1784_v18, %v4593_v4  ;;  %v1817_v25 = vmul.f32 %v1785_v15, %v4595_v28 }
 0x74a   :  { %v1848_v12 = vmul.f32 0.044715, %v1816_v39  ;;  %v1849_v35 = vmul.f32 0.044715, %v1817_v25  ;;  %v4603_v9 = vpop.f32.mrf.mxu3  ;;  %v4605_v53 = vpop.f32.mrf.mxu2 }
 0x74b   :  { %v1782_v42 = vmul.f32 %v4603_v9, %v4603_v9  ;;  %v1783_v5 = vmul.f32 %v4605_v53, %v4605_v53 }
 0x74c   :  { %v1880_v7 = vadd.f32 %v1848_v12, %v4593_v4  ;;  %v1881_v57 = vadd.f32 %v1849_v35, %v4595_v28 }
 0x74d   :  { %v1814_v10 = vmul.f32 %v1782_v42, %v4603_v9  ;;  %v1815_v30 = vmul.f32 %v1783_v5, %v4605_v53  ;;  %v1726_v19 = vpop.f32.mrf.mxu1  ;;  %v1755_v45 = vpop.f32.mrf.mxu0 }
 0x74e   :  { %v1912_v22 = vmul.f32 0.7978846, %v1880_v7  ;;  %v1913_v11 = vmul.f32 0.7978846, %v1881_v57  ;;  %v1788_v41 = vmul.f32 %v1726_v19, %v1726_v19  ;;  %v1789_v49 = vmul.f32 %v1755_v45, %v1755_v45 }
 0x74f   :  { %v1846_v21 = vmul.f32 0.044715, %v1814_v10  ;;  %v1847_v36 = vmul.f32 0.044715, %v1815_v30 }
 0x750   :  { %v1820_v23 = vmul.f32 %v1788_v41, %v1726_v19  ;;  %v1821_v24 = vmul.f32 %v1789_v49, %v1755_v45  ;;  %3643 = vtanh.f32 %v1912_v22 }
 0x751   :  { %v1878_v26 = vadd.f32 %v1846_v21, %v4603_v9  ;;  %v1879_v29 = vadd.f32 %v1847_v36, %v4605_v53  ;;  %3645 = vtanh.f32 %v1913_v11 }
 0x752   :  { %v1852_v38 = vmul.f32 0.044715, %v1820_v23  ;;  %v1853_v34 = vmul.f32 0.044715, %v1821_v24  ;;  %v1668_v20 = vpop.f32.mrf.mxu3  ;;  %v1697_v40 = vpop.f32.mrf.mxu2 }
 0x753   :  { %v1910_v32 = vmul.f32 0.7978846, %v1878_v26  ;;  %v1911_v17 = vmul.f32 0.7978846, %v1879_v29  ;;  %v1786_v59 = vmul.f32 %v1668_v20, %v1668_v20  ;;  %v1787_v52 = vmul.f32 %v1697_v40, %v1697_v40 }
 0x754   :  { %v1884_v0 = vadd.f32 %v1852_v38, %v1726_v19  ;;  %v1885_v43 = vadd.f32 %v1853_v34, %v1755_v45 }
 0x755   :  { %v1818_v47 = vmul.f32 %v1786_v59, %v1668_v20  ;;  %v1819_v58 = vmul.f32 %v1787_v52, %v1697_v40  ;;  %3647 = vtanh.f32 %v1910_v32 }
 0x756   :  { %v1916_v1 = vmul.f32 0.7978846, %v1884_v0  ;;  %v1917_v48 = vmul.f32 0.7978846, %v1885_v43  ;;  %v3644_v63 = vpop.eup %3643  ;;  %3649 = vtanh.f32 %v1911_v17 }
 0x757   :  { %v1850_v46 = vmul.f32 0.044715, %v1818_v47  ;;  %v1851_v61 = vmul.f32 0.044715, %v1819_v58  ;;  %v3646_v37 = vpop.eup %3645  ;;  %v1976_v50 = vadd.f32 1.0, %v3644_v63 }
 0x758   :  { %3651 = vtanh.f32 %v1916_v1  ;;  %v1977_v62 = vadd.f32 1.0, %v3646_v37 }
 0x759   :  { %3653 = vtanh.f32 %v1917_v48  ;;  %v1882_v14 = vadd.f32 %v1850_v46, %v1668_v20  ;;  %v1883_v16 = vadd.f32 %v1851_v61, %v1697_v40  ;;  %v2008_v25 = vmul.f32 0.5, %v1976_v50 }
 0x75a   :  { %v2009_v35 = vmul.f32 0.5, %v1977_v62 }
 0x75b   :  { %v1914_v55 = vmul.f32 0.7978846, %v1882_v14  ;;  %v1915_v6 = vmul.f32 0.7978846, %v1883_v16  ;;  %v3648_v54 = vpop.eup %3647  ;;  %v2040_v22 = vmul.f32 %v2008_v25, %v4593_v4 }
 0x75c   :  { %v3650_v18 = vpop.eup %3649  ;;  %v1974_v42 = vadd.f32 1.0, %v3648_v54  ;;  %v2041_v49 = vmul.f32 %v2009_v35, %v4595_v28 }
 0x75d   :  { %3655 = vtanh.f32 %v1914_v55  ;;  %v1975_v7 = vadd.f32 1.0, %v3650_v18 }
 0x75e   :  { %v3652_v15 = vpop.eup %3651  ;;  %3657 = vtanh.f32 %v1915_v6  ;;  %v2006_v21 = vmul.f32 0.5, %v1974_v42 }
 0x75f   :  { %v3654_v39 = vpop.eup %3653  ;;  %v1980_v12 = vadd.f32 1.0, %v3652_v15  ;;  %v2007_v24 = vmul.f32 0.5, %v1975_v7 }
 0x760   :  { %v1981_v5 = vadd.f32 1.0, %v3654_v39  ;;  %v2038_v17 = vmul.f32 %v2006_v21, %v4603_v9 }
 0x761   :  { %v2012_v57 = vmul.f32 0.5, %v1980_v12  ;;  %v2039_v4 = vmul.f32 %v2007_v24, %v4605_v53 }
 0x762   :  { %v2013_v10 = vmul.f32 0.5, %v1981_v5 }
 0x763   :  { %v3656_v30 = vpop.eup %3655  ;;  %v2044_v11 = vmul.f32 %v2012_v57, %v1726_v19 }
 0x764   :  { %v3658_v41 = vpop.eup %3657  ;;  %v2045_v36 = vmul.f32 %v2013_v10, %v1755_v45  ;;  %v1978_v23 = vadd.f32 1.0, %v3656_v30 }
 0x765   :  { %v1979_v26 = vadd.f32 1.0, %v3658_v41  ;;  %v2060_v29 = vpack.c.bf16 %v2044_v11, %v2040_v22 }
 0x766   :  { %v2010_v38 = vmul.f32 0.5, %v1978_v23  ;;  %v2061_v34 = vpack.c.bf16 %v2045_v36, %v2041_v49 }
 0x767   :  { %v2011_v32 = vmul.f32 0.5, %v1979_v26  ;;  %2399 = vmatmul.bf16.gmra.mxu1 %v2060_v29 }
 0x768   :  { %v2042_v59 = vmul.f32 %v2010_v38, %v1668_v20  ;;  %2428 = vmatmul.bf16.gmra.mxu0 %v2061_v34 }
 0x769   :  { %v2043_v19 = vmul.f32 %v2011_v32, %v1697_v40 }
 0x76a   :  { %v2058_v52 = vpack.c.bf16 %v2042_v59, %v2038_v17  ;;  %v2385_v45 = vpop.f32.mrf.mxu1 }
 0x76b   :  { %v2059_v0 = vpack.c.bf16 %v2043_v19, %v2039_v4 }
 0x76c   :  { %2341 = vmatmul.bf16.gmra.mxu3 %v2058_v52 }
 0x76d   :  { %2370 = vmatmul.bf16.gmra.mxu2 %v2059_v0  ;;  %v2414_v58 = vpop.f32.mrf.mxu0 }
 0x772   :  { %v2387_v61 = vpop.f32.mrf.mxu1 }
 0x775   :  { %v2327_v28 = vpop.f32.mrf.mxu3  ;;  %v2416_v40 = vpop.f32.mrf.mxu0 }
 0x776   :  { %v2356_v43 = vpop.f32.mrf.mxu2 }
 0x777   :  { %v2357_v47 = vadd.f32 %v2356_v43, %v2327_v28 }
 0x779   :  { %v2386_v1 = vadd.f32 %v2385_v45, %v2357_v47 }
 0x77b   :  { %v2415_v48 = vadd.f32 %v2414_v58, %v2386_v1 }
 0x77d   :  { %v2329_v63 = vpop.f32.mrf.mxu3  ;;  %v2434_v46 = vadd.f32 %v2415_v48, %v4301_v51 }
 0x77e   :  { %v2358_v9 = vpop.f32.mrf.mxu2 }
 0x77f   :  { %v2359_v20 = vadd.f32 %v2358_v9, %v2329_v63  ;;  %2444 = vadd.xlane.f32.xlu0 %v2434_v46 }
 0x781   :  { %v2388_v53 = vadd.f32 %v2387_v61, %v2359_v20  ;;  %v2390_v50 = vpop.f32.mrf.mxu1 }
 0x782   :  { %v2419_v55 = vpop.f32.mrf.mxu0 }
 0x783   :  { %v2417_v37 = vadd.f32 %v2416_v40, %v2388_v53 }
 0x785   :  { %v4623_v14 = vadd.f32 %v2417_v37, %v4305_v60 }
 0x787   :  { %2446 = vadd.xlane.f32.xlu1 %v4623_v14 }
 0x789   :  { %v2392_v15 = vpop.f32.mrf.mxu1 }
 0x78a   :  { %v2421_v25 = vpop.f32.mrf.mxu0 }
 0x78b   :  { %v2332_v16 = vpop.f32.mrf.mxu3 }
 0x78f   :  { %v2361_v6 = vpop.f32.mrf.mxu2 }
 0x790   :  { %v2362_v54 = vadd.f32 %v2361_v6, %v2332_v16 }
 0x791   :  { %v2395_v57 = vpop.f32.mrf.mxu1 }
 0x792   :  { %v2391_v18 = vadd.f32 %v2390_v50, %v2362_v54  ;;  %v2424_v22 = vpop.f32.mrf.mxu0 }
 0x793   :  { %v2334_v62 = vpop.f32.mrf.mxu3 }
 0x794   :  { %v2420_v51 = vadd.f32 %v2419_v55, %v2391_v18 }
 0x796   :  { %v4627_v39 = vadd.f32 %v2420_v51, %v4309_v44 }
 0x797   :  { %v2363_v12 = vpop.f32.mrf.mxu2 }
 0x798   :  { %v2364_v35 = vadd.f32 %v2363_v12, %v2334_v62  ;;  %2448 = vadd.xlane.f32.xlu2 %v4627_v39 }
 0x799   :  { %v2397_v23 = vpop.f32.mrf.mxu1 }
 0x79a   :  { %v2393_v60 = vadd.f32 %v2392_v15, %v2364_v35  ;;  %v2426_v26 = vpop.f32.mrf.mxu0 }
 0x79b   :  { %v2337_v42 = vpop.f32.mrf.mxu3 }
 0x79c   :  { %v2422_v5 = vadd.f32 %v2421_v25, %v2393_v60 }
 0x79e   :  { %v2437_v7 = vadd.f32 %v2422_v5, %v4313_v8  ;;  %v4636_v8 = vld [vmem:[%s4801_s7] sm:$0xf] }
 0x79f   :  { %v2366_v10 = vpop.f32.mrf.mxu2  ;;  %v2627_v34 = vperm.slane %v4636_v8, 0  ;;  %v2666_v5 = vperm.slane %v4636_v8, 3 }
 0x7a0   :  { %v2367_v30 = vadd.f32 %v2366_v10, %v2337_v42  ;;  %2450 = vadd.xlane.f32.xlu0 %v2437_v7  ;;  %v2653_v42 = vperm.slane %v4636_v8, 2 }
 0x7a2   :  { %v2396_v11 = vadd.f32 %v2395_v57, %v2367_v30 }
 0x7a3   :  { %v2339_v49 = vpop.f32.mrf.mxu3 }
 0x7a4   :  { %v2425_v41 = vadd.f32 %v2424_v22, %v2396_v11 }
 0x7a6   :  { %v2438_v44 = vadd.f32 %v2425_v41, %v4317_v56 }
 0x7a7   :  { %v2368_v21 = vpop.f32.mrf.mxu2 }
 0x7a8   :  { %v2369_v36 = vadd.f32 %v2368_v21, %v2339_v49  ;;  %2452 = vadd.xlane.f32.xlu1 %v2438_v44  ;;  %v2640_v49 = vperm.slane %v4636_v8, 1  ;;  %v2812_v21 = vmul.f32 %v4230_v13, %v4230_v13 }
 0x7aa   :  { %v2398_v24 = vadd.f32 %v2397_v23, %v2369_v36  ;;  %v2814_v23 = vsel %vm2813_vm5, %v2812_v21, 0.0 }
 0x7ac   :  { %v2427_v29 = vadd.f32 %v2426_v26, %v2398_v24 }
 0x7ae   :  { %v2439_v38 = vadd.f32 %v2427_v29, %v4321_v2 }
 0x7b0   :  { %2454 = vadd.xlane.f32.xlu2 %v2439_v38 }
 0x7c8   :  { %2638 = vperm.xlu2 %3520, %v2627_v34  }
 0x7e4   :  { %v2400_v56 = vpop.f32.mrf.mxu1 }
 0x7e5   :  { %v2429_v4 = vpop.f32.mrf.mxu0 }
 0x7ec   :  { %v2402_v48 = vpop.f32.mrf.mxu1 }
 0x7ed   :  { %v2431_v61 = vpop.f32.mrf.mxu0 }
 0x7ef   :  { %v2342_v32 = vpop.f32.mrf.mxu3 }
 0x7f0   :  { %v2371_v17 = vpop.f32.mrf.mxu2 }
 0x7f1   :  { %v2372_v59 = vadd.f32 %v2371_v17, %v2342_v32 }
 0x7f2   :  { %v2445_v19 = vpop.xlane.xlu0 %2444 }
 0x7f3   :  { %v2401_v52 = vadd.f32 %v2400_v56, %v2372_v59  ;;  %v2460_v0 = vmul.f32 %v2445_v19, %v4016_v33 }
 0x7f5   :  { %v4640_v28 = vsub.f32 %v2434_v46, %v2460_v0  ;;  %v2430_v2 = vadd.f32 %v2429_v4, %v2401_v52 }
 0x7f7   :  { %v2344_v45 = vpop.f32.mrf.mxu3  ;;  %v2476_v43 = vmul.f32 %v4640_v28, %v4640_v28  ;;  %v2440_v47 = vadd.f32 %v2430_v2, %v4325_v3 }
 0x7f8   :  { %v2373_v58 = vpop.f32.mrf.mxu2 }
 0x7f9   :  { %v2374_v1 = vadd.f32 %v2373_v58, %v2344_v45  ;;  %2484 = vadd.xlane.f32.xlu2 %v2476_v43  ;;  %2456 = vadd.xlane.f32.xlu0 %v2440_v47 }
 0x7fa   :  { %v2447_v63 = vpop.xlane.xlu1 %2446 }
 0x7fb   :  { %v2403_v9 = vadd.f32 %v2402_v48, %v2374_v1  ;;  %v2461_v20 = vmul.f32 %v2447_v63, %v4016_v33 }
 0x7fd   :  { %v4647_v46 = vsub.f32 %v4623_v14, %v2461_v20  ;;  %v2432_v53 = vadd.f32 %v2431_v61, %v2403_v9 }
 0x7ff   :  { %v2477_v40 = vmul.f32 %v4647_v46, %v4647_v46  ;;  %v2441_v37 = vadd.f32 %v2432_v53, %v4339_v27 }
 0x801   :  { %2486 = vadd.xlane.f32.xlu0 %v2477_v40  ;;  %2458 = vadd.xlane.f32.xlu1 %v2441_v37 }
 0x80b   :  { %v2449_v62 = vpop.xlane.xlu2 %2448 }
 0x80c   :  { %v2462_v18 = vmul.f32 %v2449_v62, %v4016_v33 }
 0x80e   :  { %v4664_v51 = vsub.f32 %v4627_v39, %v2462_v18 }
 0x810   :  { %v2478_v12 = vmul.f32 %v4664_v51, %v4664_v51 }
 0x813   :  { %v2451_v3 = vpop.xlane.xlu0 %2450 }
 0x814   :  { %v2463_v16 = vmul.f32 %v2451_v3, %v4016_v33 }
 0x816   :  { %v4653_v50 = vsub.f32 %v2437_v7, %v2463_v16 }
 0x818   :  { %v2479_v55 = vmul.f32 %v4653_v50, %v4653_v50 }
 0x81a   :  { %2632 = vperm.xlu1 %3519, %v2627_v34   ;;  %2490 = vadd.xlane.f32.xlu2 %v2479_v55 }
 0x81b   :  { %v2453_v14 = vpop.xlane.xlu1 %2452 }
 0x81c   :  { %v2464_v6 = vmul.f32 %v2453_v14, %v4016_v33 }
 0x81e   :  { %v4658_v54 = vsub.f32 %v2438_v44, %v2464_v6 }
 0x820   :  { %v2480_v27 = vmul.f32 %v4658_v54, %v4658_v54 }
 0x822   :  { %2492 = vadd.xlane.f32.xlu0 %v2480_v27 }
 0x823   :  { %v2455_v15 = vpop.xlane.xlu2 %2454 }
 0x824   :  { %v2465_v25 = vmul.f32 %v2455_v15, %v4016_v33 }
 0x826   :  { %v4669_v35 = vsub.f32 %v2439_v38, %v2465_v25 }
 0x828   :  { %v2481_v60 = vmul.f32 %v4669_v35, %v4669_v35 }
 0x82b   :  { %v4691_v36 = vpop.permute.xlu2 %2638 }
 0x844   :  { %2488 = vadd.xlane.f32.xlu1 %v2478_v12 }
 0x84c   :  { %2494 = vadd.xlane.f32.xlu1 %v2481_v60 }
 0x865   :  { %2658 = vperm.xlu1 %3519, %v2653_v42  }
 0x86c   :  { %v2457_v39 = vpop.xlane.xlu0 %2456  ;;  %v2485_v29 = vpop.xlane.xlu2 %2484 }
 0x86d   :  { %v2466_v7 = vmul.f32 %v2457_v39, %v4016_v33  ;;  %2671 = vperm.xlu1 %3519, %v2666_v5   ;;  %v2500_v8 = vmul.f32 %v2485_v29, %v4016_v33 }
 0x86f   :  { %v4676_v57 = vsub.f32 %v2440_v47, %v2466_v7  ;;  %v2508_v17 = vadd.f32 1e-05, %v2500_v8 }
 0x871   :  { %v2482_v10 = vmul.f32 %v4676_v57, %v4676_v57  ;;  %vm2522_vm10 = vweird.f32 %v2508_v17 }
 0x873   :  { %2496 = vadd.xlane.f32.xlu2 %v2482_v10 }
 0x874   :  { %v2459_v30 = vpop.xlane.xlu1 %2458  ;;  %v2487_v26 = vpop.xlane.xlu0 %2486 }
 0x875   :  { %v2467_v22 = vmul.f32 %v2459_v30, %v4016_v33  ;;  %v2501_v38 = vmul.f32 %v2487_v26, %v4016_v33 }
 0x877   :  { %v4681_v11 = vsub.f32 %v2441_v37, %v2467_v22  ;;  %v2509_v32 = vadd.f32 1e-05, %v2501_v38 }
 0x879   :  { %v2483_v41 = vmul.f32 %v4681_v11, %v4681_v11  ;;  %3659 = vrsqrt.f32 %v2509_v32  ;;  %vm2532_vm8 = vweird.f32 %v2509_v32 }
 0x87a   :  { %3661 = vrsqrt.f32 %v2508_v17 }
 0x87b   :  { %2498 = vadd.xlane.f32.xlu0 %v2483_v41 }
 0x87f   :  { %v3660_v0 = vpop.eup %3659 }
 0x880   :  { %v3662_v43 = vpop.eup %3661  ;;  %v2527_v47 = vmul.f32 %v3660_v0, %v2509_v32  ;;  %vm2533_vm6 = vweird.f32 %v3660_v0 }
 0x881   :  { %v2517_v48 = vmul.f32 %v3662_v43, %v2508_v17  ;;  %vm2523_vm7 = vweird.f32 %v3662_v43  ;;  %vm2534_vm9 = vmor %vm2532_vm8, %vm2533_vm6 }
 0x882   :  { %v2528_v20 = vmul.f32 %v3660_v0, %v2527_v47  ;;  %vm4715_vm11 = vmor %vm2522_vm10, %vm2523_vm7 }
 0x883   :  { %v2518_v53 = vmul.f32 %v3662_v43, %v2517_v48 }
 0x884   :  { %v2529_v37 = vmul.f32 0.5, %v2528_v20  ;;  %v3489_v20 = vld [vmem:[#allocation9 + $0x30] sm:$0xff] }
 0x885   :  { %v2519_v16 = vmul.f32 0.5, %v2518_v53 }
 0x886   :  { %v2530_v27 = vsub.f32 1.5, %v2529_v37 }
 0x887   :  { %v2520_v18 = vsub.f32 1.5, %v2519_v16 }
 0x888   :  { %v2531_v60 = vmul.f32 %v3660_v0, %v2530_v27 }
 0x88a   :  { %v2535_v30 = vsel %vm2534_vm9, %v3660_v0, %v2531_v60 }
 0x88b   :  { %2651 = vperm.xlu2 %3520, %v2640_v49   ;;  %v2597_v29 = vmul.f32 %v2535_v30, %v4647_v46 }
 0x88c   :  { %v4687_v44 = vpop.permute.xlu1 %2632 }
 0x88d   :  { %v2491_v52 = vpop.xlane.xlu2 %2490 }
 0x88e   :  { %v2503_v2 = vmul.f32 %v2491_v52, %v4016_v33 }
 0x88f   :  { %2645 = vperm.xlu0 %3521, %v2640_v49  }
 0x890   :  { %v4699_v58 = vadd.f32 1e-05, %v2503_v2  ;;  %v4739_v2 = vld [vmem:[%s4811_s17] ss:$0 sm:$0xff] }
 0x892   :  { %vm2552_vm4 = vweird.f32 %v4699_v58 }
 0x893   :  { %2664 = vperm.xlu2 %3520, %v2653_v42  }
 0x897   :  { %3522 = vset.pattern.permute.xlu0 %v4232_v31  ;;  %v2493_v31 = vpop.xlane.xlu0 %2492 }
 0x898   :  { %v2504_v59 = vmul.f32 %v2493_v31, %v4016_v33 }
 0x89a   :  { %v2512_v19 = vadd.f32 1e-05, %v2504_v59 }
 0x89b   :  { %2677 = vperm.xlu2 %3520, %v2666_v5   ;;  %v2521_v5 = vmul.f32 %v3662_v43, %v2520_v18 }
 0x89c   :  { %vm2562_vm14 = vweird.f32 %v2512_v19 }
 0x8b7   :  { %v2489_v24 = vpop.xlane.xlu1 %2488 }
 0x8b8   :  { %v2502_v45 = vmul.f32 %v2489_v24, %v4016_v33  ;;  %v2525_v24 = vsel %vm4715_vm11, %v3662_v43, %v2521_v5 }
 0x8b9   :  { %2815 = vadd.xlane.f32.xlu0 %v2814_v23 }
 0x8ba   :  { %v4701_v63 = vadd.f32 1e-05, %v2502_v45 }
 0x8bc   :  { %vm2542_vm6 = vweird.f32 %v4701_v63 }
 0x8bf   :  { %v2495_v34 = vpop.xlane.xlu1 %2494 }
 0x8c0   :  { %v2505_v56 = vmul.f32 %v2495_v34, %v4016_v33  ;;  %v4728_v34 = vld [vmem:[%s4810_s16] ss:$0 sm:$0xff] }
 0x8c1   :  { %v2608_v46 = vmul.f32 %v4728_v34, %v2597_v29  ;;  %v3485_v29 = vld [vmem:[#allocation9 + $0x10] sm:$0xff] }
 0x8c2   :  { %v2513_v4 = vadd.f32 1e-05, %v2505_v56  ;;  %v2596_v56 = vmul.f32 %v2525_v24, %v4640_v28 }
 0x8c3   :  { %v2619_v48 = vadd.f32 %v4739_v2, %v2608_v46 }
 0x8c4   :  { %3663 = vrsqrt.f32 %v2513_v4  ;;  %vm2572_vm13 = vweird.f32 %v2513_v4  ;;  %v2607_v47 = vmul.f32 %v4728_v34, %v2596_v56 }
 0x8c5   :  { %3665 = vrsqrt.f32 %v2512_v19  ;;  %v2680_v16 = vmul.f32 %v4691_v36, %v2619_v48 }
 0x8c6   :  { %3667 = vrsqrt.f32 %v4699_v58 }
 0x8c7   :  { %3669 = vrsqrt.f32 %v4701_v63 }
 0x8ca   :  { %v3664_v1 = vpop.eup %3663 }
 0x8cb   :  { %v3666_v9 = vpop.eup %3665  ;;  %v2567_v61 = vmul.f32 %v3664_v1, %v2513_v4  ;;  %vm2573_vm12 = vweird.f32 %v3664_v1  ;;  %v3490_v4 = vld [vmem:[#allocation9 + $0x38] sm:$0xff] }
 0x8cc   :  { %v2557_v40 = vmul.f32 %v3666_v9, %v2512_v19  ;;  %v4705_v14 = vpop.eup %3667  ;;  %vm2563_vm1 = vweird.f32 %v3666_v9  ;;  %vm2574_vm15 = vmor %vm2572_vm13, %vm2573_vm12  ;;  %2799 = vmatpush.bf16.msra.mxu3 %v3490_v4  ;;  %vm2743_vm13 = vcmask 1041409  }
 0x8cd   :  { %v2568_v3 = vmul.f32 %v3664_v1, %v2567_v61  ;;  %v4707_v6 = vpop.eup %3669  ;;  %v2547_v15 = vmul.f32 %v4705_v14, %v4699_v58  ;;  %vm2564_vm0 = vmor %vm2562_vm14, %vm2563_vm1  ;;  %vm2553_vm2 = vweird.f32 %v4705_v14  ;;  %vm2745_vm14 = vcmask 1042434  }
 0x8ce   :  { %v2558_v55 = vmul.f32 %v3666_v9, %v2557_v40  ;;  %v2537_v12 = vmul.f32 %v4707_v6, %v4701_v63  ;;  %vm2543_vm3 = vweird.f32 %v4707_v6  ;;  %vm4752_vm5 = vmor %vm2552_vm4, %vm2553_vm2 }
 0x8cf   :  { %v2569_v62 = vmul.f32 0.5, %v2568_v3  ;;  %v2548_v39 = vmul.f32 %v4705_v14, %v2547_v15  ;;  %vm4758_vm7 = vmor %vm2542_vm6, %vm2543_vm3  ;;  %v2618_v3 = vadd.f32 %v4739_v2, %v2607_v47 }
 0x8d0   :  { %v2559_v25 = vmul.f32 0.5, %v2558_v55  ;;  %v2538_v10 = vmul.f32 %v4707_v6, %v2537_v12  ;;  %2800 = vmatpush.bf16.msra.mxu3 %v3489_v20  ;;  %v3488_v55 = vld [vmem:[#allocation9 + $0x28] sm:$0xff] }
 0x8d1   :  { %v2570_v42 = vsub.f32 1.5, %v2569_v62  ;;  %v2549_v23 = vmul.f32 0.5, %v2548_v39  ;;  %v2679_v15 = vmul.f32 %v4687_v44, %v2618_v3  ;;  %v3487_v39 = vld [vmem:[#allocation9 + $0x20] sm:$0xff] }
 0x8d2   :  { %v2560_v7 = vsub.f32 1.5, %v2559_v25  ;;  %v2539_v38 = vmul.f32 0.5, %v2538_v10 }
 0x8d3   :  { %v2571_v49 = vmul.f32 %v3664_v1, %v2570_v42  ;;  %v2550_v32 = vsub.f32 1.5, %v2549_v23  ;;  %v3486_v23 = vld [vmem:[#allocation9 + $0x18] sm:$0xff] }
 0x8d4   :  { %v2561_v26 = vmul.f32 %v3666_v9, %v2560_v7  ;;  %v2540_v59 = vsub.f32 1.5, %v2539_v38  ;;  %2801 = vmatpush.bf16.msra.mxu3 %v3488_v55 }
 0x8d5   :  { %v2575_v31 = vsel %vm2574_vm15, %v3664_v1, %v2571_v49  ;;  %v2551_v28 = vmul.f32 %v4705_v14, %v2550_v32  ;;  %vm2747_vm15 = vcmask 1043459  }
 0x8d6   :  { %v2565_v17 = vsel %vm2564_vm0, %v3666_v9, %v2561_v26  ;;  %v2601_v0 = vmul.f32 %v2575_v31, %v4669_v35  ;;  %v2541_v35 = vmul.f32 %v4707_v6, %v2540_v59  ;;  %vm2829_vm0 = vcmask 1043456  }
 0x8d7   :  { %v2600_v45 = vmul.f32 %v2565_v17, %v4658_v54  ;;  %v2555_v58 = vsel %vm4752_vm5, %v4705_v14, %v2551_v28  ;;  %v2659_v12 = vpop.permute.xlu1 %2658 }
 0x8d8   :  { %v2612_v54 = vmul.f32 %v4728_v34, %v2601_v0  ;;  %v2545_v63 = vsel %vm4758_vm7, %v4707_v6, %v2541_v35  ;;  %v2599_v14 = vmul.f32 %v2555_v58, %v4653_v50  ;;  %v2687_v6 = vadd.f32 %v2680_v16, %v2679_v15  ;;  %2802 = vmatpush.bf16.msra.mxu3 %v3487_v39 }
 0x8d9   :  { %v2611_v53 = vmul.f32 %v4728_v34, %v2600_v45  ;;  %v2598_v42 = vmul.f32 %v2545_v63, %v4664_v51 }
 0x8da   :  { %v2623_v18 = vadd.f32 %v4739_v2, %v2612_v54  ;;  %v2610_v44 = vmul.f32 %v4728_v34, %v2599_v14 }
 0x8db   :  { %v2622_v25 = vadd.f32 %v4739_v2, %v2611_v53  ;;  %v2609_v49 = vmul.f32 %v4728_v34, %v2598_v42 }
 0x8dc   :  { %v2621_v26 = vadd.f32 %v4739_v2, %v2610_v44  ;;  %2803 = vmatpush.bf16.msra.mxu3 %v3486_v23 }
 0x8dd   :  { %v2683_v7 = vmul.f32 %v2659_v12, %v2622_v25  ;;  %v2620_v31 = vadd.f32 %v4739_v2, %v2609_v49 }
 0x8df   :  { %v2672_v54 = vpop.permute.xlu1 %2671 }
 0x8e0   :  { %2804 = vmatpush.bf16.msra.mxu3 %v3485_v29 }
 0x8e6   :  { %v2497_v22 = vpop.xlane.xlu2 %2496 }
 0x8e7   :  { %v2506_v21 = vmul.f32 %v2497_v22, %v4016_v33 }
 0x8e9   :  { %v4723_v8 = vadd.f32 1e-05, %v2506_v21  ;;  %v2688_v21 = vrot.slane %v2687_v6, 4 }
 0x8eb   :  { %3671 = vrsqrt.f32 %v4723_v8  ;;  %vm2582_vm9 = vweird.f32 %v4723_v8  ;;  %v2689_v32 = vadd.f32 %v2688_v21, %v2687_v6 }
 0x8ee   :  { %v4733_v52 = vpop.permute.xlu2 %2651  ;;  %v2499_v19 = vpop.xlane.xlu0 %2498 }
 0x8ef   :  { %v2507_v43 = vmul.f32 %v2499_v19, %v4016_v33  ;;  %v2682_v17 = vmul.f32 %v4733_v52, %v2621_v26  ;;  %v3483_v52 = vld [vmem:[#allocation9] sm:$0xff] }
 0x8f1   :  { %v3672_v1 = vpop.eup %3671  ;;  %v2515_v9 = vadd.f32 1e-05, %v2507_v43  ;;  %v2690_v43 = vrot.slane %v2689_v32, 2 }
 0x8f2   :  { %v2577_v33 = vmul.f32 %v3672_v1, %v4723_v8  ;;  %vm2583_vm8 = vweird.f32 %v3672_v1 }
 0x8f3   :  { %3673 = vrsqrt.f32 %v2515_v9  ;;  %vm2584_vm10 = vmor %vm2582_vm9, %vm2583_vm8  ;;  %vm2592_vm12 = vweird.f32 %v2515_v9  ;;  %v2691_v20 = vadd.f32 %v2690_v43, %v2689_v32  ;;  %vm2864_vm8 = vcmask 25600  }
 0x8f4   :  { %v2578_v37 = vmul.f32 %v3672_v1, %v2577_v33 }
 0x8f5   :  { %v2692_v3 = vrot.slane %v2691_v20, 1 }
 0x8f6   :  { %v2579_v27 = vmul.f32 0.5, %v2578_v37  ;;  %v2665_v62 = vpop.permute.xlu2 %2664 }
 0x8f7   :  { %v2684_v36 = vmul.f32 %v2665_v62, %v2623_v18  ;;  %v2693_v62 = vadd.f32 %v2692_v3, %v2691_v20 }
 0x8f8   :  { %v2580_v60 = vsub.f32 1.5, %v2579_v27 }
 0x8f9   :  { %v3674_v5 = vpop.eup %3673  ;;  %v2701_v41 = vadd.f32 %v2684_v36, %v2683_v7 }
 0x8fa   :  { %v2581_v10 = vmul.f32 %v3672_v1, %v2580_v60  ;;  %v2587_v30 = vmul.f32 %v3674_v5, %v2515_v9  ;;  %vm2593_vm11 = vweird.f32 %v3674_v5 }
 0x8fb   :  { %v2702_v8 = vrot.slane %v2701_v41, 4  ;;  %vm2594_vm1 = vmor %vm2592_vm12, %vm2593_vm11 }
 0x8fc   :  { %v2585_v22 = vsel %vm2584_vm10, %v3672_v1, %v2581_v10  ;;  %v2588_v50 = vmul.f32 %v3674_v5, %v2587_v30 }
 0x8fd   :  { %v2602_v24 = vmul.f32 %v2585_v22, %v4676_v57  ;;  %v3484_v57 = vld [vmem:[#allocation9 + $0x8] sm:$0xff]  ;;  %v2703_v19 = vadd.f32 %v2702_v8, %v2701_v41 }
 0x8fe   :  { %v2589_v51 = vmul.f32 0.5, %v2588_v50  ;;  %2805 = vmatpush.bf16.msra.mxu3 %v3484_v57  ;;  %v2678_v61 = vpop.permute.xlu2 %2677 }
 0x8ff   :  { %v2613_v4 = vmul.f32 %v4728_v34, %v2602_v24  ;;  %v2704_v35 = vrot.slane %v2703_v19, 2 }
 0x900   :  { %v2590_v38 = vsub.f32 1.5, %v2589_v51 }
 0x901   :  { %v2646_v56 = vpop.permute.xlu0 %2645  ;;  %v2624_v1 = vadd.f32 %v4739_v2, %v2613_v4  ;;  %v2705_v58 = vadd.f32 %v2704_v35, %v2703_v19 }
 0x902   :  { %v2591_v46 = vmul.f32 %v3674_v5, %v2590_v38  ;;  %v2681_v59 = vmul.f32 %v2646_v56, %v2620_v31  ;;  %2806 = vmatpush.bf16.msra.mxu3 %v3483_v52 }
 0x903   :  { %v2685_v40 = vmul.f32 %v2672_v54, %v2624_v1  ;;  %v2845_v1 = vstv %s4813_s19 }
 0x904   :  { %v2595_v0 = vsel %vm2594_vm1, %v3674_v5, %v2591_v46  ;;  %v2694_v45 = vadd.f32 %v2682_v17, %v2681_v59 }
 0x905   :  { %v2603_v28 = vmul.f32 %v2595_v0, %v4681_v11 }
 0x906   :  { %v2695_v47 = vrot.slane %v2694_v45, 4 }
 0x907   :  { %v2614_v48 = vmul.f32 %v4728_v34, %v2603_v28  ;;  %v2706_v34 = vrot.slane %v2705_v58, 1 }
 0x908   :  { %v2696_v9 = vadd.f32 %v2695_v47, %v2694_v45 }
 0x909   :  { %v2625_v33 = vadd.f32 %v4739_v2, %v2614_v48  ;;  %v2707_v12 = vadd.f32 %v2706_v34, %v2705_v58  ;;  %v2715_v2 = vpack.c.bf16 %v2693_v62, %v2693_v62  ;;  %v2846_v48 = vmul.f32 1.442695, %v2845_v1 }
 0x90a   :  { %v2697_v53 = vrot.slane %v2696_v9, 2 }
 0x90b   :  { %v2686_v37 = vmul.f32 %v2678_v61, %v2625_v33  ;;  %v2717_v42 = vpack.c.bf16 %v2707_v12, %v2707_v12  ;;  %v2739_v5 = vunpack.c.l.b16 %v2715_v2 }
 0x90c   :  { %v2698_v11 = vadd.f32 %v2697_v53, %v2696_v9 }
 0x90d   :  { %v2708_v16 = vadd.f32 %v2686_v37, %v2685_v40  ;;  %v2741_v10 = vunpack.c.l.b16 %v2717_v42 }
 0x90e   :  { %v2699_v63 = vrot.slane %v2698_v11, 1 }
 0x90f   :  { %v2709_v55 = vrot.slane %v2708_v16, 4 }
 0x910   :  { %v2700_v27 = vadd.f32 %v2699_v63, %v2698_v11 }
 0x911   :  { %v2710_v18 = vadd.f32 %v2709_v55, %v2708_v16 }
 0x912   :  { %v2716_v25 = vpack.c.bf16 %v2700_v27, %v2700_v27 }
 0x913   :  { %v2711_v15 = vrot.slane %v2710_v18, 2 }
 0x914   :  { %v2740_v36 = vunpack.c.l.b16 %v2716_v25 }
 0x915   :  { %v2712_v14 = vadd.f32 %v2711_v15, %v2710_v18 }
 0x916   :  { %v2744_v7 = vsel %vm2743_vm13, %v2740_v36, %v2739_v5 }
 0x917   :  { %v2713_v60 = vrot.slane %v2712_v14, 1  ;;  %v2746_v44 = vsel %vm2745_vm14, %v2741_v10, %v2744_v7 }
 0x919   :  { %v2714_v6 = vadd.f32 %v2713_v60, %v2712_v14 }
 0x91b   :  { %v2718_v39 = vpack.c.bf16 %v2714_v6, %v2714_v6 }
 0x91d   :  { %v2742_v30 = vunpack.c.l.b16 %v2718_v39 }
 0x91f   :  { %v2748_v22 = vsel %vm2747_vm15, %v2742_v30, %v2746_v44 }
 0x920   :  { %v2749_v50 = vpack.c.b16 %v2748_v22, %v2748_v22 }
 0x922   :  { %2807 = vmatmul.bf16.vlgmr.msra.gmra.mxu3 %v2749_v50 }
 0x92c   :  { %v2816_v51 = vpop.xlane.xlu0 %2815 }
 0x92d   :  { %3675 = vrsqrt.f32 %v2816_v51  ;;  %vm2823_vm6 = vweird.f32 %v2816_v51 }
 0x933   :  { %v3676_v24 = vpop.eup %3675 }
 0x934   :  { %v2818_v29 = vmul.f32 %v3676_v24, %v2816_v51  ;;  %vm2824_vm4 = vweird.f32 %v3676_v24 }
 0x935   :  { %vm2825_vm7 = vmor %vm2823_vm6, %vm2824_vm4 }
 0x936   :  { %v2819_v38 = vmul.f32 %v3676_v24, %v2818_v29 }
 0x938   :  { %v2820_v32 = vmul.f32 0.5, %v2819_v38 }
 0x93a   :  { %v2821_v46 = vsub.f32 1.5, %v2820_v32 }
 0x93c   :  { %v2822_v57 = vmul.f32 %v3676_v24, %v2821_v46 }
 0x93e   :  { %v2826_v45 = vsel %vm2825_vm7, %v3676_v24, %v2822_v57 }
 0x93f   :  { %v2827_v28 = vmul.f32 %v2826_v45, %v4230_v13 }
 0x941   :  { %v2848_v47 = vpack.c.bf16 %v2827_v28, %v2827_v28 }
 0x9a5   :  { %v2808_v41 = vpop.f32.mrf.mxu3 }
 0x9a6   :  { %v2828_v49 = vmul.f32 %v2808_v41, %v2808_v41 }
 0x9a8   :  { %v2830_v21 = vsel %vm2829_vm0, %v2828_v49, 0.0 }
 0x9a9   :  { %2831 = vadd.xlane.f32.xlu1 %v2830_v21 }
 0x9ad   :  { %v2810_v23 = vpop.f32.mrf.mxu3 }
 0xa1c   :  { %v2832_v26 = vpop.xlane.xlu1 %2831 }
 0xa1d   :  { %3677 = vrsqrt.f32 %v2832_v26  ;;  %vm2839_vm3 = vweird.f32 %v2832_v26 }
 0xa1e   :  { %3679 = vpow2.f32 %v2846_v48 }
 0xa23   :  { %v3678_v8 = vpop.eup %3677 }
 0xa24   :  { %v2834_v31 = vmul.f32 %v3678_v8, %v2832_v26  ;;  %vm2840_vm2 = vweird.f32 %v3678_v8  ;;  %v3680_v52 = vpop.eup %3679 }
 0xa25   :  { %vm2841_vm5 = vmor %vm2839_vm3, %vm2840_vm2 }
 0xa26   :  { %v2835_v56 = vmul.f32 %v3678_v8, %v2834_v31 }
 0xa28   :  { %v2836_v17 = vmul.f32 0.5, %v2835_v56 }
 0xa2a   :  { %v2837_v59 = vsub.f32 1.5, %v2836_v17 }
 0xa2c   :  { %v2838_v4 = vmul.f32 %v3678_v8, %v2837_v59 }
 0xa2e   :  { %v2842_v19 = vsel %vm2841_vm5, %v3678_v8, %v2838_v4 }
 0xa2f   :  { %v2843_v0 = vmul.f32 %v2842_v19, %v2808_v41 }
 0xa31   :  { %v2849_v43 = vpack.c.bf16 %v2843_v0, %v2843_v0 }
 0xa33   :  { %2857 = vmatpush.bf16.xpose.msra.mxu2 %v2849_v43 }
 0xa3a   :  { %2858 = vmatmul.bf16.vlgmr.msra.gmra.mxu2 %v2848_v47 }
 0xabd   :  { %v2859_v35 = vpop.f32.mrf.mxu2 }
 0xabe   :  { %v2863_v9 = vmul.f32 %v3680_v52, %v2859_v35 }
 0xac0   :  { %2865 = vst.msk [vmem:[#allocation11] sm:$0x3] %vm2864_vm8, %v2863_v9 }
 0xac1   :  { %2876 = dma.vmem_to_hbm [thread:$0]  %s2872_s21, 32, %s2874_s24, [#allocation5]  }
 0xac5   :  { %v2861_v13 = vpop.f32.mrf.mxu2 }
 0xac6   :  { %3807 = dma.done.wait [#allocation5], 32  }
 0xac7   :  { %3808 = vsyncadd [#allocation5], 4294967264 }
 0xac8   :  { %2881 = vsyncpa [#allocation4], 1 }
 0xac9   :  { %2882 = vsyncpa [#allocation7], 1 }
 0xaca   :  { %2883 = vsyncpa [#allocation10], 1 }
 0xacb   :  { %2884 = vsyncpa [#allocation5], 1 }

</bundles_post_ra>
